<compile_context>
chip_gen: v5e
topology: v5e:2x2
jax: 0.10.0
libtpu: 0.0.40
codegen_flags: <defaults>
</compile_context>

<pallas_src>
import jax
import jax.numpy as jnp
from jax import lax
from jax.experimental import pallas as pl
from jax.experimental.pallas import tpu as pltpu


def med_convblock_kernel(x_ref, w1_ref, b1_ref, w2_ref, b2_ref, w3_ref, b3_ref,
                         o_ref, pad_ref):
    """One batch element per grid step. All three convs + BN + ReLU + residual fused."""
    _, H, W, C = x_ref.shape
    M = w1_ref.shape[1]

    # ---- conv1: 1x1 (C -> M), BN scale pre-folded into w1, + bias + relu ----
    x_bf = x_ref[0].reshape(H * W, C).astype(jnp.bfloat16)
    h1 = jnp.dot(x_bf, w1_ref[...], preferred_element_type=jnp.float32)   # (H*W, M)
    h1 = jnp.maximum(h1 + b1_ref[...], 0.0)

    # ---- conv2: 3x3, stride 1, padding 1 (M -> M) as ONE im2col matmul ------
    # Zero-padded VMEM scratch supplies the zero-padding semantics; 9 static
    # slices replace roll+mask, and a single (H*W, 9M) @ (9M, M) matmul
    # replaces 9 small matmuls.  Scratch is re-zeroed every grid step.
    pad_ref[...] = jnp.zeros_like(pad_ref)
    pad_ref[1:H + 1, 1:W + 1, :] = h1.reshape(H, W, M)
    taps = [pad_ref[kh:kh + H, kw:kw + W, :]             # each (H, W, M)
            for kh in range(3) for kw in range(3)]
    im2col = jnp.concatenate(taps, axis=-1).reshape(H * W, 9 * M)
    h2 = jnp.dot(im2col.astype(jnp.bfloat16), w2_ref[...],
                 preferred_element_type=jnp.float32)                      # (H*W, M)
    h2 = jnp.maximum(h2 + b2_ref[...], 0.0)

    # ---- conv3: 1x1 (M -> C) + bias + residual + relu -----------------------
    h3 = jnp.dot(h2.astype(jnp.bfloat16), w3_ref[...],
                 preferred_element_type=jnp.float32)                      # (H*W, C)
    h3 = h3 + b3_ref[...] + x_ref[0].reshape(H * W, C)   # residual re-read in f32
    o_ref[...] = jnp.maximum(h3, 0.0).reshape(1, H, W, C).astype(o_ref.dtype)


def med_convblock(x, params):
    """x: (N, H, W, C) float32, NHWC."""
    N, H, W, C = x.shape
    M = params["w1"].shape[1]

    # Host-side: fold BN scales into the conv weights and cast matmul weights to bf16.
    w1f = (params["w1"] * params["s1"]).astype(jnp.bfloat16)                      # (C, M)
    w2f = (params["w2"] * params["s2"].reshape(1, 1, 1, M)).reshape(9 * M, M)
    w2f = w2f.astype(jnp.bfloat16)                                                # (9M, M)
    w3f = (params["w3"] * params["s3"]).astype(jnp.bfloat16)                      # (M, C)
    b1, b2, b3 = params["b1"], params["b2"], params["b3"]                         # f32 (1, ch)

    args = (w1f, b1, w2f, b2, w3f, b3)

    def full_spec(a):
        return pl.BlockSpec(a.shape, lambda n, nd=a.ndim: (0,) * nd)

    in_specs = [pl.BlockSpec((1, H, W, C), lambda n: (n, 0, 0, 0))]
    in_specs += [full_spec(a) for a in args]
    out_specs = pl.BlockSpec((1, H, W, C), lambda n: (n, 0, 0, 0))

    return pl.pallas_call(
        med_convblock_kernel,
        out_shape=jax.ShapeDtypeStruct(x.shape, x.dtype),
        grid=(N,),
        in_specs=in_specs,
        out_specs=out_specs,
        scratch_shapes=[pltpu.VMEM((H + 2, W + 2, M), jnp.float32)],
        compiler_params=pltpu.CompilerParams(
            dimension_semantics=("parallel",)),
    )(x, *args)


# ----------------------------- parameter setup -----------------------------

def make_bn_affine(key, ch, eps=1e-6):
    # eps=1e-6 matches the module's norm_layer=partial(nn.BatchNorm2d, eps=1e-6)
    kg, kb, km, kv = jax.random.split(key, 4)
    gamma = jax.random.uniform(kg, (ch,), minval=0.5, maxval=1.5)
    beta = jax.random.normal(kb, (ch,)) * 0.1
    running_mean = jax.random.normal(km, (ch,)) * 0.1
    running_var = jax.random.uniform(kv, (ch,), minval=0.5, maxval=1.5)
    scale = gamma / jnp.sqrt(running_var + eps)
    bias = beta - running_mean * scale
    return (scale.reshape(1, ch).astype(jnp.float32),
            bias.reshape(1, ch).astype(jnp.float32))


def make_params(key, inplanes):
    C = inplanes
    M = C // 4
    ks = jax.random.split(key, 6)
    w1 = (jax.random.normal(ks[0], (C, M)) * 0.1).astype(jnp.float32)        # 1x1: (Cin, Cout)
    w2 = (jax.random.normal(ks[1], (3, 3, M, M)) * 0.1).astype(jnp.float32)  # 3x3: (kh, kw, Cin, Cout)
    w3 = (jax.random.normal(ks[2], (M, C)) * 0.1).astype(jnp.float32)        # 1x1: (Cin, Cout)
    s1, b1 = make_bn_affine(ks[3], M)
    s2, b2 = make_bn_affine(ks[4], M)
    s3, b3 = make_bn_affine(ks[5], C)
    return dict(w1=w1, s1=s1, b1=b1, w2=w2, s2=s2, b2=b2, w3=w3, s3=s3, b3=b3)


# ------------------------- pure-JAX reference check -------------------------

def reference(x, params):
    dn = ("NHWC", "HWIO", "NHWC")
    C = x.shape[-1]
    M = params["w1"].shape[1]

    y = lax.conv_general_dilated(x, params["w1"].reshape(1, 1, C, M),
                                 (1, 1), "VALID", dimension_numbers=dn)
    y = jnp.maximum(y * params["s1"] + params["b1"], 0.0)
    y = lax.conv_general_dilated(y, params["w2"],
                                 (1, 1), "SAME", dimension_numbers=dn)
    y = jnp.maximum(y * params["s2"] + params["b2"], 0.0)
    y = lax.conv_general_dilated(y, params["w3"].reshape(1, 1, M, C),
                                 (1, 1), "VALID", dimension_numbers=dn)
    y = y * params["s3"] + params["b3"]
    y = jnp.maximum(y + x, 0.0)
    return y


if __name__ == "__main__":
    key = jax.random.PRNGKey(0)
    k_x, k_p = jax.random.split(key)

    # inplanes = 512 -> med_planes = 128: lane-dense output store and matmul dims.
    N, H, W, C = 2, 16, 16, 512
    x = jax.random.normal(k_x, (N, H, W, C), dtype=jnp.float32)
    params = make_params(k_p, C)

    out = jax.block_until_ready(med_convblock(x, params))
    ref = jax.block_until_ready(reference(x, params))

    assert out.shape == ref.shape and out.dtype == ref.dtype
    # bf16 matmul operands with f32 accumulation: compare with a bf16-appropriate
    # tolerance relative to the output scale (structural bugs give O(1) errors).
    rel_err = float(jnp.max(jnp.abs(out - ref)) / (jnp.max(jnp.abs(ref)) + 1e-6))
    assert rel_err < 5e-2, rel_err

    print("KERNEL_OK")
</pallas_src>

<mosaic_0001>
module attributes {stable_mosaic.version = 11 : i64} {
  func.func @med_convblock_kernel(%arg0: i32, %arg1: memref<1x16x16x512xf32, #tpu.memory_space<vmem>>, %arg2: memref<512x128xbf16, #tpu.memory_space<vmem>>, %arg3: memref<1x128xf32, #tpu.memory_space<vmem>>, %arg4: memref<1152x128xbf16, #tpu.memory_space<vmem>>, %arg5: memref<1x128xf32, #tpu.memory_space<vmem>>, %arg6: memref<128x512xbf16, #tpu.memory_space<vmem>>, %arg7: memref<1x512xf32, #tpu.memory_space<vmem>>, %arg8: memref<1x16x16x512xf32, #tpu.memory_space<vmem>>, %arg9: memref<18x18x128xf32, #tpu.memory_space<vmem>>) attributes {dimension_semantics = [#tpu.dimension_semantics<parallel>], iteration_bounds = array<i64: 2>, scalar_prefetch = 0 : i64, scratch_operands = 1 : i64, tpu.core_type = #tpu.core_type<tc>, window_params = [{transform_indices = @transform_0, window_bounds = array<i64: 1, 16, 16, 512>}, {pipeline_mode = #tpu.pipeline_mode<synchronous>, transform_indices = @transform_1, window_bounds = array<i64: 512, 128>}, {pipeline_mode = #tpu.pipeline_mode<synchronous>, transform_indices = @transform_2, window_bounds = array<i64: 1, 128>}, {pipeline_mode = #tpu.pipeline_mode<synchronous>, transform_indices = @transform_3, window_bounds = array<i64: 1152, 128>}, {pipeline_mode = #tpu.pipeline_mode<synchronous>, transform_indices = @transform_4, window_bounds = array<i64: 1, 128>}, {pipeline_mode = #tpu.pipeline_mode<synchronous>, transform_indices = @transform_5, window_bounds = array<i64: 128, 512>}, {pipeline_mode = #tpu.pipeline_mode<synchronous>, transform_indices = @transform_6, window_bounds = array<i64: 1, 512>}, {transform_indices = @transform_7, window_bounds = array<i64: 1, 16, 16, 512>}]} {
    %c0 = arith.constant 0 : index
    %c0_0 = arith.constant 0 : index
    %c0_1 = arith.constant 0 : index
    %c0_2 = arith.constant 0 : index
    %0 = vector.load %arg1[%c0, %c0_0, %c0_1, %c0_2] : memref<1x16x16x512xf32, #tpu.memory_space<vmem>>, vector<1x16x16x512xf32>
    %1 = vector.shape_cast %0 : vector<1x16x16x512xf32> to vector<16x16x512xf32>
    %2 = vector.shape_cast %1 : vector<16x16x512xf32> to vector<256x512xf32>
    %3 = arith.truncf %2 : vector<256x512xf32> to vector<256x512xbf16>
    %c0_3 = arith.constant 0 : index
    %c0_4 = arith.constant 0 : index
    %4 = vector.load %arg2[%c0_3, %c0_4] : memref<512x128xbf16, #tpu.memory_space<vmem>>, vector<512x128xbf16>
    %cst = arith.constant dense<0.000000e+00> : vector<256x128xf32>
    %5 = tpu.matmul %3, %4, %cst {dimension_numbers = #tpu.dot_dimension_numbers<[1], [0], [0], [1], [0, 0, 1, 1], [], []>} : vector<256x512xbf16>, vector<512x128xbf16>, vector<256x128xf32> -> vector<256x128xf32>
    %c0_5 = arith.constant 0 : index
    %c0_6 = arith.constant 0 : index
    %6 = vector.load %arg3[%c0_5, %c0_6] : memref<1x128xf32, #tpu.memory_space<vmem>>, vector<1x128xf32>
    %7 = vector.broadcast %6 : vector<1x128xf32> to vector<256x128xf32>
    %8 = arith.addf %5, %7 : vector<256x128xf32>
    %cst_7 = arith.constant 0.000000e+00 : f32
    %9 = vector.broadcast %cst_7 : f32 to vector<256x128xf32>
    %10 = arith.maximumf %8, %9 : vector<256x128xf32>
    %cst_8 = arith.constant 0.000000e+00 : f32
    %11 = vector.broadcast %cst_8 : f32 to vector<18x18x128xf32>
    %c0_9 = arith.constant 0 : index
    %c0_10 = arith.constant 0 : index
    %c0_11 = arith.constant 0 : index
    %12 = vector.load %arg9[%c0_9, %c0_10, %c0_11] : memref<18x18x128xf32, #tpu.memory_space<vmem>>, vector<18x18x128xf32>
    tpu.vector_store %arg9[%c0_9, %c0_10, %c0_11], %11 {strides = array<i32>} : memref<18x18x128xf32, #tpu.memory_space<vmem>>, vector<18x18x128xf32>,
    %13 = vector.shape_cast %10 : vector<256x128xf32> to vector<16x16x128xf32>
    %c1 = arith.constant 1 : index
    %c1_12 = arith.constant 1 : index
    %c0_13 = arith.constant 0 : index
    %14 = vector.load %arg9[%c1, %c1_12, %c0_13] : memref<18x18x128xf32, #tpu.memory_space<vmem>>, vector<16x16x128xf32>
    tpu.vector_store %arg9[%c1, %c1_12, %c0_13], %13 {strides = array<i32>} : memref<18x18x128xf32, #tpu.memory_space<vmem>>, vector<16x16x128xf32>,
    %c0_14 = arith.constant 0 : index
    %c0_15 = arith.constant 0 : index
    %c0_16 = arith.constant 0 : index
    %15 = vector.load %arg9[%c0_14, %c0_15, %c0_16] : memref<18x18x128xf32, #tpu.memory_space<vmem>>, vector<16x16x128xf32>
    %c0_17 = arith.constant 0 : index
    %c1_18 = arith.constant 1 : index
    %c0_19 = arith.constant 0 : index
    %16 = vector.load %arg9[%c0_17, %c1_18, %c0_19] : memref<18x18x128xf32, #tpu.memory_space<vmem>>, vector<16x16x128xf32>
    %c0_20 = arith.constant 0 : index
    %c2 = arith.constant 2 : index
    %c0_21 = arith.constant 0 : index
    %17 = vector.load %arg9[%c0_20, %c2, %c0_21] : memref<18x18x128xf32, #tpu.memory_space<vmem>>, vector<16x16x128xf32>
    %c1_22 = arith.constant 1 : index
    %c0_23 = arith.constant 0 : index
    %c0_24 = arith.constant 0 : index
    %18 = vector.load %arg9[%c1_22, %c0_23, %c0_24] : memref<18x18x128xf32, #tpu.memory_space<vmem>>, vector<16x16x128xf32>
    %c1_25 = arith.constant 1 : index
    %c1_26 = arith.constant 1 : index
    %c0_27 = arith.constant 0 : index
    %19 = vector.load %arg9[%c1_25, %c1_26, %c0_27] : memref<18x18x128xf32, #tpu.memory_space<vmem>>, vector<16x16x128xf32>
    %c1_28 = arith.constant 1 : index
    %c2_29 = arith.constant 2 : index
    %c0_30 = arith.constant 0 : index
    %20 = vector.load %arg9[%c1_28, %c2_29, %c0_30] : memref<18x18x128xf32, #tpu.memory_space<vmem>>, vector<16x16x128xf32>
    %c2_31 = arith.constant 2 : index
    %c0_32 = arith.constant 0 : index
    %c0_33 = arith.constant 0 : index
    %21 = vector.load %arg9[%c2_31, %c0_32, %c0_33] : memref<18x18x128xf32, #tpu.memory_space<vmem>>, vector<16x16x128xf32>
    %c2_34 = arith.constant 2 : index
    %c1_35 = arith.constant 1 : index
    %c0_36 = arith.constant 0 : index
    %22 = vector.load %arg9[%c2_34, %c1_35, %c0_36] : memref<18x18x128xf32, #tpu.memory_space<vmem>>, vector<16x16x128xf32>
    %c2_37 = arith.constant 2 : index
    %c2_38 = arith.constant 2 : index
    %c0_39 = arith.constant 0 : index
    %23 = vector.load %arg9[%c2_37, %c2_38, %c0_39] : memref<18x18x128xf32, #tpu.memory_space<vmem>>, vector<16x16x128xf32>
    %24 = tpu.concatenate %15, %16, %17, %18, %19, %20, %21, %22, %23 in 2 : vector<16x16x128xf32>, vector<16x16x128xf32>, vector<16x16x128xf32>, vector<16x16x128xf32>, vector<16x16x128xf32>, vector<16x16x128xf32>, vector<16x16x128xf32>, vector<16x16x128xf32>, vector<16x16x128xf32> -> vector<16x16x1152xf32>
    %25 = vector.shape_cast %24 : vector<16x16x1152xf32> to vector<256x1152xf32>
    %26 = arith.truncf %25 : vector<256x1152xf32> to vector<256x1152xbf16>
    %c0_40 = arith.constant 0 : index
    %c0_41 = arith.constant 0 : index
    %27 = vector.load %arg4[%c0_40, %c0_41] : memref<1152x128xbf16, #tpu.memory_space<vmem>>, vector<1152x128xbf16>
    %cst_42 = arith.constant dense<0.000000e+00> : vector<256x128xf32>
    %28 = tpu.matmul %26, %27, %cst_42 {dimension_numbers = #tpu.dot_dimension_numbers<[1], [0], [0], [1], [0, 0, 1, 1], [], []>} : vector<256x1152xbf16>, vector<1152x128xbf16>, vector<256x128xf32> -> vector<256x128xf32>
    %c0_43 = arith.constant 0 : index
    %c0_44 = arith.constant 0 : index
    %29 = vector.load %arg5[%c0_43, %c0_44] : memref<1x128xf32, #tpu.memory_space<vmem>>, vector<1x128xf32>
    %30 = vector.broadcast %29 : vector<1x128xf32> to vector<256x128xf32>
    %31 = arith.addf %28, %30 : vector<256x128xf32>
    %cst_45 = arith.constant 0.000000e+00 : f32
    %32 = vector.broadcast %cst_45 : f32 to vector<256x128xf32>
    %33 = arith.maximumf %31, %32 : vector<256x128xf32>
    %34 = arith.truncf %33 : vector<256x128xf32> to vector<256x128xbf16>
    %c0_46 = arith.constant 0 : index
    %c0_47 = arith.constant 0 : index
    %35 = vector.load %arg6[%c0_46, %c0_47] : memref<128x512xbf16, #tpu.memory_space<vmem>>, vector<128x512xbf16>
    %cst_48 = arith.constant dense<0.000000e+00> : vector<256x512xf32>
    %36 = tpu.matmul %34, %35, %cst_48 {dimension_numbers = #tpu.dot_dimension_numbers<[1], [0], [0], [1], [0, 0, 1, 1], [], []>} : vector<256x128xbf16>, vector<128x512xbf16>, vector<256x512xf32> -> vector<256x512xf32>
    %c0_49 = arith.constant 0 : index
    %c0_50 = arith.constant 0 : index
    %37 = vector.load %arg7[%c0_49, %c0_50] : memref<1x512xf32, #tpu.memory_space<vmem>>, vector<1x512xf32>
    %38 = vector.broadcast %37 : vector<1x512xf32> to vector<256x512xf32>
    %39 = arith.addf %36, %38 : vector<256x512xf32>
    %c0_51 = arith.constant 0 : index
    %c0_52 = arith.constant 0 : index
    %c0_53 = arith.constant 0 : index
    %c0_54 = arith.constant 0 : index
    %40 = vector.load %arg1[%c0_51, %c0_52, %c0_53, %c0_54] : memref<1x16x16x512xf32, #tpu.memory_space<vmem>>, vector<1x16x16x512xf32>
    %41 = vector.shape_cast %40 : vector<1x16x16x512xf32> to vector<16x16x512xf32>
    %42 = vector.shape_cast %41 : vector<16x16x512xf32> to vector<256x512xf32>
    %43 = arith.addf %39, %42 : vector<256x512xf32>
    %cst_55 = arith.constant 0.000000e+00 : f32
    %44 = vector.broadcast %cst_55 : f32 to vector<256x512xf32>
    %45 = arith.maximumf %43, %44 : vector<256x512xf32>
    %46 = vector.shape_cast %45 : vector<256x512xf32> to vector<1x16x16x512xf32>
    %c0_56 = arith.constant 0 : index
    %c0_57 = arith.constant 0 : index
    %c0_58 = arith.constant 0 : index
    %c0_59 = arith.constant 0 : index
    %47 = vector.load %arg8[%c0_56, %c0_57, %c0_58, %c0_59] : memref<1x16x16x512xf32, #tpu.memory_space<vmem>>, vector<1x16x16x512xf32>
    tpu.vector_store %arg8[%c0_56, %c0_57, %c0_58, %c0_59], %46 {strides = array<i32>} : memref<1x16x16x512xf32, #tpu.memory_space<vmem>>, vector<1x16x16x512xf32>,
    return
  }
  func.func @transform_0(%arg0: i32) -> (i32, i32, i32, i32) {
    %c0_i32 = arith.constant 0 : i32
    %c0_i32_0 = arith.constant 0 : i32
    %c0_i32_1 = arith.constant 0 : i32
    %c0_i32_2 = arith.constant 0 : i32
    return %arg0, %c0_i32, %c0_i32_0, %c0_i32_1 : i32, i32, i32, i32
  }
  func.func @transform_1(%arg0: i32) -> (i32, i32) {
    %c0_i32 = arith.constant 0 : i32
    %c0_i32_0 = arith.constant 0 : i32
    %c0_i32_1 = arith.constant 0 : i32
    return %c0_i32, %c0_i32_0 : i32, i32
  }
  func.func @transform_2(%arg0: i32) -> (i32, i32) {
    %c0_i32 = arith.constant 0 : i32
    %c0_i32_0 = arith.constant 0 : i32
    %c0_i32_1 = arith.constant 0 : i32
    return %c0_i32, %c0_i32_0 : i32, i32
  }
  func.func @transform_3(%arg0: i32) -> (i32, i32) {
    %c0_i32 = arith.constant 0 : i32
    %c0_i32_0 = arith.constant 0 : i32
    %c0_i32_1 = arith.constant 0 : i32
    return %c0_i32, %c0_i32_0 : i32, i32
  }
  func.func @transform_4(%arg0: i32) -> (i32, i32) {
    %c0_i32 = arith.constant 0 : i32
    %c0_i32_0 = arith.constant 0 : i32
    %c0_i32_1 = arith.constant 0 : i32
    return %c0_i32, %c0_i32_0 : i32, i32
  }
  func.func @transform_5(%arg0: i32) -> (i32, i32) {
    %c0_i32 = arith.constant 0 : i32
    %c0_i32_0 = arith.constant 0 : i32
    %c0_i32_1 = arith.constant 0 : i32
    return %c0_i32, %c0_i32_0 : i32, i32
  }
  func.func @transform_6(%arg0: i32) -> (i32, i32) {
    %c0_i32 = arith.constant 0 : i32
    %c0_i32_0 = arith.constant 0 : i32
    %c0_i32_1 = arith.constant 0 : i32
    return %c0_i32, %c0_i32_0 : i32, i32
  }
  func.func @transform_7(%arg0: i32) -> (i32, i32, i32, i32) {
    %c0_i32 = arith.constant 0 : i32
    %c0_i32_0 = arith.constant 0 : i32
    %c0_i32_1 = arith.constant 0 : i32
    %c0_i32_2 = arith.constant 0 : i32
    return %arg0, %c0_i32, %c0_i32_0, %c0_i32_1 : i32, i32, i32, i32
  }
}

</mosaic_0001>

<bundles_post_ra>
// kernel: tpu_custom_call.1
= control target key start
LH: loop header
LB: loop body
LE: loop exit
PB: predicated region body
PF: predicated region fallthrough
CT: control target
= control target key end

     0   :  { %s7137_s0 = inlined_call_operand.hbm [shape: f32[2,16,16,512], index: 0, kind: input, shape index: {}]   ;;  %s7138_s1 = inlined_call_operand.hbm [shape: bf16[512,128], index: 1, kind: input, shape index: {}]   ;;  %s7139_s2 = inlined_call_operand.vmem [shape: f32[1,128], index: 2, kind: input, shape index: {}]   ;;  %s7140_s3 = inlined_call_operand.hbm [shape: bf16[1152,128], index: 3, kind: input, shape index: {}]   ;;  %s7141_s4 = inlined_call_operand.hbm [shape: f32[1,128], index: 4, kind: input, shape index: {}]   ;;  %s7142_s5 = inlined_call_operand.hbm [shape: bf16[128,512], index: 5, kind: input, shape index: {}]   ;;  %s7143_s6 = inlined_call_operand.vmem [shape: f32[1,512], index: 6, kind: input, shape index: {}]   ;;  %s7144_s7 = inlined_call_operand.hbm [shape: f32[2,16,16,512], index: 7, kind: output, shape index: {}]  }
   0x1   :  { %7145 = sst [smem:[#allocation25_spill]] %s7138_s1 }
   0x2   :  { %12 = vsyncpa [#allocation4], 0 }
   0x3   :  { %14 = vsyncpa [#allocation4 + $0x1], 0 }
   0x4   :  { %15 = vsyncpa [#allocation7], 0 }
   0x5   :  { %16 = vsyncpa [#allocation10], 0 }
   0x6   :  { %17 = vsyncpa [#allocation5], 0 }
   0x7   :  { %19 = vsyncpa [#allocation5 + $0x1], 0  ;;  %s5458_s24 = smov 0   ;;  %s5460_s25 = smov 0  }
   0x8   :  { %s5462_s26 = smov 0   ;;  %s5464_s27 = smov 0  }
   0x9 LB: > { %s5479_s28 = sadd.s32 4294967295, %s5402_s27   ;;  %s4349_s29 = sadd.s32 4294967294, %s5402_s27   ;;  %s5402_s27 = sphi %s5464_s27, %s7173_s27   ;;  %s5398_s26 = sphi %s5462_s26, %s7172_s26   ;;  %s5394_s25 = sphi %s5460_s25, %s7171_s25   ;;  %s5390_s24 = sphi %s5458_s24, %s7170_s24  }
   0xa   : > { %p45_p0 = scmp.ne.s32.totalorder %s5394_s25, %s5390_s24  ;;  %p46_p1 = scmp.eq.s32.totalorder %s5479_s28, 0 }
   0xb   : > { %p195_p2 = scmp.eq.s32.totalorder %s5479_s28, 1  ;;  %p201_p3 = scmp.eq.s32.totalorder %s4349_s29, 1 }
   0xc   : > { %p5488_p4 = por %p46_p1, %p45_p0  ;;  %p4350_p5 = scmp.ge.s32.totalorder %s5402_s27, 1 }
   0xd   : > { %p5493_p6 = por %p201_p3, %p45_p0  ;;  %p208_p7 = scmp.lt.s32.totalorder %s5402_s27, 3 }
   0xe   : > { %s7148_s1 = sld [smem:[#allocation25_spill]]  ;;  %s5404_s13 = smov [#allocation6]  }
   0xf   : > { %p5501_p8 = pnand %p4350_p5, %p208_p7  ;;  %s221_s14 = sshll.u32 %s5404_s13, 4  ;;  %s222_s14 = int_to_ptr.vmem [resolvable:$true] %s221_s14 }
  0x10   : > { %s251_s18 = sshll.u32 %s7141_s4, 4  ;;  %s5405_s19 = smov 64   ;;  %s252_s18 = int_to_ptr.hbm [resolvable:$true] %s251_s18 }
  0x11   : > { %p5097_p9 = pneg %p5501_p8  ;;  %s5406_s20 = smov 4  }
  0x12   : > { %s5407_s21 = smov [#allocation9]   ;;  %s236_s9 = sshll.u32 %s7140_s3, 4  ;;  %s237_s9 = int_to_ptr.hbm [resolvable:$true] %s236_s9 }
  0x13   : > { %p5509_p10 = pnand %p5097_p9, %p46_p1  ;;  %s253_s22 = sshll.u32 %s5407_s21, 4  ;;  %s254_s22 = int_to_ptr.vmem [resolvable:$true] %s253_s22 }
  0x14   : > { %s219_s11 = sshll.u32 %s7148_s1, 4  ;;  %s262_s16 = sshll.u32 %s7142_s5, 4  ;;  %s220_s11 = int_to_ptr.hbm [resolvable:$true] %s219_s11  ;;  %s263_s16 = int_to_ptr.hbm [resolvable:$true] %s262_s16 }
  0x15   : > { %5100 = dma.hbm_to_vmem [thread:$0]  (!%p5509_p10), %s220_s11, 4096, %s222_s14, [#allocation7], %s5405_s19, %s5405_s19, %s5406_s20  }
  0x16   : > { %5106 = dma.hbm_to_vmem [thread:$0]  (!%p5509_p10), %s252_s18, 16, %s254_s22, [#allocation10]  }
  0x17   : > { %s5408_s11 = smov [#allocation8]   ;;  %s5409_s17 = smov [#allocation11]  }
  0x18   : > { %s238_s14 = sshll.u32 %s5408_s11, 4  ;;  %s264_s18 = sshll.u32 %s5409_s17, 4  ;;  %s239_s14 = int_to_ptr.vmem [resolvable:$true] %s238_s14  ;;  %s265_s18 = int_to_ptr.vmem [resolvable:$true] %s264_s18 }
  0x19   : > { %5103 = dma.hbm_to_vmem [thread:$0]  (!%p5509_p10), %s237_s9, 9216, %s239_s14, [#allocation7], %s5405_s19, %s5405_s19, %s5406_s20  }
  0x1a   : > { %s5410_s21 = smov 256   ;;  %s5411_s22 = smov 16  }
  0x1b   : > { %5109 = dma.hbm_to_vmem [thread:$0]  (!%p5509_p10), %s263_s16, 4096, %s265_s18, [#allocation10], %s5410_s21, %s5410_s21, %s5411_s22  }
  0x1c   : > { %s5532_s23 = sadd.s32 1, %s5402_s27   ;;  %s32_s10 = sadd.s32 1, %s5398_s26 }
  0x1d   : > { %s29_s29 = ssub.s32 %s5402_s27, %s5532_s23  ;;  %p39_p13 = scmp.ne.s32.totalorder %s5398_s26, %s5394_s25 }
  0x1e   : > { %p30_p12 = scmp.eq.s32.totalorder %s29_s29, 0  ;;  %p40_p0 = scmp.eq.s32.totalorder %s5402_s27, 0 }
  0x1f   : > { %p5545_p5 = por %p195_p2, %p39_p13  ;;  %p5122_p7 = scmp.lt.s32.totalorder %s5402_s27, 2 }
  0x20   : > { %s5541_s13 = scalar_select %p30_p12, %s5398_s26, %s32_s10  }
  0x21   : > { %p41_p3 = por %p40_p0, %p39_p13  ;;  %s281_s20 = sand.u32 1, %s5398_s26  }
  0x22   : > { %s4356_s15 = sshll.u32 %s281_s20, 10  ;;  %s4915_s9 = sshll.u32 %s5402_s27, 10 }
  0x23   : > { %s290_s14 = scalar_lea.hbm %s7137_s0, %s4915_s9  ;;  %s285_s17 = scalar_lea.vmem [#allocation3], %s4356_s15 }
  0x24   : > { %s293_s18 = sshll.u32 %s285_s17, 4  ;;  %s291_s21 = sshll.u32 %s290_s14, 4  ;;  %s294_s18 = int_to_ptr.vmem [resolvable:$true] %s293_s18  ;;  %s292_s21 = int_to_ptr.hbm [resolvable:$true] %s291_s21 }
  0x25   : > { %p5555_p9 = pnand %p5122_p7, %p41_p3  ;;  %s282_s29 = scalar_lea.sflag [#allocation4], %s281_s20 }
  0x26   : > { %s5298_s10 = sshra.s32 %s292_s21, 4  ;;  %s5305_s16 = scalar_lea.hbm %s7137_s0, 2048  ;;  %s5299_s10 = int_to_ptr.hbm [resolvable:$true] %s5298_s10 }
  0x27   : > { %s5300_s1 = scalar_lea.hbm %s5299_s10, 1024  ;;  %p5302_p10 = pneg %p5555_p9 }
  0x28   : > { %p5301_p2 = scmp.ne.s32.totalorder %s5299_s10, %s5300_s1  ;;  %p5306_p0 = scmp.lt.s32.totalorder %s5299_s10, %s7137_s0 }
  0x29   : > { %p5307_p3 = scmp.lt.s32.totalorder %s5305_s16, %s5300_s1 }
  0x2a   : > { %p5303_p12 = pnand %p5302_p10, %p5301_p2 }
  0x2b   : > { %p5308_p7 = por %p5307_p3, %p5306_p0 }
  0x2c   : > { %p5304_p13 = pneg %p5303_p12 }
  0x2e   : > { %p5309_p11 = pnand %p5308_p7, %p5304_p13 }
  0x30   : > { %5312 = shalt.err (!%p5309_p11)
}
  0x31   : > { %s5412_s20 = smov 512   ;;  %s5413_s17 = smov 32  }
  0x32   : > { %5113 = dma.hbm_to_vmem [thread:$0]  (!%p5555_p9), %s292_s21, 16384, %s294_s18, %s282_s29, %s5412_s20, %s5412_s20, %s5413_s17  }
  0x33   : > { %305 = sbr.rel (%p5501_p8) target bundleno = 1455 (0x5af), region = 48 }
  0x38   : > { %s5572_s9 = sand.u32 1, %s5394_s25  }
  0x39   : > { %s4360_s10 = sshll.u32 %s5572_s9, 10  ;;  %s308_s1 = scalar_lea.sflag [#allocation4], %s5572_s9 }
  0x3a   : > { %s5578_s15 = scalar_lea.vmem [#allocation3], %s4360_s10 }
  0x3b   : > { %5373 = dma.done.wait (%p5488_p4), %s308_s1, 16384  }
  0x3c   : > { %5375 = vsyncadd (%p5488_p4), %s308_s1, 4294950912 }
  0x3d   : > { %5377 = dma.done.wait (%p46_p1), [#allocation7], 13312  }
  0x3e   : > { %5379 = vsyncadd (%p46_p1), [#allocation7], 4294953984 }
  0x3f   : > { %5381 = dma.done.wait (%p46_p1), [#allocation10], 4112  }
  0x40   : > { %5383 = vsyncadd (%p46_p1), [#allocation10], 4294963184  ;;  %v4923_v0 = vld [vmem:[#allocation6 + $0x38] sm:$0xff]  ;;  %v4922_v1 = vld [vmem:[#allocation6 + $0x30] sm:$0xff]  ;;  %s6635_s16 = scalar_lea.vmem [#allocation12], %s4360_s10  ;;  %s5052_s11 = sshll.u32 %s5479_s28, 10 }
  0x41   : > { %5053 = vmatpush.bf16.msra.mxu1 %v4923_v0  ;;  %5054 = vmatpush.bf16.msra.mxu2 %v4923_v0  ;;  %v4921_v2 = vld [vmem:[#allocation6 + $0x28] sm:$0xff]  ;;  %v4920_v3 = vld [vmem:[#allocation6 + $0x20] sm:$0xff]  ;;  %v4919_v4 = vld [vmem:[#allocation6 + $0x18] sm:$0xff]  ;;  %s4234_s17 = scalar_lea.hbm %s7144_s7, %s5052_s11  ;;  %s4235_s10 = sshll.u32 %s6635_s16, 4  ;;  %s4236_s10 = int_to_ptr.vmem [resolvable:$true] %s4235_s10 }
  0x42   : > { %5055 = vmatpush.bf16.msra.mxu3 %v4923_v0  ;;  %815 = vmatpush.bf16.msra.mxu0 %v4923_v0  ;;  %v4918_v5 = vld [vmem:[#allocation6 + $0x10] sm:$0xff]  ;;  %v4917_v6 = vld [vmem:[#allocation6 + $0x8] sm:$0xff]  ;;  %v4916_v7 = vld [vmem:[#allocation6] sm:$0xff]  ;;  %s4237_s1 = sshll.u32 %s4234_s17, 4  ;;  %s4223_s30 = scalar_lea.sflag [#allocation5], %s5572_s9  ;;  %s4238_s1 = int_to_ptr.hbm [resolvable:$true] %s4237_s1 }
  0x43   : > { %v395_v8 = vld [vmem:[%s5578_s15 + $0x100] sm:$0xff]  ;;  %v4939_v14 = vld [vmem:[#allocation6 + $0xb8] sm:$0xff]  ;;  %v4938_v20 = vld [vmem:[#allocation6 + $0xb0] sm:$0xff]  ;;  %s5342_s28 = sshra.s32 %s4238_s1, 4  ;;  %s5343_s28 = int_to_ptr.hbm [resolvable:$true] %s5342_s28 }
  0x44   : > { %v399_v9 = vld [vmem:[%s5578_s15 + $0x120] sm:$0xff]  ;;  %v4947_v15 = vld [vmem:[#allocation6 + $0xf8] sm:$0xff]  ;;  %v4946_v21 = vld [vmem:[#allocation6 + $0xf0] sm:$0xff]  ;;  %s5344_s12 = scalar_lea.hbm %s5343_s28, 1024  ;;  %p5349_p11 = scmp.lt.s32.totalorder %s5343_s28, %s7144_s7 }
  0x45   : > { %5056 = vmatpush.bf16.msra.mxu1 %v4922_v1  ;;  %5057 = vmatpush.bf16.msra.mxu2 %v4922_v1  ;;  %v427_v10 = vld [vmem:[%s5578_s15 + $0x200] sm:$0xff]  ;;  %v4931_v16 = vld [vmem:[#allocation6 + $0x78] sm:$0xff]  ;;  %v507_v17 = vpack.c.bf16 %v399_v9, %v395_v8  ;;  %v4930_v22 = vld [vmem:[#allocation6 + $0x70] sm:$0xff]  ;;  %p5345_p1 = scmp.ne.s32.totalorder %s5343_s28, %s5344_s12 }
  0x46   : > { %5058 = vmatpush.bf16.msra.mxu3 %v4922_v1  ;;  %816 = vmatpush.bf16.msra.mxu0 %v4922_v1  ;;  %v431_v11 = vld [vmem:[%s5578_s15 + $0x220] sm:$0xff]  ;;  %v4937_v23 = vld [vmem:[#allocation6 + $0xa8] sm:$0xff]  ;;  %v4935_v35 = vld [vmem:[#allocation6 + $0x98] sm:$0xff] }
  0x47   : > { %v459_v12 = vld [vmem:[%s5578_s15 + $0x300] sm:$0xff]  ;;  %v523_v18 = vpack.c.bf16 %v431_v11, %v427_v10  ;;  %v4945_v24 = vld [vmem:[#allocation6 + $0xe8] sm:$0xff]  ;;  %v4943_v36 = vld [vmem:[#allocation6 + $0xd8] sm:$0xff]  ;;  %p5346_p4 = pnand %p5345_p1, %p5545_p5 }
  0x48   : > { %v463_v13 = vld [vmem:[%s5578_s15 + $0x320] sm:$0xff]  ;;  %v4929_v25 = vld [vmem:[#allocation6 + $0x68] sm:$0xff]  ;;  %v4927_v37 = vld [vmem:[#allocation6 + $0x58] sm:$0xff] }
  0x49   : > { %5059 = vmatpush.bf16.msra.mxu1 %v4921_v2  ;;  %5060 = vmatpush.bf16.msra.mxu2 %v4921_v2  ;;  %v539_v19 = vpack.c.bf16 %v463_v13, %v459_v12  ;;  %v4936_v26 = vld [vmem:[#allocation6 + $0xa0] sm:$0xff]  ;;  %v4934_v41 = vld [vmem:[#allocation6 + $0x90] sm:$0xff]  ;;  %v4933_v44 = vld [vmem:[#allocation6 + $0x88] sm:$0xff]  ;;  %p5347_p8 = pneg %p5346_p4 }
  0x4a   : > { %5061 = vmatpush.bf16.msra.mxu3 %v4921_v2  ;;  %817 = vmatpush.bf16.msra.mxu0 %v4921_v2  ;;  %v4944_v27 = vld [vmem:[#allocation6 + $0xe0] sm:$0xff]  ;;  %v4942_v42 = vld [vmem:[#allocation6 + $0xd0] sm:$0xff]  ;;  %v4941_v47 = vld [vmem:[#allocation6 + $0xc8] sm:$0xff] }
  0x4b   : > { %v4928_v28 = vld [vmem:[#allocation6 + $0x60] sm:$0xff]  ;;  %v4926_v43 = vld [vmem:[#allocation6 + $0x50] sm:$0xff]  ;;  %v4925_v48 = vld [vmem:[#allocation6 + $0x48] sm:$0xff] }
  0x4c   : > { %v403_v29 = vld [vmem:[%s5578_s15 + $0x140] sm:$0xff]  ;;  %v364_v13 = vld [vmem:[%s5578_s15 + $0x8] sm:$0xff] }
  0x4d   : > { %5062 = vmatpush.bf16.msra.mxu1 %v4920_v3  ;;  %5063 = vmatpush.bf16.msra.mxu2 %v4920_v3  ;;  %v407_v30 = vld [vmem:[%s5578_s15 + $0x160] sm:$0xff] }
  0x4e   : > { %5064 = vmatpush.bf16.msra.mxu3 %v4920_v3  ;;  %818 = vmatpush.bf16.msra.mxu0 %v4920_v3  ;;  %v435_v31 = vld [vmem:[%s5578_s15 + $0x240] sm:$0xff]  ;;  %v511_v38 = vpack.c.bf16 %v407_v30, %v403_v29  ;;  %v374_v29 = vld [vmem:[%s5578_s15 + $0x58] sm:$0xff] }
  0x4f   : > { %v439_v32 = vld [vmem:[%s5578_s15 + $0x260] sm:$0xff]  ;;  %v378_v30 = vld [vmem:[%s5578_s15 + $0x78] sm:$0xff] }
  0x50   : > { %v467_v33 = vld [vmem:[%s5578_s15 + $0x340] sm:$0xff]  ;;  %v527_v39 = vpack.c.bf16 %v439_v32, %v435_v31 }
  0x51   : > { %5065 = vmatpush.bf16.msra.mxu1 %v4919_v4  ;;  %5066 = vmatpush.bf16.msra.mxu2 %v4919_v4  ;;  %v471_v34 = vld [vmem:[%s5578_s15 + $0x360] sm:$0xff] }
  0x52   : > { %5067 = vmatpush.bf16.msra.mxu3 %v4919_v4  ;;  %819 = vmatpush.bf16.msra.mxu0 %v4919_v4  ;;  %v543_v40 = vpack.c.bf16 %v471_v34, %v467_v33  ;;  %v363_v45 = vld [vmem:[%s5578_s15] sm:$0xff]  ;;  %v498_v33 = vpack.c.bf16 %v378_v30, %v374_v29  ;;  %v380_v34 = vld [vmem:[%s5578_s15 + $0x88] sm:$0xff] }
  0x53   : > { %v367_v46 = vld [vmem:[%s5578_s15 + $0x20] sm:$0xff] }
  0x54   : > { %v491_v49 = vpack.c.bf16 %v367_v46, %v363_v45  ;;  %v4932_v50 = vld [vmem:[#allocation6 + $0x80] sm:$0xff]  ;;  %v389_v45 = vld [vmem:[%s5578_s15 + $0xd0] sm:$0xff] }
  0x55   : > { %5068 = vmatpush.bf16.msra.mxu1 %v4918_v5  ;;  %5069 = vmatpush.bf16.msra.mxu2 %v4918_v5  ;;  %v4940_v51 = vld [vmem:[#allocation6 + $0xc0] sm:$0xff]  ;;  %v393_v46 = vld [vmem:[%s5578_s15 + $0xf0] sm:$0xff] }
  0x56   : > { %5070 = vmatpush.bf16.msra.mxu3 %v4918_v5  ;;  %820 = vmatpush.bf16.msra.mxu0 %v4918_v5  ;;  %v4924_v52 = vld [vmem:[#allocation6 + $0x40] sm:$0xff] }
  0x57   : > { %v411_v53 = vld [vmem:[%s5578_s15 + $0x180] sm:$0xff] }
  0x58   : > { %v415_v54 = vld [vmem:[%s5578_s15 + $0x1a0] sm:$0xff] }
  0x59   : > { %5071 = vmatpush.bf16.msra.mxu1 %v4917_v6  ;;  %5072 = vmatpush.bf16.msra.mxu2 %v4917_v6  ;;  %v443_v55 = vld [vmem:[%s5578_s15 + $0x280] sm:$0xff]  ;;  %v515_v59 = vpack.c.bf16 %v415_v54, %v411_v53  ;;  %v4954_v53 = vld [vmem:[#allocation8 + $0x30] sm:$0xff]  ;;  %v396_v54 = vld [vmem:[%s5578_s15 + $0x108] sm:$0xff] }
  0x5a   : > { %5073 = vmatpush.bf16.msra.mxu3 %v4917_v6  ;;  %821 = vmatpush.bf16.msra.mxu0 %v4917_v6  ;;  %v447_v56 = vld [vmem:[%s5578_s15 + $0x2a0] sm:$0xff] }
  0x5b   : > { %v475_v57 = vld [vmem:[%s5578_s15 + $0x380] sm:$0xff]  ;;  %v531_v60 = vpack.c.bf16 %v447_v56, %v443_v55  ;;  %v400_v55 = vld [vmem:[%s5578_s15 + $0x128] sm:$0xff]  ;;  %v397_v56 = vld [vmem:[%s5578_s15 + $0x110] sm:$0xff] }
  0x5c   : > { %v479_v58 = vld [vmem:[%s5578_s15 + $0x3a0] sm:$0xff] }
  0x5d   : > { %5074 = vmatpush.bf16.msra.mxu1 %v4916_v7  ;;  %5075 = vmatpush.bf16.msra.mxu2 %v4916_v7  ;;  %v547_v61 = vpack.c.bf16 %v479_v58, %v475_v57  ;;  %v371_v62 = vld [vmem:[%s5578_s15 + $0x40] sm:$0xff]  ;;  %v401_v57 = vld [vmem:[%s5578_s15 + $0x130] sm:$0xff]  ;;  %v398_v58 = vld [vmem:[%s5578_s15 + $0x118] sm:$0xff] }
  0x5e   : > { %5076 = vmatpush.bf16.msra.mxu3 %v4916_v7  ;;  %822 = vmatpush.bf16.msra.mxu0 %v4916_v7  ;;  %v375_v63 = vld [vmem:[%s5578_s15 + $0x60] sm:$0xff] }
  0x5f   : > { %v495_v0 = vpack.c.bf16 %v375_v63, %v371_v62  ;;  %v419_v1 = vld [vmem:[%s5578_s15 + $0x1c0] sm:$0xff] }
  0x60   : > { %843 = vmatmul.bf16.vlgmr.msra.gmra.mxu1 %v507_v17  ;;  %863 = vmatmul.bf16.vlgmr.msra.gmra.mxu2 %v523_v18  ;;  %v423_v2 = vld [vmem:[%s5578_s15 + $0x1e0] sm:$0xff]  ;;  %v366_v17 = vld [vmem:[%s5578_s15 + $0x18] sm:$0xff] }
  0x61   : > { %993 = vmatpush.bf16.msrb.mxu2 %v4939_v14  ;;  %904 = vmatpush.bf16.msrb.mxu1 %v4931_v16  ;;  %v451_v3 = vld [vmem:[%s5578_s15 + $0x2c0] sm:$0xff]  ;;  %v519_v7 = vpack.c.bf16 %v423_v2, %v419_v1  ;;  %v368_v14 = vld [vmem:[%s5578_s15 + $0x28] sm:$0xff]  ;;  %v369_v16 = vld [vmem:[%s5578_s15 + $0x30] sm:$0xff] }
  0x62   : > { %1082 = vmatpush.bf16.msrb.mxu3 %v4947_v15  ;;  %823 = vmatmul.bf16.vlgmr.msra.gmra.mxu0 %v491_v49  ;;  %v455_v4 = vld [vmem:[%s5578_s15 + $0x2e0] sm:$0xff]  ;;  %v365_v15 = vld [vmem:[%s5578_s15 + $0x10] sm:$0xff]  ;;  %v370_v18 = vld [vmem:[%s5578_s15 + $0x38] sm:$0xff] }
  0x63   : > { %883 = vmatmul.bf16.vlgmr.msra.gmra.mxu3 %v539_v19  ;;  %v483_v5 = vld [vmem:[%s5578_s15 + $0x3c0] sm:$0xff]  ;;  %v535_v8 = vpack.c.bf16 %v455_v4, %v451_v3  ;;  %v492_v19 = vpack.c.bf16 %v368_v14, %v364_v13 }
  0x64   : > { %v487_v6 = vld [vmem:[%s5578_s15 + $0x3e0] sm:$0xff] }
  0x65   : > { %994 = vmatpush.bf16.msrb.mxu2 %v4938_v20  ;;  %905 = vmatpush.bf16.msrb.mxu1 %v4930_v22  ;;  %v551_v9 = vpack.c.bf16 %v487_v6, %v483_v5  ;;  %v379_v10 = vld [vmem:[%s5578_s15 + $0x80] sm:$0xff]  ;;  %v493_v20 = vpack.c.bf16 %v369_v16, %v365_v15  ;;  %v404_v5 = vld [vmem:[%s5578_s15 + $0x148] sm:$0xff] }
  0x66   : > { %1083 = vmatpush.bf16.msrb.mxu3 %v4946_v21  ;;  %v383_v11 = vld [vmem:[%s5578_s15 + $0xa0] sm:$0xff]  ;;  %v494_v21 = vpack.c.bf16 %v370_v18, %v366_v17  ;;  %v408_v6 = vld [vmem:[%s5578_s15 + $0x168] sm:$0xff]  ;;  %v4951_v17 = vld [vmem:[#allocation8 + $0x18] sm:$0xff] }
  0x67   : > { %v499_v12 = vpack.c.bf16 %v383_v11, %v379_v10  ;;  %v387_v22 = vld [vmem:[%s5578_s15 + $0xc0] sm:$0xff]  ;;  %v410_v10 = vld [vmem:[%s5578_s15 + $0x178] sm:$0xff]  ;;  %v512_v13 = vpack.c.bf16 %v408_v6, %v404_v5 }
  0x68   : > { %v4952_v4 = vld [vmem:[#allocation8 + $0x20] sm:$0xff]  ;;  %v4979_v5 = vld [vmem:[#allocation8 + $0xf8] sm:$0xff] }
  0x69   : > { %995 = vmatpush.bf16.msrb.mxu2 %v4937_v23  ;;  %906 = vmatpush.bf16.msrb.mxu1 %v4929_v25  ;;  %v391_v23 = vld [vmem:[%s5578_s15 + $0xe0] sm:$0xff]  ;;  %v372_v25 = vld [vmem:[%s5578_s15 + $0x48] sm:$0xff]  ;;  %v434_v6 = vld [vmem:[%s5578_s15 + $0x238] sm:$0xff] }
  0x6a   : > { %1084 = vmatpush.bf16.msrb.mxu3 %v4945_v24  ;;  %v503_v24 = vpack.c.bf16 %v391_v23, %v387_v22  ;;  %v412_v22 = vld [vmem:[%s5578_s15 + $0x188] sm:$0xff] }
  0x6b   : > { %v416_v23 = vld [vmem:[%s5578_s15 + $0x1a8] sm:$0xff] }
  0x6c   : > { %v516_v30 = vpack.c.bf16 %v416_v23, %v412_v22 }
  0x6d   : > { %996 = vmatpush.bf16.msrb.mxu2 %v4936_v26  ;;  %907 = vmatpush.bf16.msrb.mxu1 %v4928_v28  ;;  %v376_v26 = vld [vmem:[%s5578_s15 + $0x68] sm:$0xff]  ;;  %v377_v28 = vld [vmem:[%s5578_s15 + $0x70] sm:$0xff] }
  0x6e   : > { %1085 = vmatpush.bf16.msrb.mxu3 %v4944_v27  ;;  %v373_v27 = vld [vmem:[%s5578_s15 + $0x50] sm:$0xff]  ;;  %v496_v31 = vpack.c.bf16 %v376_v26, %v372_v25  ;;  %v414_v26 = vld [vmem:[%s5578_s15 + $0x198] sm:$0xff] }
  0x6f   : > { %v497_v32 = vpack.c.bf16 %v377_v28, %v373_v27  ;;  %v417_v25 = vld [vmem:[%s5578_s15 + $0x1b0] sm:$0xff]  ;;  %v418_v27 = vld [vmem:[%s5578_s15 + $0x1b8] sm:$0xff] }
  0x70   : > { %848 = vmatmul.bf16.gmra.mxu1 %v511_v38  ;;  %868 = vmatmul.bf16.gmra.mxu2 %v527_v39  ;;  %v382_v38 = vld [vmem:[%s5578_s15 + $0x98] sm:$0xff] }
  0x71   : > { %997 = vmatpush.bf16.msrb.mxu2 %v4935_v35  ;;  %908 = vmatpush.bf16.msrb.mxu1 %v4927_v37  ;;  %v384_v35 = vld [vmem:[%s5578_s15 + $0xa8] sm:$0xff]  ;;  %v385_v37 = vld [vmem:[%s5578_s15 + $0xb0] sm:$0xff]  ;;  %v386_v39 = vld [vmem:[%s5578_s15 + $0xb8] sm:$0xff] }
  0x72   : > { %1086 = vmatpush.bf16.msrb.mxu3 %v4943_v36  ;;  %828 = vmatmul.bf16.gmra.mxu0 %v495_v0  ;;  %v381_v36 = vld [vmem:[%s5578_s15 + $0x90] sm:$0xff]  ;;  %v4953_v0 = vld [vmem:[#allocation8 + $0x28] sm:$0xff] }
  0x73   : > { %888 = vmatmul.bf16.gmra.mxu3 %v543_v40  ;;  %v500_v40 = vpack.c.bf16 %v384_v35, %v380_v34  ;;  %v518_v34 = vpack.c.bf16 %v418_v27, %v414_v26  ;;  %v4948_v35 = vld [vmem:[#allocation8] sm:$0xff] }
  0x75   : > { %998 = vmatpush.bf16.msrb.mxu2 %v4934_v41  ;;  %909 = vmatpush.bf16.msrb.mxu1 %v4926_v43  ;;  %v501_v41 = vpack.c.bf16 %v385_v37, %v381_v36  ;;  %v388_v43 = vld [vmem:[%s5578_s15 + $0xc8] sm:$0xff]  ;;  %v5414_v37 = vmov 0.0  }
  0x76   : > { %1087 = vmatpush.bf16.msrb.mxu3 %v4942_v42  ;;  %v502_v42 = vpack.c.bf16 %v386_v39, %v382_v38  ;;  %1206 = vst [vmem:[#allocation2 + $0x18] sm:$0xff] %v5414_v37 }
  0x77   : > { %1207 = vst [vmem:[#allocation2 + $0x20] sm:$0xff] %v5414_v37 }
  0x78   : > { %1203 = vst [vmem:[#allocation2] sm:$0xff] %v5414_v37 }
  0x79   : > { %999 = vmatpush.bf16.msrb.mxu2 %v4933_v44  ;;  %910 = vmatpush.bf16.msrb.mxu1 %v4925_v48  ;;  %v392_v44 = vld [vmem:[%s5578_s15 + $0xe8] sm:$0xff]  ;;  %v394_v48 = vld [vmem:[%s5578_s15 + $0xf8] sm:$0xff]  ;;  %1204 = vst [vmem:[#allocation2 + $0x8] sm:$0xff] %v5414_v37 }
  0x7a   : > { %1088 = vmatpush.bf16.msrb.mxu3 %v4941_v47  ;;  %v390_v47 = vld [vmem:[%s5578_s15 + $0xd8] sm:$0xff]  ;;  %v504_v49 = vpack.c.bf16 %v392_v44, %v388_v43  ;;  %1205 = vst [vmem:[#allocation2 + $0x10] sm:$0x3] %v5414_v37  ;;  %v421_v43 = vld [vmem:[%s5578_s15 + $0x1d0] sm:$0xff] }
  0x7b   : > { %1208 = vst [vmem:[#allocation2 + $0x28] sm:$0x3] %v5414_v37  ;;  %v425_v44 = vld [vmem:[%s5578_s15 + $0x1f0] sm:$0xff] }
  0x7c   : > { %1209 = vst [vmem:[#allocation2 + $0x30] sm:$0xff] %v5414_v37 }
  0x7d   : > { %1000 = vmatpush.bf16.msrb.mxu2 %v4932_v50  ;;  %911 = vmatpush.bf16.msrb.mxu1 %v4924_v52  ;;  %v505_v50 = vpack.c.bf16 %v393_v46, %v389_v45  ;;  %v4955_v52 = vld [vmem:[#allocation8 + $0x38] sm:$0xff]  ;;  %1210 = vst [vmem:[#allocation2 + $0x38] sm:$0xff] %v5414_v37 }
  0x7e   : > { %1089 = vmatpush.bf16.msrb.mxu3 %v4940_v51  ;;  %v506_v51 = vpack.c.bf16 %v394_v48, %v390_v47  ;;  %2303 = vmatpush.bf16.msrb.mxu0 %v4955_v52  ;;  %v422_v45 = vld [vmem:[%s5578_s15 + $0x1d8] sm:$0xff]  ;;  %1211 = vst [vmem:[#allocation2 + $0x40] sm:$0x3] %v5414_v37 }
  0x7f   : > { %v426_v46 = vld [vmem:[%s5578_s15 + $0x1f8] sm:$0xff]  ;;  %1212 = vst [vmem:[#allocation2 + $0x48] sm:$0xff] %v5414_v37 }
  0x80   : > { %853 = vmatmul.bf16.gmra.mxu1 %v515_v59  ;;  %873 = vmatmul.bf16.gmra.mxu2 %v531_v60  ;;  %v402_v59 = vld [vmem:[%s5578_s15 + $0x138] sm:$0xff]  ;;  %v508_v60 = vpack.c.bf16 %v400_v55, %v396_v54  ;;  %v522_v52 = vpack.c.bf16 %v426_v46, %v422_v45  ;;  %1213 = vst [vmem:[#allocation2 + $0x50] sm:$0xff] %v5414_v37  ;;  %v4970_v45 = vld [vmem:[#allocation8 + $0xb0] sm:$0xff] }
  0x81   : > { %v510_v63 = vpack.c.bf16 %v402_v59, %v398_v58  ;;  %1214 = vst [vmem:[#allocation2 + $0x58] sm:$0x3] %v5414_v37  ;;  %v5741_v58 = vld [vmem:[%s7139_s2] ss:$0 sm:$0xff] }
  0x82   : > { %833 = vmatmul.bf16.gmra.mxu0 %v499_v12  ;;  %1215 = vst [vmem:[#allocation2 + $0x60] sm:$0xff] %v5414_v37  ;;  %2570 = vmatpush.bf16.msra.mxu3 %v4979_v5  ;;  %v4978_v46 = vld [vmem:[#allocation8 + $0xf0] sm:$0xff] }
  0x83   : > { %893 = vmatmul.bf16.gmra.mxu3 %v547_v61  ;;  %2304 = vmatpush.bf16.msrb.mxu0 %v4954_v53  ;;  %v509_v61 = vpack.c.bf16 %v401_v57, %v397_v56  ;;  %1216 = vst [vmem:[#allocation2 + $0x68] sm:$0xff] %v5414_v37  ;;  %v428_v57 = vld [vmem:[%s5578_s15 + $0x208] sm:$0xff] }
  0x84   : > { %1217 = vst [vmem:[#allocation2 + $0x70] sm:$0x3] %v5414_v37 }
  0x85   : > { %1218 = vst [vmem:[#allocation2 + $0x78] sm:$0xff] %v5414_v37 }
  0x86   : > { %1219 = vst [vmem:[#allocation2 + $0x80] sm:$0xff] %v5414_v37  ;;  %2571 = vmatpush.bf16.msra.mxu3 %v4978_v46 }
  0x87   : > { %2305 = vmatpush.bf16.msrb.mxu0 %v4953_v0  ;;  %1220 = vst [vmem:[#allocation2 + $0x88] sm:$0x3] %v5414_v37  ;;  %v430_v0 = vld [vmem:[%s5578_s15 + $0x218] sm:$0xff] }
  0x88   : > { %1221 = vst [vmem:[#allocation2 + $0x90] sm:$0xff] %v5414_v37 }
  0x89   : > { %1222 = vst [vmem:[#allocation2 + $0x98] sm:$0xff] %v5414_v37 }
  0x8a   : > { %1223 = vst [vmem:[#allocation2 + $0xa0] sm:$0x3] %v5414_v37 }
  0x8b   : > { %2306 = vmatpush.bf16.msrb.mxu0 %v4952_v4  ;;  %1224 = vst [vmem:[#allocation2 + $0xa8] sm:$0xff] %v5414_v37  ;;  %v4971_v4 = vld [vmem:[#allocation8 + $0xb8] sm:$0xff] }
  0x8c   : > { %1225 = vst [vmem:[#allocation2 + $0xb0] sm:$0xff] %v5414_v37  ;;  %2481 = vmatpush.bf16.msra.mxu2 %v4971_v4 }
  0x8d   : > { %1226 = vst [vmem:[#allocation2 + $0xb8] sm:$0x3] %v5414_v37 }
  0x8e   : > { %1227 = vst [vmem:[#allocation2 + $0xc0] sm:$0xff] %v5414_v37 }
  0x8f   : > { %2307 = vmatpush.bf16.msrb.mxu0 %v4951_v17  ;;  %1228 = vst [vmem:[#allocation2 + $0xc8] sm:$0xff] %v5414_v37 }
  0x90   : > { %858 = vmatmul.bf16.gmra.mxu1 %v519_v7  ;;  %878 = vmatmul.bf16.gmra.mxu2 %v535_v8  ;;  %v405_v7 = vld [vmem:[%s5578_s15 + $0x150] sm:$0xff]  ;;  %1229 = vst [vmem:[#allocation2 + $0xd0] sm:$0x3] %v5414_v37 }
  0x91   : > { %v409_v8 = vld [vmem:[%s5578_s15 + $0x170] sm:$0xff]  ;;  %1230 = vst [vmem:[#allocation2 + $0xd8] sm:$0xff] %v5414_v37  ;;  %2482 = vmatpush.bf16.msra.mxu2 %v4970_v45 }
  0x92   : > { %838 = vmatmul.bf16.gmra.mxu0 %v503_v24  ;;  %v513_v14 = vpack.c.bf16 %v409_v8, %v405_v7  ;;  %v413_v24 = vld [vmem:[%s5578_s15 + $0x190] sm:$0xff]  ;;  %v4963_v7 = vld [vmem:[#allocation8 + $0x78] sm:$0xff]  ;;  %1231 = vst [vmem:[#allocation2 + $0xe0] sm:$0xff] %v5414_v37 }
  0x93   : > { %898 = vmatmul.bf16.gmra.mxu3 %v551_v9  ;;  %v406_v9 = vld [vmem:[%s5578_s15 + $0x158] sm:$0xff]  ;;  %2392 = vmatpush.bf16.msra.mxu1 %v4963_v7  ;;  %1232 = vst [vmem:[#allocation2 + $0xe8] sm:$0x3] %v5414_v37 }
  0x94   : > { %v514_v16 = vpack.c.bf16 %v410_v10, %v406_v9  ;;  %v4987_v8 = vld [vmem:[#allocation8 + $0x138] sm:$0xff]  ;;  %1233 = vst [vmem:[#allocation2 + $0xf0] sm:$0xff] %v5414_v37 }
  0x95   : > { %1234 = vst [vmem:[#allocation2 + $0xf8] sm:$0xff] %v5414_v37 }
  0x96   : > { %1235 = vst [vmem:[#allocation2 + $0x100] sm:$0x3] %v5414_v37 }
  0x97   : > { %1236 = vst [vmem:[#allocation2 + $0x108] sm:$0xff] %v5414_v37 }
  0x98   : > { %1237 = vst [vmem:[#allocation2 + $0x110] sm:$0xff] %v5414_v37 }
  0x99   : > { %1238 = vst [vmem:[#allocation2 + $0x118] sm:$0x3] %v5414_v37 }
  0x9a   : > { %1239 = vst [vmem:[#allocation2 + $0x120] sm:$0xff] %v5414_v37 }
  0x9b   : > { %1240 = vst [vmem:[#allocation2 + $0x128] sm:$0xff] %v5414_v37 }
  0x9c   : > { %1241 = vst [vmem:[#allocation2 + $0x130] sm:$0x3] %v5414_v37 }
  0x9d   : > { %1242 = vst [vmem:[#allocation2 + $0x138] sm:$0xff] %v5414_v37 }
  0x9e   : > { %1243 = vst [vmem:[#allocation2 + $0x140] sm:$0xff] %v5414_v37 }
  0x9f   : > { %1244 = vst [vmem:[#allocation2 + $0x148] sm:$0x3] %v5414_v37 }
  0xa0   : > { %912 = vmatmul.bf16.vlgmr.msrb.gmra.mxu1 %v492_v19  ;;  %1001 = vmatmul.bf16.vlgmr.msrb.gmra.mxu2 %v493_v20  ;;  %1245 = vst [vmem:[#allocation2 + $0x150] sm:$0xff] %v5414_v37 }
  0xa1   : > { %1246 = vst [vmem:[#allocation2 + $0x158] sm:$0xff] %v5414_v37 }
  0xa2   : > { %1247 = vst [vmem:[#allocation2 + $0x160] sm:$0x3] %v5414_v37 }
  0xa3   : > { %1090 = vmatmul.bf16.vlgmr.msrb.gmra.mxu3 %v494_v21  ;;  %v4950_v21 = vld [vmem:[#allocation8 + $0x10] sm:$0xff]  ;;  %1248 = vst [vmem:[#allocation2 + $0x168] sm:$0xff] %v5414_v37 }
  0xa4   : > { %2308 = vmatpush.bf16.msrb.mxu0 %v4950_v21  ;;  %v526_v21 = vpack.c.bf16 %v434_v6, %v430_v0  ;;  %1249 = vst [vmem:[#allocation2 + $0x170] sm:$0xff] %v5414_v37 }
  0xa5   : > { %1250 = vst [vmem:[#allocation2 + $0x178] sm:$0x3] %v5414_v37 }
  0xa6   : > { %1251 = vst [vmem:[#allocation2 + $0x180] sm:$0xff] %v5414_v37 }
  0xa7   : > { %1252 = vst [vmem:[#allocation2 + $0x188] sm:$0xff] %v5414_v37 }
  0xa8   : > { %1253 = vst [vmem:[#allocation2 + $0x190] sm:$0x3] %v5414_v37 }
  0xa9   : > { %1254 = vst [vmem:[#allocation2 + $0x198] sm:$0xff] %v5414_v37 }
  0xaa   : > { %1255 = vst [vmem:[#allocation2 + $0x1a0] sm:$0xff] %v5414_v37 }
  0xab   : > { %1256 = vst [vmem:[#allocation2 + $0x1a8] sm:$0x3] %v5414_v37 }
  0xb0   : > { %917 = vmatmul.bf16.gmra.mxu1 %v496_v31  ;;  %1006 = vmatmul.bf16.gmra.mxu2 %v497_v32  ;;  %v517_v31 = vpack.c.bf16 %v417_v25, %v413_v24  ;;  %v4949_v32 = vld [vmem:[#allocation8 + $0x8] sm:$0xff] }
  0xb1   : > { %2309 = vmatpush.bf16.msrb.mxu0 %v4949_v32 }
  0xb3   : > { %1095 = vmatmul.bf16.gmra.mxu3 %v498_v33 }
  0xb5   : > { %2310 = vmatpush.bf16.msrb.mxu0 %v4948_v35  ;;  %v440_v35 = vld [vmem:[%s5578_s15 + $0x268] sm:$0xff] }
  0xb9   : > { %2659 = vmatpush.bf16.msra.mxu0 %v4987_v8 }
  0xc0   : > { %922 = vmatmul.bf16.gmra.mxu1 %v500_v40  ;;  %1011 = vmatmul.bf16.gmra.mxu2 %v501_v41  ;;  %v5415_v40 = vmov 0.0|0.0   ;;  %v420_v41 = vld [vmem:[%s5578_s15 + $0x1c8] sm:$0xff] }
  0xc1   : > { %2311 = vmatmul.bf16.vlgmr.msrb.gmra.mxu0 %v5415_v40  ;;  %v437_v40 = vld [vmem:[%s5578_s15 + $0x250] sm:$0xff] }
  0xc3   : > { %1100 = vmatmul.bf16.gmra.mxu3 %v502_v42  ;;  %v424_v42 = vld [vmem:[%s5578_s15 + $0x1e8] sm:$0xff] }
  0xd0   : > { %927 = vmatmul.bf16.gmra.mxu1 %v504_v49  ;;  %1016 = vmatmul.bf16.gmra.mxu2 %v505_v50  ;;  %v520_v49 = vpack.c.bf16 %v424_v42, %v420_v41  ;;  %v521_v50 = vpack.c.bf16 %v425_v44, %v421_v43  ;;  %v441_v41 = vld [vmem:[%s5578_s15 + $0x270] sm:$0xff]  ;;  %v438_v42 = vld [vmem:[%s5578_s15 + $0x258] sm:$0xff] }
  0xd1   : > { %v442_v44 = vld [vmem:[%s5578_s15 + $0x278] sm:$0xff] }
  0xd3   : > { %1105 = vmatmul.bf16.gmra.mxu3 %v506_v51 }
  0xdd   : > { %v5654_v62 = vpop.f32.mrf.mxu1 }
  0xdf   : > { %v824_v53 = vpop.f32.mrf.mxu0 }
  0xe0   : > { %932 = vmatmul.bf16.gmra.mxu1 %v508_v60  ;;  %1021 = vmatmul.bf16.gmra.mxu2 %v509_v61  ;;  %v432_v60 = vld [vmem:[%s5578_s15 + $0x228] sm:$0xff]  ;;  %v429_v61 = vld [vmem:[%s5578_s15 + $0x210] sm:$0xff]  ;;  %v825_v10 = vadd.f32 %v5741_v58, %v824_v53 }
  0xe3   : > { %1110 = vmatmul.bf16.gmra.mxu3 %v510_v63  ;;  %v5656_v1 = vpop.f32.mrf.mxu2  ;;  %v433_v63 = vld [vmem:[%s5578_s15 + $0x230] sm:$0xff] }
  0xe5   : > { %v5660_v3 = vpop.f32.mrf.mxu1 }
  0xe6   : > { %v5658_v2 = vpop.f32.mrf.mxu3 }
  0xe7   : > { %v826_v59 = vpop.f32.mrf.mxu0 }
  0xeb   : > { %v5668_v11 = vpop.f32.mrf.mxu2 }
  0xed   : > { %v5672_v15 = vpop.f32.mrf.mxu1 }
  0xee   : > { %v5670_v12 = vpop.f32.mrf.mxu3 }
  0xef   : > { %v829_v23 = vpop.f32.mrf.mxu0 }
  0xf0   : > { %937 = vmatmul.bf16.gmra.mxu1 %v512_v13  ;;  %1026 = vmatmul.bf16.gmra.mxu2 %v513_v14  ;;  %v524_v14 = vpack.c.bf16 %v432_v60, %v428_v57  ;;  %v529_v60 = vpack.c.bf16 %v441_v41, %v437_v40 }
  0xf3   : > { %1115 = vmatmul.bf16.gmra.mxu3 %v514_v16  ;;  %v5674_v18 = vpop.f32.mrf.mxu2  ;;  %v525_v16 = vpack.c.bf16 %v433_v63, %v429_v61  ;;  %v530_v63 = vpack.c.bf16 %v442_v44, %v438_v42 }
  0xf5   : > { %v5678_v20 = vpop.f32.mrf.mxu1 }
  0xf6   : > { %v5676_v19 = vpop.f32.mrf.mxu3 }
  0xf7   : > { %v831_v57 = vpop.f32.mrf.mxu0 }
  0xfb   : > { %v5686_v28 = vpop.f32.mrf.mxu2 }
  0xfd   : > { %v5690_v33 = vpop.f32.mrf.mxu1 }
  0xfe   : > { %v5688_v29 = vpop.f32.mrf.mxu3 }
 0x100   : > { %942 = vmatmul.bf16.gmra.mxu1 %v516_v30  ;;  %1031 = vmatmul.bf16.gmra.mxu2 %v517_v31  ;;  %v827_v31 = vadd.f32 %v5741_v58, %v826_v59 }
 0x103   : > { %1120 = vmatmul.bf16.gmra.mxu3 %v518_v34  ;;  %v5692_v36 = vpop.f32.mrf.mxu2  ;;  %v436_v34 = vld [vmem:[%s5578_s15 + $0x248] sm:$0xff] }
 0x104   : > { %v528_v59 = vpack.c.bf16 %v440_v35, %v436_v34  ;;  %v450_v34 = vld [vmem:[%s5578_s15 + $0x2b8] sm:$0xff] }
 0x105   : > { %v5698_v39 = vpop.f32.mrf.mxu1 }
 0x106   : > { %v5695_v38 = vpop.f32.mrf.mxu3 }
 0x10b   : > { %v5712_v47 = vpop.f32.mrf.mxu2 }
 0x10d   : > { %v5718_v51 = vpop.f32.mrf.mxu1 }
 0x10e   : > { %v5715_v48 = vpop.f32.mrf.mxu3 }
 0x110   : > { %947 = vmatmul.bf16.gmra.mxu1 %v520_v49  ;;  %1036 = vmatmul.bf16.gmra.mxu2 %v521_v50  ;;  %v830_v49 = vadd.f32 %v5741_v58, %v829_v23  ;;  %v832_v23 = vadd.f32 %v5741_v58, %v831_v57 }
 0x113   : > { %1125 = vmatmul.bf16.gmra.mxu3 %v522_v52  ;;  %v5726_v54 = vpop.f32.mrf.mxu2 }
 0x115   : > { %v5732_v56 = vpop.f32.mrf.mxu1 }
 0x116   : > { %v5729_v55 = vpop.f32.mrf.mxu3 }
 0x11b   : > { %v5751_v9 = vpop.f32.mrf.mxu2 }
 0x11d   : > { %v913_v17 = vpop.f32.mrf.mxu1 }
 0x11e   : > { %v5755_v13 = vpop.f32.mrf.mxu3  ;;  %v914_v22 = vadd.f32 %v913_v17, %v825_v10 }
 0x120   : > { %952 = vmatmul.bf16.gmra.mxu1 %v524_v14  ;;  %1041 = vmatmul.bf16.gmra.mxu2 %v525_v16  ;;  %v4962_v14 = vld [vmem:[#allocation8 + $0x70] sm:$0xff] }
 0x121   : > { %v4986_v16 = vld [vmem:[#allocation8 + $0x130] sm:$0xff]  ;;  %2393 = vmatpush.bf16.msra.mxu1 %v4962_v14  ;;  %v456_v14 = vld [vmem:[%s5578_s15 + $0x2e8] sm:$0xff] }
 0x122   : > { %2660 = vmatpush.bf16.msra.mxu0 %v4986_v16  ;;  %v453_v16 = vld [vmem:[%s5578_s15 + $0x2d0] sm:$0xff] }
 0x123   : > { %1130 = vmatmul.bf16.gmra.mxu3 %v526_v21  ;;  %v1002_v24 = vpop.f32.mrf.mxu2 }
 0x124   : > { %v1003_v25 = vadd.f32 %v1002_v24, %v914_v22  ;;  %v834_v22 = vpop.f32.mrf.mxu0 }
 0x125   : > { %v915_v27 = vpop.f32.mrf.mxu1  ;;  %v835_v40 = vadd.f32 %v5741_v58, %v834_v22 }
 0x126   : > { %v1091_v26 = vpop.f32.mrf.mxu3  ;;  %v916_v43 = vadd.f32 %v915_v27, %v827_v31  ;;  %v445_v27 = vld [vmem:[%s5578_s15 + $0x290] sm:$0xff] }
 0x127   : > { %v1092_v30 = vadd.f32 %v1091_v26, %v1003_v25  ;;  %v444_v25 = vld [vmem:[%s5578_s15 + $0x288] sm:$0xff] }
 0x128   : > { %v448_v26 = vld [vmem:[%s5578_s15 + $0x2a8] sm:$0xff] }
 0x129   : > { %v1171_v32 = vmax.f32 %v1092_v30, 0.0  ;;  %v449_v30 = vld [vmem:[%s5578_s15 + $0x2b0] sm:$0xff] }
 0x12a   : > { %v533_v44 = vpack.c.bf16 %v449_v30, %v445_v27 }
 0x12b   : > { %1258 = vst [vmem:[#allocation2 + $0x19] sm:$0xff] %v1171_v32  ;;  %v1004_v50 = vpop.f32.mrf.mxu2 }
 0x12c   : > { %v1005_v52 = vadd.f32 %v1004_v50, %v916_v43  ;;  %v532_v43 = vpack.c.bf16 %v448_v26, %v444_v25  ;;  %v4969_v25 = vld [vmem:[#allocation8 + $0xa8] sm:$0xff] }
 0x12d   : > { %v918_v61 = vpop.f32.mrf.mxu1  ;;  %v4977_v26 = vld [vmem:[#allocation8 + $0xe8] sm:$0xff]  ;;  %2483 = vmatpush.bf16.msra.mxu2 %v4969_v25 }
 0x12e   : > { %v1093_v53 = vpop.f32.mrf.mxu3  ;;  %v919_v5 = vadd.f32 %v918_v61, %v830_v49  ;;  %2572 = vmatpush.bf16.msra.mxu3 %v4977_v26 }
 0x12f   : > { %v1094_v0 = vadd.f32 %v1093_v53, %v1005_v52  ;;  %v836_v52 = vpop.f32.mrf.mxu0 }
 0x130   : > { %957 = vmatmul.bf16.gmra.mxu1 %v528_v59  ;;  %1046 = vmatmul.bf16.gmra.mxu2 %v529_v60 }
 0x131   : > { %v1172_v4 = vmax.f32 %v1094_v0, 0.0 }
 0x132   : > { %v1292_v53 = vld [vmem:[#allocation2 + $0x18] sm:$0xff] }
 0x133   : > { %1135 = vmatmul.bf16.gmra.mxu3 %v530_v63  ;;  %v5787_v6 = vpack.c.bf16 %v1172_v4, %v1171_v32  ;;  %v1007_v7 = vpop.f32.mrf.mxu2  ;;  %1259 = vst [vmem:[#allocation2 + $0x21] sm:$0xff] %v1172_v4  ;;  %v446_v32 = vld [vmem:[%s5578_s15 + $0x298] sm:$0xff] }
 0x134   : > { %v1008_v8 = vadd.f32 %v1007_v7, %v919_v5  ;;  %v534_v46 = vpack.c.bf16 %v450_v34, %v446_v32  ;;  %v837_v7 = vadd.f32 %v5741_v58, %v836_v52 }
 0x135   : > { %v920_v17 = vpop.f32.mrf.mxu1 }
 0x136   : > { %v1096_v10 = vpop.f32.mrf.mxu3  ;;  %v921_v31 = vadd.f32 %v920_v17, %v832_v23  ;;  %v457_v17 = vld [vmem:[%s5578_s15 + $0x2f0] sm:$0xff] }
 0x137   : > { %v1097_v21 = vadd.f32 %v1096_v10, %v1008_v8  ;;  %v452_v10 = vld [vmem:[%s5578_s15 + $0x2c8] sm:$0xff]  ;;  %v839_v23 = vpop.f32.mrf.mxu0 }
 0x138   : > { %v840_v27 = vadd.f32 %v5741_v58, %v839_v23  ;;  %v536_v34 = vpack.c.bf16 %v456_v14, %v452_v10  ;;  %v464_v10 = vld [vmem:[%s5578_s15 + $0x328] sm:$0xff]  ;;  %v461_v14 = vld [vmem:[%s5578_s15 + $0x310] sm:$0xff] }
 0x139   : > { %v1173_v24 = vmax.f32 %v1097_v21, 0.0  ;;  %v454_v21 = vld [vmem:[%s5578_s15 + $0x2d8] sm:$0xff] }
 0x13a   : > { %v1293_v57 = vld [vmem:[#allocation2 + $0x20] sm:$0xff] }
 0x13b   : > { %1260 = vst [vmem:[#allocation2 + $0x31] sm:$0xff] %v1173_v24  ;;  %v1009_v35 = vpop.f32.mrf.mxu2  ;;  %v5804_v59 = vpack.c.bf16 %v1293_v57, %v1292_v53  ;;  %v4961_v57 = vld [vmem:[#allocation8 + $0x68] sm:$0xff] }
 0x13c   : > { %v1010_v41 = vadd.f32 %v1009_v35, %v921_v31  ;;  %v537_v35 = vpack.c.bf16 %v457_v17, %v453_v16  ;;  %2394 = vmatpush.bf16.msra.mxu1 %v4961_v57  ;;  %v465_v16 = vld [vmem:[%s5578_s15 + $0x330] sm:$0xff] }
 0x13d   : > { %v923_v45 = vpop.f32.mrf.mxu1  ;;  %2316 = vmatmul.bf16.gmra.mxu0 %v5804_v59 }
 0x13e   : > { %v1098_v42 = vpop.f32.mrf.mxu3  ;;  %v924_v37 = vadd.f32 %v923_v45, %v835_v40 }
 0x13f   : > { %v1099_v49 = vadd.f32 %v1098_v42, %v1010_v41 }
 0x140   : > { %962 = vmatmul.bf16.gmra.mxu1 %v532_v43  ;;  %1051 = vmatmul.bf16.gmra.mxu2 %v533_v44 }
 0x141   : > { %v1174_v50 = vmax.f32 %v1099_v49, 0.0 }
 0x142   : > { %v1294_v44 = vld [vmem:[#allocation2 + $0x30] sm:$0xff] }
 0x143   : > { %1140 = vmatmul.bf16.gmra.mxu3 %v534_v46  ;;  %1261 = vst [vmem:[#allocation2 + $0x39] sm:$0xff] %v1174_v50  ;;  %v5806_v60 = vpack.c.bf16 %v1174_v50, %v1173_v24  ;;  %v1012_v61 = vpop.f32.mrf.mxu2  ;;  %v458_v24 = vld [vmem:[%s5578_s15 + $0x2f8] sm:$0xff] }
 0x144   : > { %v1013_v63 = vadd.f32 %v1012_v61, %v924_v37  ;;  %v538_v42 = vpack.c.bf16 %v458_v24, %v454_v21  ;;  %v4985_v61 = vld [vmem:[#allocation8 + $0x128] sm:$0xff]  ;;  %v462_v21 = vld [vmem:[%s5578_s15 + $0x318] sm:$0xff] }
 0x145   : > { %v925_v4 = vpop.f32.mrf.mxu1  ;;  %2661 = vmatpush.bf16.msra.mxu0 %v4985_v61  ;;  %v468_v61 = vld [vmem:[%s5578_s15 + $0x348] sm:$0xff] }
 0x146   : > { %v1101_v0 = vpop.f32.mrf.mxu3  ;;  %v926_v22 = vadd.f32 %v925_v4, %v837_v7 }
 0x147   : > { %v1102_v5 = vadd.f32 %v1101_v0, %v1013_v63  ;;  %v841_v63 = vpop.f32.mrf.mxu0 }
 0x149   : > { %v1175_v8 = vmax.f32 %v1102_v5, 0.0  ;;  %v842_v5 = vadd.f32 %v5741_v58, %v841_v63  ;;  %v472_v63 = vld [vmem:[%s5578_s15 + $0x368] sm:$0xff] }
 0x14a   : > { %v1295_v40 = vld [vmem:[#allocation2 + $0x38] sm:$0xff] }
 0x14b   : > { %1262 = vst [vmem:[#allocation2 + $0x49] sm:$0xff] %v1175_v8  ;;  %v1014_v30 = vpop.f32.mrf.mxu2  ;;  %v5817_v46 = vpack.c.bf16 %v1295_v40, %v1294_v44  ;;  %v845_v40 = vadd.f32 %v5741_v58, %v5654_v62 }
 0x14c   : > { %v1015_v31 = vadd.f32 %v1014_v30, %v926_v22  ;;  %v466_v22 = vld [vmem:[%s5578_s15 + $0x338] sm:$0xff] }
 0x14d   : > { %v928_v41 = vpop.f32.mrf.mxu1  ;;  %2321 = vmatmul.bf16.gmra.mxu0 %v5817_v46 }
 0x14e   : > { %v1103_v32 = vpop.f32.mrf.mxu3  ;;  %v929_v49 = vadd.f32 %v928_v41, %v840_v27  ;;  %v541_v27 = vpack.c.bf16 %v465_v16, %v461_v14  ;;  %v4976_v14 = vld [vmem:[#allocation8 + $0xe0] sm:$0xff] }
 0x14f   : > { %v1104_v43 = vadd.f32 %v1103_v32, %v1015_v31  ;;  %v542_v32 = vpack.c.bf16 %v466_v22, %v462_v21  ;;  %v544_v22 = vpack.c.bf16 %v472_v63, %v468_v61  ;;  %2573 = vmatpush.bf16.msra.mxu3 %v4976_v14  ;;  %v476_v63 = vld [vmem:[%s5578_s15 + $0x388] sm:$0xff]  ;;  %v4958_v14 = vld [vmem:[#allocation8 + $0x50] sm:$0xff] }
 0x150   : > { %967 = vmatmul.bf16.gmra.mxu1 %v536_v34  ;;  %1056 = vmatmul.bf16.gmra.mxu2 %v537_v35 }
 0x151   : > { %v1176_v45 = vmax.f32 %v1104_v43, 0.0 }
 0x152   : > { %v1296_v35 = vld [vmem:[#allocation2 + $0x48] sm:$0xff] }
 0x153   : > { %1145 = vmatmul.bf16.gmra.mxu3 %v538_v42  ;;  %1263 = vst [vmem:[#allocation2 + $0x51] sm:$0xff] %v1176_v45  ;;  %v5819_v50 = vpack.c.bf16 %v1176_v45, %v1175_v8  ;;  %v1017_v37 = vpop.f32.mrf.mxu2  ;;  %v460_v8 = vld [vmem:[%s5578_s15 + $0x308] sm:$0xff] }
 0x154   : > { %v1018_v52 = vadd.f32 %v1017_v37, %v929_v49  ;;  %v540_v26 = vpack.c.bf16 %v464_v10, %v460_v8  ;;  %v474_v8 = vld [vmem:[%s5578_s15 + $0x378] sm:$0xff]  ;;  %v4968_v10 = vld [vmem:[#allocation8 + $0xa0] sm:$0xff] }
 0x155   : > { %v930_v0 = vpop.f32.mrf.mxu1  ;;  %2484 = vmatpush.bf16.msra.mxu2 %v4968_v10 }
 0x156   : > { %v1106_v53 = vpop.f32.mrf.mxu3  ;;  %v931_v17 = vadd.f32 %v930_v0, %v842_v5  ;;  %v469_v0 = vld [vmem:[%s5578_s15 + $0x350] sm:$0xff]  ;;  %v470_v5 = vld [vmem:[%s5578_s15 + $0x358] sm:$0xff] }
 0x157   : > { %v1107_v4 = vadd.f32 %v1106_v53, %v1018_v52  ;;  %v847_v53 = vadd.f32 %v5741_v58, %v5660_v3 }
 0x159   : > { %v1177_v7 = vmax.f32 %v1107_v4, 0.0  ;;  %v473_v4 = vld [vmem:[%s5578_s15 + $0x370] sm:$0xff] }
 0x15a   : > { %v1297_v30 = vld [vmem:[#allocation2 + $0x50] sm:$0xff] }
 0x15b   : > { %1264 = vst [vmem:[#allocation2 + $0x61] sm:$0xff] %v1177_v7  ;;  %v1019_v23 = vpop.f32.mrf.mxu2  ;;  %v5831_v42 = vpack.c.bf16 %v1297_v30, %v1296_v35  ;;  %v850_v30 = vadd.f32 %v5741_v58, %v5672_v15 }
 0x15c   : > { %v1020_v24 = vadd.f32 %v1019_v23, %v931_v17  ;;  %v545_v23 = vpack.c.bf16 %v473_v4, %v469_v0  ;;  %v480_v0 = vld [vmem:[%s5578_s15 + $0x3a8] sm:$0xff]  ;;  %v477_v4 = vld [vmem:[%s5578_s15 + $0x390] sm:$0xff] }
 0x15d   : > { %v933_v31 = vpop.f32.mrf.mxu1  ;;  %2326 = vmatmul.bf16.gmra.mxu0 %v5831_v42 }
 0x15e   : > { %v1108_v25 = vpop.f32.mrf.mxu3  ;;  %v934_v43 = vadd.f32 %v933_v31, %v845_v40 }
 0x15f   : > { %v1109_v34 = vadd.f32 %v1108_v25, %v1020_v24  ;;  %v546_v25 = vpack.c.bf16 %v474_v8, %v470_v5  ;;  %v481_v5 = vld [vmem:[%s5578_s15 + $0x3b0] sm:$0xff]  ;;  %v482_v8 = vld [vmem:[%s5578_s15 + $0x3b8] sm:$0xff] }
 0x160   : > { %972 = vmatmul.bf16.gmra.mxu1 %v540_v26  ;;  %1061 = vmatmul.bf16.gmra.mxu2 %v541_v27 }
 0x161   : > { %v1178_v41 = vmax.f32 %v1109_v34, 0.0 }
 0x162   : > { %v1298_v27 = vld [vmem:[#allocation2 + $0x60] sm:$0xff] }
 0x163   : > { %1150 = vmatmul.bf16.gmra.mxu3 %v542_v32  ;;  %1265 = vst [vmem:[#allocation2 + $0x69] sm:$0xff] %v1178_v41  ;;  %v5833_v44 = vpack.c.bf16 %v1178_v41, %v1177_v7  ;;  %v1022_v45 = vpop.f32.mrf.mxu2  ;;  %v4960_v41 = vld [vmem:[#allocation8 + $0x60] sm:$0xff] }
 0x164   : > { %v1023_v62 = vadd.f32 %v1022_v45, %v934_v43  ;;  %v4984_v45 = vld [vmem:[#allocation8 + $0x120] sm:$0xff]  ;;  %2395 = vmatpush.bf16.msra.mxu1 %v4960_v41  ;;  %v855_v41 = vadd.f32 %v5741_v58, %v5690_v33 }
 0x165   : > { %v935_v37 = vpop.f32.mrf.mxu1  ;;  %2662 = vmatpush.bf16.msra.mxu0 %v4984_v45  ;;  %v4964_v33 = vld [vmem:[#allocation8 + $0x80] sm:$0xff] }
 0x166   : > { %v1111_v49 = vpop.f32.mrf.mxu3  ;;  %v936_v7 = vadd.f32 %v935_v37, %v847_v53  ;;  %v4959_v37 = vld [vmem:[#allocation8 + $0x58] sm:$0xff] }
 0x167   : > { %v1112_v52 = vadd.f32 %v1111_v49, %v1023_v62  ;;  %v4975_v53 = vld [vmem:[#allocation8 + $0xd8] sm:$0xff] }
 0x168   : > { %2396 = vmatpush.bf16.msra.mxu1 %v4959_v37  ;;  %2574 = vmatpush.bf16.msra.mxu3 %v4975_v53  ;;  %v4956_v37 = vld [vmem:[#allocation8 + $0x40] sm:$0xff] }
 0x169   : > { %v1179_v57 = vmax.f32 %v1112_v52, 0.0  ;;  %v4967_v52 = vld [vmem:[#allocation8 + $0x98] sm:$0xff] }
 0x16a   : > { %v1299_v24 = vld [vmem:[#allocation2 + $0x68] sm:$0xff]  ;;  %2485 = vmatpush.bf16.msra.mxu2 %v4967_v52  ;;  %v4972_v52 = vld [vmem:[#allocation8 + $0xc0] sm:$0xff] }
 0x16b   : > { %1266 = vst [vmem:[#allocation2 + $0x79] sm:$0xff] %v1179_v57  ;;  %v1024_v16 = vpop.f32.mrf.mxu2  ;;  %v5846_v32 = vpack.c.bf16 %v1299_v24, %v1298_v27  ;;  %v548_v24 = vpack.c.bf16 %v480_v0, %v476_v63  ;;  %v4957_v27 = vld [vmem:[#allocation8 + $0x48] sm:$0xff] }
 0x16c   : > { %v1025_v17 = vadd.f32 %v1024_v16, %v936_v7  ;;  %v478_v7 = vld [vmem:[%s5578_s15 + $0x398] sm:$0xff]  ;;  %v4966_v16 = vld [vmem:[#allocation8 + $0x90] sm:$0xff]  ;;  %2397 = vmatpush.bf16.msra.mxu1 %v4958_v14 }
 0x16d   : > { %v938_v3 = vpop.f32.mrf.mxu1  ;;  %2331 = vmatmul.bf16.gmra.mxu0 %v5846_v32 }
 0x16e   : > { %v1113_v21 = vpop.f32.mrf.mxu3  ;;  %v939_v34 = vadd.f32 %v938_v3, %v850_v30  ;;  %2486 = vmatpush.bf16.msra.mxu2 %v4966_v16  ;;  %v486_v16 = vld [vmem:[%s5578_s15 + $0x3d8] sm:$0xff] }
 0x16f   : > { %v1114_v26 = vadd.f32 %v1113_v21, %v1025_v17  ;;  %v4974_v17 = vld [vmem:[#allocation8 + $0xd0] sm:$0xff] }
 0x170   : > { %977 = vmatmul.bf16.gmra.mxu1 %v544_v22  ;;  %1066 = vmatmul.bf16.gmra.mxu2 %v545_v23 }
 0x171   : > { %v1180_v31 = vmax.f32 %v1114_v26, 0.0  ;;  %v550_v26 = vpack.c.bf16 %v482_v8, %v478_v7  ;;  %2575 = vmatpush.bf16.msra.mxu3 %v4974_v17  ;;  %2398 = vmatpush.bf16.msra.mxu1 %v4957_v27  ;;  %v488_v7 = vld [vmem:[%s5578_s15 + $0x3e8] sm:$0xff]  ;;  %v485_v8 = vld [vmem:[%s5578_s15 + $0x3d0] sm:$0xff]  ;;  %v490_v17 = vld [vmem:[%s5578_s15 + $0x3f8] sm:$0xff] }
 0x173   : > { %1155 = vmatmul.bf16.gmra.mxu3 %v546_v25  ;;  %1267 = vst [vmem:[#allocation2 + $0x81] sm:$0xff] %v1180_v31  ;;  %v5848_v35 = vpack.c.bf16 %v1180_v31, %v1179_v57  ;;  %v1027_v40 = vpop.f32.mrf.mxu2  ;;  %v852_v57 = vadd.f32 %v5741_v58, %v5678_v20  ;;  %v549_v20 = vpack.c.bf16 %v481_v5, %v477_v4  ;;  %v4965_v31 = vld [vmem:[#allocation8 + $0x88] sm:$0xff] }
 0x174   : > { %v1028_v43 = vadd.f32 %v1027_v40, %v939_v34  ;;  %v4973_v34 = vld [vmem:[#allocation8 + $0xc8] sm:$0xff]  ;;  %2487 = vmatpush.bf16.msra.mxu2 %v4965_v31 }
 0x175   : > { %v940_v62 = vpop.f32.mrf.mxu1  ;;  %v1300_v40 = vld [vmem:[#allocation2 + $0x78] sm:$0xff]  ;;  %2576 = vmatpush.bf16.msra.mxu3 %v4973_v34  ;;  %2399 = vmatpush.bf16.msra.mxu1 %v4956_v37  ;;  %v4983_v37 = vld [vmem:[#allocation8 + $0x118] sm:$0xff] }
 0x176   : > { %v1116_v15 = vpop.f32.mrf.mxu3  ;;  %v941_v10 = vadd.f32 %v940_v62, %v852_v57  ;;  %v484_v5 = vld [vmem:[%s5578_s15 + $0x3c8] sm:$0xff]  ;;  %2663 = vmatpush.bf16.msra.mxu0 %v4983_v37 }
 0x177   : > { %v1117_v49 = vadd.f32 %v1116_v15, %v1028_v43 }
 0x178   : > { %2488 = vmatpush.bf16.msra.mxu2 %v4964_v33 }
 0x179   : > { %v1181_v61 = vmax.f32 %v1117_v49, 0.0  ;;  %2577 = vmatpush.bf16.msra.mxu3 %v4972_v52 }
 0x17a   : > { %v1301_v3 = vld [vmem:[#allocation2 + $0x80] sm:$0xff] }
 0x17b   : > { %1268 = vst [vmem:[#allocation2 + $0x91] sm:$0xff] %v1181_v61  ;;  %v1029_v21 = vpop.f32.mrf.mxu2  ;;  %v5861_v15 = vpack.c.bf16 %v1301_v3, %v1300_v40 }
 0x17c   : > { %v1030_v22 = vadd.f32 %v1029_v21, %v941_v10  ;;  %v489_v10 = vld [vmem:[%s5578_s15 + $0x3f0] sm:$0xff] }
 0x17d   : > { %v943_v25 = vpop.f32.mrf.mxu1  ;;  %2336 = vmatmul.bf16.gmra.mxu0 %v5861_v15 }
 0x17e   : > { %v1118_v23 = vpop.f32.mrf.mxu3  ;;  %v944_v45 = vadd.f32 %v943_v25, %v855_v41 }
 0x17f   : > { %v1119_v30 = vadd.f32 %v1118_v23, %v1030_v22 }
 0x180   : > { %982 = vmatmul.bf16.gmra.mxu1 %v548_v24  ;;  %1071 = vmatmul.bf16.gmra.mxu2 %v549_v20  ;;  %v552_v24 = vpack.c.bf16 %v488_v7, %v484_v5  ;;  %v553_v20 = vpack.c.bf16 %v489_v10, %v485_v8 }
 0x181   : > { %v1182_v43 = vmax.f32 %v1119_v30, 0.0 }
 0x182   : > { %v1302_v30 = vld [vmem:[#allocation2 + $0x90] sm:$0xff] }
 0x183   : > { %1160 = vmatmul.bf16.gmra.mxu3 %v550_v26  ;;  %1269 = vst [vmem:[#allocation2 + $0x99] sm:$0xff] %v1182_v43  ;;  %v5863_v62 = vpack.c.bf16 %v1182_v43, %v1181_v61  ;;  %v1032_v49 = vpop.f32.mrf.mxu2  ;;  %v857_v61 = vadd.f32 %v5741_v58, %v5698_v39  ;;  %v554_v26 = vpack.c.bf16 %v490_v17, %v486_v16 }
 0x184   : > { %v1033_v53 = vadd.f32 %v1032_v49, %v944_v45  ;;  %v860_v39 = vadd.f32 %v5741_v58, %v5718_v51  ;;  %v862_v51 = vadd.f32 %v5741_v58, %v5732_v56 }
 0x185   : > { %v945_v63 = vpop.f32.mrf.mxu1 }
 0x186   : > { %v1121_v57 = vpop.f32.mrf.mxu3  ;;  %v946_v14 = vadd.f32 %v945_v63, %v857_v61  ;;  %v1323_v63 = vld [vmem:[#allocation2 + $0x9] sm:$0xff] }
 0x187   : > { %v1122_v0 = vadd.f32 %v1121_v57, %v1033_v53  ;;  %v1322_v57 = vld [vmem:[#allocation2 + $0x1] sm:$0xff]  ;;  %v1355_v61 = vld [vmem:[#allocation2 + $0xa] sm:$0xff] }
 0x188   : > { %v1580_v10 = vpack.c.bf16 %v1323_v63, %v1322_v57  ;;  %v5893_v57 = vpop.f32.mrf.mxu0 }
 0x189   : > { %v1183_v4 = vmax.f32 %v1122_v0, 0.0  ;;  %v1354_v0 = vld [vmem:[#allocation2 + $0x2] sm:$0xff] }
 0x18a   : > { %v1303_v3 = vld [vmem:[#allocation2 + $0x98] sm:$0xff] }
 0x18b   : > { %1270 = vst [vmem:[#allocation2 + $0xa9] sm:$0xff] %v1183_v4  ;;  %v1034_v21 = vpop.f32.mrf.mxu2  ;;  %v5876_v34 = vpack.c.bf16 %v1303_v3, %v1302_v30 }
 0x18c   : > { %v1035_v22 = vadd.f32 %v1034_v21, %v946_v14  ;;  %v1581_v14 = vpack.c.bf16 %v1355_v61, %v1354_v0  ;;  %v870_v0 = vadd.f32 %v5741_v58, %v5674_v18 }
 0x18d   : > { %v948_v25 = vpop.f32.mrf.mxu1  ;;  %2341 = vmatmul.bf16.gmra.mxu0 %v5876_v34 }
 0x18e   : > { %v1123_v23 = vpop.f32.mrf.mxu3  ;;  %v949_v40 = vadd.f32 %v948_v25, %v860_v39 }
 0x18f   : > { %v1124_v27 = vadd.f32 %v1123_v23, %v1035_v22  ;;  %v865_v23 = vadd.f32 %v5741_v58, %v5656_v1  ;;  %v867_v1 = vadd.f32 %v5741_v58, %v5668_v11 }
 0x190   : > { %987 = vmatmul.bf16.gmra.mxu1 %v552_v24  ;;  %1076 = vmatmul.bf16.gmra.mxu2 %v553_v20 }
 0x191   : > { %v1184_v31 = vmax.f32 %v1124_v27, 0.0 }
 0x192   : > { %v1304_v22 = vld [vmem:[#allocation2 + $0xa8] sm:$0xff] }
 0x193   : > { %1165 = vmatmul.bf16.gmra.mxu3 %v554_v26  ;;  %1271 = vst [vmem:[#allocation2 + $0xb1] sm:$0xff] %v1184_v31  ;;  %v5878_v41 = vpack.c.bf16 %v1184_v31, %v1183_v4  ;;  %v1037_v43 = vpop.f32.mrf.mxu2 }
 0x194   : > { %v1038_v45 = vadd.f32 %v1037_v43, %v949_v40 }
 0x195   : > { %v950_v33 = vpop.f32.mrf.mxu1 }
 0x196   : > { %v1126_v49 = vpop.f32.mrf.mxu3  ;;  %v951_v4 = vadd.f32 %v950_v33, %v862_v51 }
 0x197   : > { %v1127_v52 = vadd.f32 %v1126_v49, %v1038_v45  ;;  %v1356_v45 = vld [vmem:[#allocation2 + $0x1a] sm:$0xff] }
 0x199   : > { %v1185_v53 = vmax.f32 %v1127_v52, 0.0 }
 0x19a   : > { %v1305_v16 = vld [vmem:[#allocation2 + $0xb0] sm:$0xff] }
 0x19b   : > { %1272 = vst [vmem:[#allocation2 + $0xc1] sm:$0xff] %v1185_v53  ;;  %v1039_v5 = vpop.f32.mrf.mxu2  ;;  %v5885_v24 = vpack.c.bf16 %v1305_v16, %v1304_v22 }
 0x19c   : > { %v1040_v7 = vadd.f32 %v1039_v5, %v951_v4 }
 0x19d   : > { %v953_v17 = vpop.f32.mrf.mxu1  ;;  %2346 = vmatmul.bf16.gmra.mxu0 %v5885_v24 }
 0x19e   : > { %v1128_v8 = vpop.f32.mrf.mxu3  ;;  %v954_v20 = vadd.f32 %v953_v17, %v865_v23  ;;  %v872_v17 = vadd.f32 %v5741_v58, %v5686_v28  ;;  %v1358_v23 = vld [vmem:[#allocation2 + $0x32] sm:$0xff] }
 0x19f   : > { %v1129_v21 = vadd.f32 %v1128_v8, %v1040_v7 }
 0x1a0   : > { %2400 = vmatmul.bf16.vlgmr.msra.gmra.mxu1 %v1580_v10  ;;  %2489 = vmatmul.bf16.vlgmr.msra.gmra.mxu2 %v1581_v14  ;;  %v4982_v14 = vld [vmem:[#allocation8 + $0x110] sm:$0xff] }
 0x1a1   : > { %v1186_v56 = vmax.f32 %v1129_v21, 0.0  ;;  %2664 = vmatpush.bf16.msra.mxu0 %v4982_v14  ;;  %v5906_v21 = vpop.f32.mrf.mxu0 }
 0x1a2   : > { %v1306_v63 = vld [vmem:[#allocation2 + $0xc0] sm:$0xff] }
 0x1a3   : > { %2578 = vmatmul.bf16.vlgmr.msra.gmra.mxu3 %v5804_v59  ;;  %1273 = vst [vmem:[#allocation2 + $0xc9] sm:$0xff] %v1186_v56  ;;  %v5888_v3 = vpack.c.bf16 %v1186_v56, %v1185_v53  ;;  %v1042_v25 = vpop.f32.mrf.mxu2  ;;  %v1357_v59 = vld [vmem:[#allocation2 + $0x22] sm:$0xff]  ;;  %v1359_v56 = vld [vmem:[#allocation2 + $0x3a] sm:$0xff] }
 0x1a4   : > { %v1043_v26 = vadd.f32 %v1042_v25, %v954_v20  ;;  %v1590_v53 = vpack.c.bf16 %v1357_v59, %v1356_v45 }
 0x1a5   : > { %v955_v30 = vpop.f32.mrf.mxu1 }
 0x1a6   : > { %v1131_v27 = vpop.f32.mrf.mxu3  ;;  %v956_v40 = vadd.f32 %v955_v30, %v867_v1 }
 0x1a7   : > { %v1132_v39 = vadd.f32 %v1131_v27, %v1043_v26 }
 0x1a9   : > { %v1187_v31 = vmax.f32 %v1132_v39, 0.0  ;;  %v1599_v39 = vpack.c.bf16 %v1359_v56, %v1358_v23 }
 0x1aa   : > { %v1307_v33 = vld [vmem:[#allocation2 + $0xc8] sm:$0xff] }
 0x1ab   : > { %1274 = vst [vmem:[#allocation2 + $0xd9] sm:$0xff] %v1187_v31  ;;  %v1044_v43 = vpop.f32.mrf.mxu2  ;;  %v5897_v11 = vpack.c.bf16 %v1307_v33, %v1306_v63 }
 0x1ac   : > { %v1045_v49 = vadd.f32 %v1044_v43, %v956_v40 }
 0x1ad   : > { %v958_v52 = vpop.f32.mrf.mxu1  ;;  %2351 = vmatmul.bf16.gmra.mxu0 %v5897_v11 }
 0x1ae   : > { %v1133_v37 = vpop.f32.mrf.mxu3  ;;  %v959_v4 = vadd.f32 %v958_v52, %v870_v0  ;;  %v1360_v0 = vld [vmem:[#allocation2 + $0x4a] sm:$0xff] }
 0x1af   : > { %v1134_v51 = vadd.f32 %v1133_v37, %v1045_v49 }
 0x1b0   : > { %2405 = vmatmul.bf16.gmra.mxu1 %v5787_v6  ;;  %2494 = vmatmul.bf16.gmra.mxu2 %v1590_v53 }
 0x1b1   : > { %v1188_v61 = vmax.f32 %v1134_v51, 0.0  ;;  %v877_v51 = vadd.f32 %v5741_v58, %v5712_v47 }
 0x1b2   : > { %v1308_v1 = vld [vmem:[#allocation2 + $0xd8] sm:$0xff] }
 0x1b3   : > { %2583 = vmatmul.bf16.gmra.mxu3 %v5817_v46  ;;  %1275 = vst [vmem:[#allocation2 + $0xe1] sm:$0xff] %v1188_v61  ;;  %v5901_v5 = vpack.c.bf16 %v1188_v61, %v1187_v31  ;;  %v1047_v7 = vpop.f32.mrf.mxu2  ;;  %v875_v31 = vadd.f32 %v5741_v58, %v5692_v36  ;;  %v1361_v61 = vld [vmem:[#allocation2 + $0x52] sm:$0xff] }
 0x1b4   : > { %v1048_v8 = vadd.f32 %v1047_v7, %v959_v4 }
 0x1b5   : > { %v960_v16 = vpop.f32.mrf.mxu1 }
 0x1b6   : > { %v1136_v10 = vpop.f32.mrf.mxu3  ;;  %v961_v46 = vadd.f32 %v960_v16, %v872_v17  ;;  %v1608_v16 = vpack.c.bf16 %v1361_v61, %v1360_v0  ;;  %v880_v17 = vadd.f32 %v5741_v58, %v5726_v54  ;;  %v4981_v54 = vld [vmem:[#allocation8 + $0x108] sm:$0xff] }
 0x1b7   : > { %v1137_v18 = vadd.f32 %v1136_v10, %v1048_v8  ;;  %2665 = vmatpush.bf16.msra.mxu0 %v4981_v54 }
 0x1b9   : > { %v1189_v6 = vmax.f32 %v1137_v18, 0.0 }
 0x1ba   : > { %v1309_v26 = vld [vmem:[#allocation2 + $0xe0] sm:$0xff]  ;;  %v5913_v43 = vpop.f32.mrf.mxu0 }
 0x1bb   : > { %1276 = vst [vmem:[#allocation2 + $0xf1] sm:$0xff] %v1189_v6  ;;  %v1049_v22 = vpop.f32.mrf.mxu2  ;;  %v5910_v28 = vpack.c.bf16 %v1309_v26, %v1308_v1 }
 0x1bc   : > { %v1050_v20 = vadd.f32 %v1049_v22, %v961_v46 }
 0x1bd   : > { %v963_v27 = vpop.f32.mrf.mxu1  ;;  %2356 = vmatmul.bf16.gmra.mxu0 %v5910_v28 }
 0x1be   : > { %v1138_v25 = vpop.f32.mrf.mxu3  ;;  %v964_v45 = vadd.f32 %v963_v27, %v875_v31  ;;  %v1362_v31 = vld [vmem:[#allocation2 + $0x62] sm:$0xff] }
 0x1bf   : > { %v1139_v30 = vadd.f32 %v1138_v25, %v1050_v20 }
 0x1c0   : > { %2410 = vmatmul.bf16.gmra.mxu1 %v5806_v60  ;;  %2499 = vmatmul.bf16.gmra.mxu2 %v1599_v39 }
 0x1c1   : > { %v1190_v40 = vmax.f32 %v1139_v30, 0.0 }
 0x1c2   : > { %v5921_v53 = vpop.f32.mrf.mxu0  ;;  %v1310_v18 = vld [vmem:[#allocation2 + $0xf0] sm:$0xff] }
 0x1c3   : > { %2588 = vmatmul.bf16.gmra.mxu3 %v5831_v42  ;;  %1277 = vst [vmem:[#allocation2 + $0xf9] sm:$0xff] %v1190_v40  ;;  %v5916_v59 = vpack.c.bf16 %v1190_v40, %v1189_v6  ;;  %v1052_v49 = vpop.f32.mrf.mxu2  ;;  %v1363_v40 = vld [vmem:[#allocation2 + $0x6a] sm:$0xff] }
 0x1c4   : > { %v1053_v37 = vadd.f32 %v1052_v49, %v964_v45 }
 0x1c5   : > { %v965_v36 = vpop.f32.mrf.mxu1 }
 0x1c6   : > { %v1141_v33 = vpop.f32.mrf.mxu3  ;;  %v966_v63 = vadd.f32 %v965_v36, %v877_v51 }
 0x1c7   : > { %v1142_v52 = vadd.f32 %v1141_v33, %v1053_v37 }
 0x1c9   : > { %v1191_v60 = vmax.f32 %v1142_v52, 0.0  ;;  %v1617_v52 = vpack.c.bf16 %v1363_v40, %v1362_v31 }
 0x1ca   : > { %v1311_v8 = vld [vmem:[#allocation2 + $0xf8] sm:$0xff]  ;;  %v5928_v46 = vpop.f32.mrf.mxu0 }
 0x1cb   : > { %1278 = vst [vmem:[#allocation2 + $0x109] sm:$0xff] %v1191_v60  ;;  %v1054_v42 = vpop.f32.mrf.mxu2  ;;  %v5925_v47 = vpack.c.bf16 %v1311_v8, %v1310_v18 }
 0x1cc   : > { %v1055_v4 = vadd.f32 %v1054_v42, %v966_v63 }
 0x1cd   : > { %v968_v10 = vpop.f32.mrf.mxu1  ;;  %2361 = vmatmul.bf16.gmra.mxu0 %v5925_v47 }
 0x1ce   : > { %v1143_v7 = vpop.f32.mrf.mxu3  ;;  %v969_v22 = vadd.f32 %v968_v10, %v880_v17  ;;  %v1364_v17 = vld [vmem:[#allocation2 + $0x7a] sm:$0xff] }
 0x1cf   : > { %v1144_v14 = vadd.f32 %v1143_v7, %v1055_v4 }
 0x1d0   : > { %2415 = vmatmul.bf16.gmra.mxu1 %v5819_v50  ;;  %2504 = vmatmul.bf16.gmra.mxu2 %v1608_v16  ;;  %v882_v50 = vadd.f32 %v5741_v58, %v5751_v9 }
 0x1d1   : > { %v1192_v6 = vmax.f32 %v1144_v14, 0.0 }
 0x1d2   : > { %v5936_v39 = vpop.f32.mrf.mxu0  ;;  %v1312_v51 = vld [vmem:[#allocation2 + $0x108] sm:$0xff] }
 0x1d3   : > { %2593 = vmatmul.bf16.gmra.mxu3 %v5846_v32  ;;  %1279 = vst [vmem:[#allocation2 + $0x111] sm:$0xff] %v1192_v6  ;;  %v5931_v23 = vpack.c.bf16 %v1192_v6, %v1191_v60  ;;  %v1057_v56 = vpop.f32.mrf.mxu2  ;;  %v885_v60 = vadd.f32 %v5741_v58, %v5658_v2  ;;  %v1365_v6 = vld [vmem:[#allocation2 + $0x82] sm:$0xff] }
 0x1d4   : > { %v1058_v20 = vadd.f32 %v1057_v56, %v969_v22 }
 0x1d5   : > { %v970_v26 = vpop.f32.mrf.mxu1 }
 0x1d6   : > { %v1146_v25 = vpop.f32.mrf.mxu3  ;;  %v971_v32 = vadd.f32 %v970_v26, %v882_v50  ;;  %v1626_v26 = vpack.c.bf16 %v1365_v6, %v1364_v17 }
 0x1d7   : > { %v1147_v27 = vadd.f32 %v1146_v25, %v1058_v20 }
 0x1d9   : > { %v1193_v30 = vmax.f32 %v1147_v27, 0.0 }
 0x1da   : > { %v1313_v37 = vld [vmem:[#allocation2 + $0x110] sm:$0xff]  ;;  %v5943_v42 = vpop.f32.mrf.mxu0 }
 0x1db   : > { %1280 = vst [vmem:[#allocation2 + $0x121] sm:$0xff] %v1193_v30  ;;  %v1059_v1 = vpop.f32.mrf.mxu2  ;;  %v5940_v9 = vpack.c.bf16 %v1313_v37, %v1312_v51 }
 0x1dc   : > { %v1060_v45 = vadd.f32 %v1059_v1, %v971_v32 }
 0x1dd   : > { %v973_v33 = vpop.f32.mrf.mxu1  ;;  %2366 = vmatmul.bf16.gmra.mxu0 %v5940_v9 }
 0x1de   : > { %v1148_v49 = vpop.f32.mrf.mxu3  ;;  %v974_v0 = vadd.f32 %v973_v33, %v885_v60  ;;  %v1366_v60 = vld [vmem:[#allocation2 + $0x92] sm:$0xff] }
 0x1df   : > { %v1149_v36 = vadd.f32 %v1148_v49, %v1060_v45 }
 0x1e0   : > { %2420 = vmatmul.bf16.gmra.mxu1 %v5833_v44  ;;  %2509 = vmatmul.bf16.gmra.mxu2 %v1617_v52  ;;  %v5952_v44 = vld [vmem:[%s7139_s2] ss:$0 sm:$0xff] }
 0x1e1   : > { %v1194_v63 = vmax.f32 %v1149_v36, 0.0  ;;  %v887_v10 = vadd.f32 %v5952_v44, %v5670_v12  ;;  %v890_v50 = vadd.f32 %v5952_v44, %v5676_v19  ;;  %v4980_v19 = vld [vmem:[#allocation8 + $0x100] sm:$0xff] }
 0x1e2   : > { %v5956_v14 = vpop.f32.mrf.mxu0  ;;  %v1314_v27 = vld [vmem:[#allocation2 + $0x120] sm:$0xff]  ;;  %2666 = vmatpush.bf16.msra.mxu0 %v4980_v19 }
 0x1e3   : > { %2598 = vmatmul.bf16.gmra.mxu3 %v5861_v15  ;;  %1281 = vst [vmem:[#allocation2 + $0x129] sm:$0xff] %v1194_v63  ;;  %v5946_v61 = vpack.c.bf16 %v1194_v63, %v1193_v30  ;;  %v1062_v4 = vpop.f32.mrf.mxu2  ;;  %v1367_v63 = vld [vmem:[#allocation2 + $0x9a] sm:$0xff] }
 0x1e4   : > { %v1063_v7 = vadd.f32 %v1062_v4, %v974_v0 }
 0x1e5   : > { %v975_v2 = vpop.f32.mrf.mxu1 }
 0x1e6   : > { %v1151_v8 = vpop.f32.mrf.mxu3  ;;  %v976_v16 = vadd.f32 %v975_v2, %v887_v10 }
 0x1e7   : > { %v1152_v58 = vadd.f32 %v1151_v8, %v1063_v7 }
 0x1e9   : > { %v1195_v15 = vmax.f32 %v1152_v58, 0.0  ;;  %v1635_v58 = vpack.c.bf16 %v1367_v63, %v1366_v60 }
 0x1ea   : > { %v1315_v20 = vld [vmem:[#allocation2 + $0x128] sm:$0xff]  ;;  %v5963_v32 = vpop.f32.mrf.mxu0 }
 0x1eb   : > { %1282 = vst [vmem:[#allocation2 + $0x139] sm:$0xff] %v1195_v15  ;;  %v1064_v18 = vpop.f32.mrf.mxu2  ;;  %v5960_v12 = vpack.c.bf16 %v1315_v20, %v1314_v27 }
 0x1ec   : > { %v1065_v22 = vadd.f32 %v1064_v18, %v976_v16 }
 0x1ed   : > { %v978_v25 = vpop.f32.mrf.mxu1  ;;  %2371 = vmatmul.bf16.gmra.mxu0 %v5960_v12 }
 0x1ee   : > { %v1153_v56 = vpop.f32.mrf.mxu3  ;;  %v979_v1 = vadd.f32 %v978_v25, %v890_v50  ;;  %v5011_v50 = vld [vmem:[#allocation8 + $0x1f8] sm:$0xff] }
 0x1ef   : > { %v1154_v54 = vadd.f32 %v1153_v56, %v1065_v22  ;;  %2926 = vmatpush.bf16.msrb.mxu3 %v5011_v50 }
 0x1f0   : > { %2425 = vmatmul.bf16.gmra.mxu1 %v5848_v35  ;;  %2514 = vmatmul.bf16.gmra.mxu2 %v1626_v26  ;;  %v892_v35 = vadd.f32 %v5952_v44, %v5688_v29 }
 0x1f1   : > { %v1196_v30 = vmax.f32 %v1154_v54, 0.0  ;;  %v897_v54 = vadd.f32 %v5952_v44, %v5715_v48  ;;  %v900_v48 = vadd.f32 %v5952_v44, %v5729_v55  ;;  %v4995_v55 = vld [vmem:[#allocation8 + $0x178] sm:$0xff] }
 0x1f2   : > { %v5971_v52 = vpop.f32.mrf.mxu0  ;;  %v1316_v10 = vld [vmem:[#allocation2 + $0x138] sm:$0xff]  ;;  %2748 = vmatpush.bf16.msrb.mxu1 %v4995_v55 }
 0x1f3   : > { %2603 = vmatmul.bf16.gmra.mxu3 %v5876_v34  ;;  %1283 = vst [vmem:[#allocation2 + $0x141] sm:$0xff] %v1196_v30  ;;  %v5966_v31 = vpack.c.bf16 %v1196_v30, %v1195_v15  ;;  %v1067_v40 = vpop.f32.mrf.mxu2  ;;  %v895_v15 = vadd.f32 %v5952_v44, %v5695_v38 }
 0x1f4   : > { %v1068_v45 = vadd.f32 %v1067_v40, %v979_v1  ;;  %v1368_v1 = vld [vmem:[#allocation2 + $0xaa] sm:$0xff]  ;;  %v1369_v40 = vld [vmem:[#allocation2 + $0xb2] sm:$0xff] }
 0x1f5   : > { %v980_v37 = vpop.f32.mrf.mxu1 }
 0x1f6   : > { %v1156_v49 = vpop.f32.mrf.mxu3  ;;  %v981_v34 = vadd.f32 %v980_v37, %v892_v35  ;;  %v1644_v35 = vpack.c.bf16 %v1369_v40, %v1368_v1 }
 0x1f7   : > { %v1157_v33 = vadd.f32 %v1156_v49, %v1068_v45 }
 0x1f9   : > { %v1197_v36 = vmax.f32 %v1157_v33, 0.0 }
 0x1fa   : > { %v1317_v7 = vld [vmem:[#allocation2 + $0x140] sm:$0xff]  ;;  %v5978_v18 = vpop.f32.mrf.mxu0 }
 0x1fb   : > { %1284 = vst [vmem:[#allocation2 + $0x151] sm:$0xff] %v1197_v36  ;;  %v1069_v51 = vpop.f32.mrf.mxu2  ;;  %v5975_v29 = vpack.c.bf16 %v1317_v7, %v1316_v10 }
 0x1fc   : > { %v1070_v0 = vadd.f32 %v1069_v51, %v981_v34 }
 0x1fd   : > { %v983_v8 = vpop.f32.mrf.mxu1  ;;  %2376 = vmatmul.bf16.gmra.mxu0 %v5975_v29 }
 0x1fe   : > { %v1158_v4 = vpop.f32.mrf.mxu3  ;;  %v984_v17 = vadd.f32 %v983_v8, %v895_v15  ;;  %v6001_v15 = vld [vmem:[#allocation9] ss:$0 sm:$0xff] }
 0x1ff   : > { %v1159_v2 = vadd.f32 %v1158_v4, %v1070_v0 }
 0x200   : > { %2430 = vmatmul.bf16.gmra.mxu1 %v5863_v62  ;;  %2519 = vmatmul.bf16.gmra.mxu2 %v1635_v58 }
 0x201   : > { %v1198_v16 = vmax.f32 %v1159_v2, 0.0  ;;  %v5019_v2 = vld [vmem:[#allocation8 + $0x238] sm:$0xff] }
 0x202   : > { %v5986_v26 = vpop.f32.mrf.mxu0  ;;  %3015 = vmatpush.bf16.msrb.mxu0 %v5019_v2 }
 0x203   : > { %2608 = vmatmul.bf16.gmra.mxu3 %v5885_v24  ;;  %1285 = vst [vmem:[#allocation2 + $0x159] sm:$0xff] %v1198_v16  ;;  %v5981_v6 = vpack.c.bf16 %v1198_v16, %v1197_v36  ;;  %v1072_v22 = vpop.f32.mrf.mxu2  ;;  %v5003_v24 = vld [vmem:[#allocation8 + $0x1b8] sm:$0xff]  ;;  %v1318_v36 = vld [vmem:[#allocation2 + $0x150] sm:$0xff] }
 0x204   : > { %v1073_v56 = vadd.f32 %v1072_v22, %v984_v17  ;;  %2837 = vmatpush.bf16.msrb.mxu2 %v5003_v24 }
 0x205   : > { %v985_v38 = vpop.f32.mrf.mxu1 }
 0x206   : > { %v1161_v20 = vpop.f32.mrf.mxu3  ;;  %v986_v27 = vadd.f32 %v985_v38, %v897_v54  ;;  %v2313_v38 = vadd.f32 %v6001_v15, %v5893_v57 }
 0x207   : > { %v1162_v25 = vadd.f32 %v1161_v20, %v1073_v56  ;;  %v1370_v56 = vld [vmem:[#allocation2 + $0xc2] sm:$0xff]  ;;  %v1371_v20 = vld [vmem:[#allocation2 + $0xca] sm:$0xff] }
 0x209   : > { %v1199_v62 = vmax.f32 %v1162_v25, 0.0 }
 0x20a   : > { %v1319_v19 = vld [vmem:[#allocation2 + $0x158] sm:$0xff]  ;;  %v5993_v60 = vpop.f32.mrf.mxu0 }
 0x20b   : > { %1286 = vst [vmem:[#allocation2 + $0x169] sm:$0xff] %v1199_v62  ;;  %v1074_v30 = vpop.f32.mrf.mxu2  ;;  %v5990_v51 = vpack.c.bf16 %v1319_v19, %v1318_v36  ;;  %v5002_v36 = vld [vmem:[#allocation8 + $0x1b0] sm:$0xff] }
 0x20c   : > { %v1075_v45 = vadd.f32 %v1074_v30, %v986_v27  ;;  %2838 = vmatpush.bf16.msrb.mxu2 %v5002_v36 }
 0x20d   : > { %v988_v37 = vpop.f32.mrf.mxu1  ;;  %2381 = vmatmul.bf16.gmra.mxu0 %v5990_v51 }
 0x20e   : > { %v1163_v49 = vpop.f32.mrf.mxu3  ;;  %v989_v63 = vadd.f32 %v988_v37, %v900_v48  ;;  %v5010_v48 = vld [vmem:[#allocation8 + $0x1f0] sm:$0xff] }
 0x20f   : > { %v1164_v33 = vadd.f32 %v1163_v49, %v1075_v45  ;;  %2927 = vmatpush.bf16.msrb.mxu3 %v5010_v48 }
 0x210   : > { %2435 = vmatmul.bf16.gmra.mxu1 %v5878_v41  ;;  %2524 = vmatmul.bf16.gmra.mxu2 %v1644_v35  ;;  %v902_v41 = vadd.f32 %v5952_v44, %v5755_v13  ;;  %v1653_v13 = vpack.c.bf16 %v1371_v20, %v1370_v56 }
 0x211   : > { %v1200_v34 = vmax.f32 %v1164_v33, 0.0  ;;  %v2315_v33 = vadd.f32 %v6001_v15, %v5906_v21 }
 0x212   : > { %v6003_v16 = vpop.f32.mrf.mxu0  ;;  %v1320_v44 = vld [vmem:[#allocation2 + $0x168] sm:$0xff] }
 0x213   : > { %2613 = vmatmul.bf16.gmra.mxu3 %v5897_v11  ;;  %1287 = vst [vmem:[#allocation2 + $0x171] sm:$0xff] %v1200_v34  ;;  %v5996_v0 = vpack.c.bf16 %v1200_v34, %v1199_v62  ;;  %v1077_v4 = vpop.f32.mrf.mxu2 }
 0x214   : > { %v1078_v7 = vadd.f32 %v1077_v4, %v989_v63  ;;  %v1372_v63 = vld [vmem:[#allocation2 + $0xda] sm:$0xff]  ;;  %v2318_v4 = vadd.f32 %v6001_v15, %v5913_v43 }
 0x215   : > { %v990_v58 = vpop.f32.mrf.mxu1 }
 0x216   : > { %v1166_v8 = vpop.f32.mrf.mxu3  ;;  %v991_v17 = vadd.f32 %v990_v58, %v902_v41 }
 0x217   : > { %v1167_v10 = vadd.f32 %v1166_v8, %v1078_v7 }
 0x219   : > { %v1201_v11 = vmax.f32 %v1167_v10, 0.0  ;;  %v1419_v10 = vld [vmem:[#allocation2 + $0x21] sm:$0xff] }
 0x21a   : > { %v1321_v62 = vld [vmem:[#allocation2 + $0x170] sm:$0xff]  ;;  %v6010_v40 = vpop.f32.mrf.mxu0 }
 0x21b   : > { %1288 = vst [vmem:[#allocation2 + $0x181] sm:$0xff] %v1201_v11  ;;  %v1079_v22 = vpop.f32.mrf.mxu2  ;;  %v6007_v1 = vpack.c.bf16 %v1321_v62, %v1320_v44  ;;  %v1418_v11 = vld [vmem:[#allocation2 + $0x19] sm:$0xff] }
 0x21c   : > { %v1080_v25 = vadd.f32 %v1079_v22, %v991_v17  ;;  %v1583_v17 = vpack.c.bf16 %v1419_v10, %v1418_v11  ;;  %v2320_v22 = vadd.f32 %v6001_v15, %v5921_v53  ;;  %v2328_v10 = vadd.f32 %v6001_v15, %v5943_v42 }
 0x21d   : > { %v2401_v27 = vpop.f32.mrf.mxu1  ;;  %2386 = vmatmul.bf16.gmra.mxu0 %v6007_v1 }
 0x21e   : > { %v1168_v54 = vpop.f32.mrf.mxu3  ;;  %v2402_v50 = vadd.f32 %v2401_v27, %v2313_v38  ;;  %v4994_v38 = vld [vmem:[#allocation8 + $0x170] sm:$0xff] }
 0x21f   : > { %v1169_v24 = vadd.f32 %v1168_v54, %v1080_v25  ;;  %v5018_v25 = vld [vmem:[#allocation8 + $0x230] sm:$0xff]  ;;  %2749 = vmatpush.bf16.msrb.mxu1 %v4994_v38 }
 0x220   : > { %2440 = vmatmul.bf16.gmra.mxu1 %v5888_v3  ;;  %2529 = vmatmul.bf16.gmra.mxu2 %v1653_v13  ;;  %v2323_v13 = vadd.f32 %v6001_v15, %v5928_v46  ;;  %v2325_v46 = vadd.f32 %v6001_v15, %v5936_v39 }
 0x221   : > { %v1202_v30 = vmax.f32 %v1169_v24, 0.0  ;;  %3016 = vmatpush.bf16.msrb.mxu0 %v5018_v25  ;;  %v1422_v25 = vld [vmem:[#allocation2 + $0x49] sm:$0xff] }
 0x222   : > { %v6018_v35 = vpop.f32.mrf.mxu0 }
 0x223   : > { %2618 = vmatmul.bf16.gmra.mxu3 %v5910_v28  ;;  %1289 = vst [vmem:[#allocation2 + $0x189] sm:$0xff] %v1202_v30  ;;  %v2490_v57 = vpop.f32.mrf.mxu2  ;;  %v1373_v28 = vld [vmem:[#allocation2 + $0xe2] sm:$0xff] }
 0x224   : > { %v2491_v45 = vadd.f32 %v2490_v57, %v2402_v50  ;;  %v1662_v21 = vpack.c.bf16 %v1373_v28, %v1372_v63  ;;  %v1375_v50 = vld [vmem:[#allocation2 + $0xfa] sm:$0xff] }
 0x225   : > { %v2403_v19 = vpop.f32.mrf.mxu1 }
 0x226   : > { %v2579_v49 = vpop.f32.mrf.mxu3  ;;  %v2404_v3 = vadd.f32 %v2403_v19, %v2315_v33  ;;  %v1421_v19 = vld [vmem:[#allocation2 + $0x39] sm:$0xff] }
 0x227   : > { %v6014_v37 = vadd.f32 %v2579_v49, %v2491_v45 }
 0x22a   : > { %v6025_v41 = vpop.f32.mrf.mxu0 }
 0x22b   : > { %v2492_v34 = vpop.f32.mrf.mxu2 }
 0x22c   : > { %v2493_v7 = vadd.f32 %v2492_v34, %v2404_v3  ;;  %v1420_v3 = vld [vmem:[#allocation2 + $0x31] sm:$0xff] }
 0x22d   : > { %v2406_v55 = vpop.f32.mrf.mxu1  ;;  %2667 = vmatmul.bf16.vlgmr.msra.gmra.mxu0 %v1583_v17  ;;  %v6042_v36 = vpack.c.bf16 %v1421_v19, %v1420_v3 }
 0x22e   : > { %v2581_v8 = vpop.f32.mrf.mxu3  ;;  %v2407_v58 = vadd.f32 %v2406_v55, %v2318_v4  ;;  %v5009_v55 = vld [vmem:[#allocation8 + $0x1e8] sm:$0xff] }
 0x22f   : > { %v6022_v2 = vadd.f32 %v2581_v8, %v2493_v7  ;;  %v5001_v8 = vld [vmem:[#allocation8 + $0x1a8] sm:$0xff]  ;;  %2928 = vmatpush.bf16.msrb.mxu3 %v5009_v55 }
 0x230   : > { %2445 = vmatmul.bf16.gmra.mxu1 %v5901_v5  ;;  %2534 = vmatmul.bf16.gmra.mxu2 %v1662_v21  ;;  %v1377_v21 = vld [vmem:[#allocation2 + $0x112] sm:$0xff] }
 0x231   : > { %2839 = vmatpush.bf16.msrb.mxu2 %v5001_v8  ;;  %v1424_v8 = vld [vmem:[#allocation2 + $0x61] sm:$0xff] }
 0x232   : > { %v6032_v27 = vpop.f32.mrf.mxu0 }
 0x233   : > { %2623 = vmatmul.bf16.gmra.mxu3 %v5925_v47  ;;  %v2495_v43 = vpop.f32.mrf.mxu2  ;;  %v1374_v47 = vld [vmem:[#allocation2 + $0xf2] sm:$0xff] }
 0x234   : > { %v2496_v56 = vadd.f32 %v2495_v43, %v2407_v58  ;;  %v1671_v49 = vpack.c.bf16 %v1375_v50, %v1374_v47  ;;  %v4993_v50 = vld [vmem:[#allocation8 + $0x168] sm:$0xff] }
 0x235   : > { %v2408_v54 = vpop.f32.mrf.mxu1  ;;  %2750 = vmatpush.bf16.msrb.mxu1 %v4993_v50 }
 0x236   : > { %v2584_v20 = vpop.f32.mrf.mxu3  ;;  %v2409_v5 = vadd.f32 %v2408_v54, %v2320_v22 }
 0x237   : > { %v6030_v62 = vadd.f32 %v2584_v20, %v2496_v56  ;;  %v1423_v20 = vld [vmem:[#allocation2 + $0x51] sm:$0xff] }
 0x238   : > { %v6059_v54 = vpack.c.bf16 %v1423_v20, %v1422_v25  ;;  %v1381_v20 = vld [vmem:[#allocation2 + $0x142] sm:$0xff]  ;;  %v2338_v25 = vadd.f32 %v6001_v15, %v5978_v18 }
 0x23a   : > { %v6039_v33 = vpop.f32.mrf.mxu0 }
 0x23b   : > { %v2497_v24 = vpop.f32.mrf.mxu2 }
 0x23c   : > { %v2498_v53 = vadd.f32 %v2497_v24, %v2409_v5  ;;  %v2330_v5 = vadd.f32 %v6001_v15, %v5956_v14  ;;  %v2333_v14 = vadd.f32 %v6001_v15, %v5963_v32  ;;  %v2335_v32 = vadd.f32 %v6001_v15, %v5971_v52 }
 0x23d   : > { %v2411_v30 = vpop.f32.mrf.mxu1  ;;  %2672 = vmatmul.bf16.gmra.mxu0 %v6042_v36 }
 0x23e   : > { %v2586_v44 = vpop.f32.mrf.mxu3  ;;  %v2412_v45 = vadd.f32 %v2411_v30, %v2323_v13  ;;  %v5017_v13 = vld [vmem:[#allocation8 + $0x228] sm:$0xff] }
 0x23f   : > { %v6036_v57 = vadd.f32 %v2586_v44, %v2498_v53  ;;  %3017 = vmatpush.bf16.msrb.mxu0 %v5017_v13  ;;  %v1427_v13 = vld [vmem:[#allocation2 + $0x81] sm:$0xff] }
 0x240   : > { %2450 = vmatmul.bf16.gmra.mxu1 %v5916_v59  ;;  %2539 = vmatmul.bf16.gmra.mxu2 %v1671_v49  ;;  %v1379_v49 = vld [vmem:[#allocation2 + $0x12a] sm:$0xff] }
 0x242   : > { %v6049_v7 = vpop.f32.mrf.mxu0 }
 0x243   : > { %2628 = vmatmul.bf16.gmra.mxu3 %v5940_v9  ;;  %v2500_v48 = vpop.f32.mrf.mxu2  ;;  %v1376_v9 = vld [vmem:[#allocation2 + $0x10a] sm:$0xff] }
 0x244   : > { %v2501_v34 = vadd.f32 %v2500_v48, %v2412_v45  ;;  %v1680_v56 = vpack.c.bf16 %v1377_v21, %v1376_v9  ;;  %v1378_v45 = vld [vmem:[#allocation2 + $0x122] sm:$0xff] }
 0x245   : > { %v2413_v28 = vpop.f32.mrf.mxu1 }
 0x246   : > { %v2589_v63 = vpop.f32.mrf.mxu3  ;;  %v2414_v59 = vadd.f32 %v2413_v28, %v2325_v46  ;;  %v1425_v28 = vld [vmem:[#allocation2 + $0x69] sm:$0xff] }
 0x247   : > { %v6047_v4 = vadd.f32 %v2589_v63, %v2501_v34  ;;  %v1689_v63 = vpack.c.bf16 %v1379_v49, %v1378_v45  ;;  %v6076_v55 = vpack.c.bf16 %v1425_v28, %v1424_v8  ;;  %v2340_v45 = vadd.f32 %v6001_v15, %v5986_v26  ;;  %v5007_v28 = vld [vmem:[#allocation8 + $0x1d8] sm:$0xff]  ;;  %v4990_v26 = vld [vmem:[#allocation8 + $0x150] sm:$0xff] }
 0x24a   : > { %v6056_v38 = vpop.f32.mrf.mxu0 }
 0x24b   : > { %v2502_v58 = vpop.f32.mrf.mxu2 }
 0x24c   : > { %v2503_v11 = vadd.f32 %v2502_v58, %v2414_v59 }
 0x24d   : > { %v2416_v17 = vpop.f32.mrf.mxu1  ;;  %2677 = vmatmul.bf16.gmra.mxu0 %v6059_v54 }
 0x24e   : > { %v2591_v39 = vpop.f32.mrf.mxu3  ;;  %v2417_v22 = vadd.f32 %v2416_v17, %v2328_v10  ;;  %v5000_v17 = vld [vmem:[#allocation8 + $0x1a0] sm:$0xff] }
 0x24f   : > { %v6053_v43 = vadd.f32 %v2591_v39, %v2503_v11  ;;  %2840 = vmatpush.bf16.msrb.mxu2 %v5000_v17 }
 0x250   : > { %2455 = vmatmul.bf16.gmra.mxu1 %v5931_v23  ;;  %2544 = vmatmul.bf16.gmra.mxu2 %v1680_v56 }
 0x252   : > { %v6066_v30 = vpop.f32.mrf.mxu0 }
 0x253   : > { %2633 = vmatmul.bf16.gmra.mxu3 %v5960_v12  ;;  %v2505_v42 = vpop.f32.mrf.mxu2 }
 0x254   : > { %v2506_v24 = vadd.f32 %v2505_v42, %v2417_v22  ;;  %v5008_v22 = vld [vmem:[#allocation8 + $0x1e0] sm:$0xff] }
 0x255   : > { %v2418_v53 = vpop.f32.mrf.mxu1  ;;  %2929 = vmatpush.bf16.msrb.mxu3 %v5008_v22 }
 0x256   : > { %v2594_v47 = vpop.f32.mrf.mxu3  ;;  %v2419_v44 = vadd.f32 %v2418_v53, %v2330_v5 }
 0x257   : > { %v6064_v23 = vadd.f32 %v2594_v47, %v2506_v24 }
 0x259   : > { %2930 = vmatpush.bf16.msrb.mxu3 %v5007_v28  ;;  %v1385_v28 = vld [vmem:[#allocation2 + $0x172] sm:$0xff] }
 0x25a   : > { %v6073_v59 = vpop.f32.mrf.mxu0 }
 0x25b   : > { %v2507_v12 = vpop.f32.mrf.mxu2 }
 0x25c   : > { %v2508_v19 = vadd.f32 %v2507_v12, %v2419_v44  ;;  %v1426_v44 = vld [vmem:[#allocation2 + $0x79] sm:$0xff] }
 0x25d   : > { %v2421_v48 = vpop.f32.mrf.mxu1  ;;  %2682 = vmatmul.bf16.gmra.mxu0 %v6076_v55  ;;  %v6093_v12 = vpack.c.bf16 %v1427_v13, %v1426_v44 }
 0x25e   : > { %v2596_v3 = vpop.f32.mrf.mxu3  ;;  %v2422_v34 = vadd.f32 %v2421_v48, %v2333_v14 }
 0x25f   : > { %v6070_v46 = vadd.f32 %v2596_v3, %v2508_v19  ;;  %v4992_v19 = vld [vmem:[#allocation8 + $0x160] sm:$0xff] }
 0x260   : > { %2460 = vmatmul.bf16.gmra.mxu1 %v5946_v61  ;;  %2549 = vmatmul.bf16.gmra.mxu2 %v1689_v63  ;;  %v5016_v3 = vld [vmem:[#allocation8 + $0x220] sm:$0xff]  ;;  %v4991_v63 = vld [vmem:[#allocation8 + $0x158] sm:$0xff] }
 0x261   : > { %2751 = vmatpush.bf16.msrb.mxu1 %v4992_v19  ;;  %3018 = vmatpush.bf16.msrb.mxu0 %v5016_v3  ;;  %v5004_v19 = vld [vmem:[#allocation8 + $0x1c0] sm:$0xff] }
 0x262   : > { %v6083_v39 = vpop.f32.mrf.mxu0 }
 0x263   : > { %2638 = vmatmul.bf16.gmra.mxu3 %v5975_v29  ;;  %v2510_v58 = vpop.f32.mrf.mxu2  ;;  %v1380_v29 = vld [vmem:[#allocation2 + $0x13a] sm:$0xff] }
 0x264   : > { %v2511_v9 = vadd.f32 %v2510_v58, %v2422_v34  ;;  %v1698_v50 = vpack.c.bf16 %v1381_v20, %v1380_v29  ;;  %v4998_v58 = vld [vmem:[#allocation8 + $0x190] sm:$0xff] }
 0x265   : > { %v2423_v10 = vpop.f32.mrf.mxu1  ;;  %2752 = vmatpush.bf16.msrb.mxu1 %v4991_v63 }
 0x266   : > { %v2599_v21 = vpop.f32.mrf.mxu3  ;;  %v2424_v61 = vadd.f32 %v2423_v10, %v2335_v32  ;;  %v5006_v10 = vld [vmem:[#allocation8 + $0x1d0] sm:$0xff] }
 0x267   : > { %v6081_v11 = vadd.f32 %v2599_v21, %v2511_v9  ;;  %v1382_v9 = vld [vmem:[#allocation2 + $0x152] sm:$0xff]  ;;  %v1383_v21 = vld [vmem:[#allocation2 + $0x15a] sm:$0xff]  ;;  %2931 = vmatpush.bf16.msrb.mxu3 %v5006_v10 }
 0x269   : > { %2753 = vmatpush.bf16.msrb.mxu1 %v4990_v26 }
 0x26a   : > { %v6090_v53 = vpop.f32.mrf.mxu0 }
 0x26b   : > { %v2512_v56 = vpop.f32.mrf.mxu2 }
 0x26c   : > { %v2513_v42 = vadd.f32 %v2512_v56, %v2424_v61  ;;  %v2343_v61 = vadd.f32 %v6001_v15, %v5993_v60  ;;  %v1428_v60 = vld [vmem:[#allocation2 + $0x91] sm:$0xff] }
 0x26d   : > { %v2426_v5 = vpop.f32.mrf.mxu1  ;;  %2687 = vmatmul.bf16.gmra.mxu0 %v6093_v12 }
 0x26e   : > { %v2601_v52 = vpop.f32.mrf.mxu3  ;;  %v2427_v47 = vadd.f32 %v2426_v5, %v2338_v25  ;;  %v1707_v25 = vpack.c.bf16 %v1383_v21, %v1382_v9  ;;  %v4997_v5 = vld [vmem:[#allocation8 + $0x188] sm:$0xff] }
 0x26f   : > { %v6087_v24 = vadd.f32 %v2601_v52, %v2513_v42  ;;  %v1429_v42 = vld [vmem:[#allocation2 + $0x99] sm:$0xff] }
 0x270   : > { %2465 = vmatmul.bf16.gmra.mxu1 %v5966_v31  ;;  %2554 = vmatmul.bf16.gmra.mxu2 %v1698_v50  ;;  %v4989_v52 = vld [vmem:[#allocation8 + $0x148] sm:$0xff]  ;;  %v6110_v13 = vpack.c.bf16 %v1429_v42, %v1428_v60  ;;  %v5015_v60 = vld [vmem:[#allocation8 + $0x218] sm:$0xff] }
 0x271   : > { %2754 = vmatpush.bf16.msrb.mxu1 %v4989_v52  ;;  %v2350_v52 = vadd.f32 %v6001_v15, %v6018_v35  ;;  %3019 = vmatpush.bf16.msrb.mxu0 %v5015_v60  ;;  %v1452_v60 = vld [vmem:[#allocation2 + $0x32] sm:$0xff] }
 0x272   : > { %v6100_v8 = vpop.f32.mrf.mxu0 }
 0x273   : > { %2643 = vmatmul.bf16.gmra.mxu3 %v5990_v51  ;;  %v2515_v18 = vpop.f32.mrf.mxu2  ;;  %v4999_v51 = vld [vmem:[#allocation8 + $0x198] sm:$0xff] }
 0x274   : > { %v2516_v49 = vadd.f32 %v2515_v18, %v2427_v47  ;;  %2841 = vmatpush.bf16.msrb.mxu2 %v4999_v51  ;;  %v5005_v47 = vld [vmem:[#allocation8 + $0x1c8] sm:$0xff]  ;;  %v2345_v18 = vadd.f32 %v6001_v15, %v6003_v16  ;;  %v1384_v51 = vld [vmem:[#allocation2 + $0x16a] sm:$0xff]  ;;  %v2348_v16 = vadd.f32 %v6001_v15, %v6010_v40 }
 0x275   : > { %v2428_v48 = vpop.f32.mrf.mxu1  ;;  %2932 = vmatpush.bf16.msrb.mxu3 %v5005_v47 }
 0x276   : > { %v2604_v14 = vpop.f32.mrf.mxu3  ;;  %v2429_v34 = vadd.f32 %v2428_v48, %v2340_v45 }
 0x277   : > { %v6098_v31 = vadd.f32 %v2604_v14, %v2516_v49  ;;  %v4988_v49 = vld [vmem:[#allocation8 + $0x140] sm:$0xff] }
 0x278   : > { %2842 = vmatpush.bf16.msrb.mxu2 %v4998_v58  ;;  %v4996_v14 = vld [vmem:[#allocation8 + $0x180] sm:$0xff]  ;;  %2755 = vmatpush.bf16.msrb.mxu1 %v4988_v49  ;;  %v1450_v49 = vld [vmem:[#allocation2 + $0x1a] sm:$0xff] }
 0x279   : > { %2933 = vmatpush.bf16.msrb.mxu3 %v5004_v19  ;;  %v1484_v19 = vld [vmem:[#allocation2 + $0x38] sm:$0xff] }
 0x27a   : > { %v6107_v50 = vpop.f32.mrf.mxu0 }
 0x27b   : > { %v2517_v32 = vpop.f32.mrf.mxu2 }
 0x27c   : > { %v2518_v17 = vadd.f32 %v2517_v32, %v2429_v34  ;;  %2843 = vmatpush.bf16.msrb.mxu2 %v4997_v5  ;;  %v1417_v32 = vld [vmem:[#allocation2 + $0x188] sm:$0xff] }
 0x27d   : > { %v2431_v56 = vpop.f32.mrf.mxu1  ;;  %2692 = vmatmul.bf16.gmra.mxu0 %v6110_v13 }
 0x27e   : > { %v2606_v22 = vpop.f32.mrf.mxu3  ;;  %v2432_v20 = vadd.f32 %v2431_v56, %v2343_v61  ;;  %v1716_v61 = vpack.c.bf16 %v1385_v28, %v1384_v51  ;;  %v1483_v51 = vld [vmem:[#allocation2 + $0x30] sm:$0xff] }
 0x27f   : > { %v6104_v29 = vadd.f32 %v2606_v22, %v2518_v17  ;;  %v1416_v17 = vld [vmem:[#allocation2 + $0x180] sm:$0xff]  ;;  %v1431_v22 = vld [vmem:[#allocation2 + $0xb1] sm:$0xff] }
 0x280   : > { %2470 = vmatmul.bf16.gmra.mxu1 %v5981_v6  ;;  %2559 = vmatmul.bf16.gmra.mxu2 %v1707_v25  ;;  %v1717_v56 = vpack.c.bf16 %v1417_v32, %v1416_v17  ;;  %v1430_v25 = vld [vmem:[#allocation2 + $0xa9] sm:$0xff]  ;;  %v2355_v17 = vadd.f32 %v6001_v15, %v6032_v27 }
 0x281   : > { %2844 = vmatpush.bf16.msrb.mxu2 %v4996_v14  ;;  %v6126_v42 = vpack.c.bf16 %v1431_v22, %v1430_v25  ;;  %v1451_v14 = vld [vmem:[#allocation2 + $0x22] sm:$0xff] }
 0x282   : > { %v6117_v34 = vpop.f32.mrf.mxu0  ;;  %v1433_v32 = vld [vmem:[#allocation2 + $0xc9] sm:$0xff] }
 0x283   : > { %2648 = vmatmul.bf16.gmra.mxu3 %v6007_v1  ;;  %v2520_v44 = vpop.f32.mrf.mxu2 }
 0x284   : > { %v2521_v6 = vadd.f32 %v2520_v44, %v2432_v20 }
 0x285   : > { %v2433_v3 = vpop.f32.mrf.mxu1 }
 0x286   : > { %v2609_v45 = vpop.f32.mrf.mxu3  ;;  %v2434_v1 = vadd.f32 %v2433_v3, %v2345_v18  ;;  %v2353_v3 = vadd.f32 %v6001_v15, %v6025_v41 }
 0x287   : > { %v6115_v48 = vadd.f32 %v2609_v45, %v2521_v6 }
 0x28a   : > { %v6124_v20 = vpop.f32.mrf.mxu0 }
 0x28b   : > { %v2522_v63 = vpop.f32.mrf.mxu2 }
 0x28c   : > { %v2523_v26 = vadd.f32 %v2522_v63, %v2434_v1 }
 0x28d   : > { %v2436_v9 = vpop.f32.mrf.mxu1  ;;  %2697 = vmatmul.bf16.gmra.mxu0 %v6126_v42 }
 0x28e   : > { %v2611_v58 = vpop.f32.mrf.mxu3  ;;  %v2437_v10 = vadd.f32 %v2436_v9, %v2348_v16 }
 0x28f   : > { %v6121_v21 = vadd.f32 %v2611_v58, %v2523_v26  ;;  %v1584_v26 = vpack.c.bf16 %v1451_v14, %v1450_v49  ;;  %v1585_v58 = vpack.c.bf16 %v1484_v19, %v1483_v51  ;;  %v1485_v14 = vld [vmem:[#allocation2 + $0x48] sm:$0xff] }
 0x290   : > { %2475 = vmatmul.bf16.gmra.mxu1 %v5996_v0  ;;  %2564 = vmatmul.bf16.gmra.mxu2 %v1716_v61 }
 0x292   : > { %v6133_v6 = vpop.f32.mrf.mxu0 }
 0x293   : > { %2653 = vmatmul.bf16.gmra.mxu3 %v1717_v56  ;;  %v2525_v40 = vpop.f32.mrf.mxu2 }
 0x294   : > { %v2526_v5 = vadd.f32 %v2525_v40, %v2437_v10  ;;  %v1432_v10 = vld [vmem:[#allocation2 + $0xc1] sm:$0xff] }
 0x295   : > { %v2438_v44 = vpop.f32.mrf.mxu1  ;;  %v6142_v61 = vpack.c.bf16 %v1433_v32, %v1432_v10  ;;  %v2360_v32 = vadd.f32 %v6001_v15, %v6049_v7  ;;  %v2363_v7 = vadd.f32 %v6001_v15, %v6056_v38 }
 0x296   : > { %v2614_v47 = vpop.f32.mrf.mxu3  ;;  %v2439_v0 = vadd.f32 %v2438_v44, %v2350_v52  ;;  %v1453_v44 = vld [vmem:[#allocation2 + $0x3a] sm:$0xff] }
 0x297   : > { %v6131_v18 = vadd.f32 %v2614_v47, %v2526_v5 }
 0x29a   : > { %v6139_v9 = vpop.f32.mrf.mxu0 }
 0x29b   : > { %v2527_v45 = vpop.f32.mrf.mxu2 }
 0x29c   : > { %v2528_v35 = vadd.f32 %v2527_v45, %v2439_v0  ;;  %v2358_v0 = vadd.f32 %v6001_v15, %v6039_v33 }
 0x29d   : > { %v2441_v63 = vpop.f32.mrf.mxu1  ;;  %2702 = vmatmul.bf16.gmra.mxu0 %v6142_v61 }
 0x29e   : > { %v2616_v1 = vpop.f32.mrf.mxu3  ;;  %v2442_v16 = vadd.f32 %v2441_v63, %v2353_v3  ;;  %v1435_v63 = vld [vmem:[#allocation2 + $0xe1] sm:$0xff] }
 0x29f   : > { %v6137_v28 = vadd.f32 %v2616_v1, %v2528_v35  ;;  %v6155_v35 = vpack.c.bf16 %v1453_v44, %v1452_v60  ;;  %v1455_v60 = vld [vmem:[#allocation2 + $0x52] sm:$0xff]  ;;  %v1488_v44 = vld [vmem:[#allocation2 + $0x68] sm:$0xff] }
 0x2a0   : > { %2756 = vmatmul.bf16.vlgmr.msrb.gmra.mxu1 %v1584_v26  ;;  %2845 = vmatmul.bf16.vlgmr.msrb.gmra.mxu2 %v1585_v58 }
 0x2a2   : > { %v6149_v5 = vpop.f32.mrf.mxu0 }
 0x2a3   : > { %2934 = vmatmul.bf16.vlgmr.msrb.gmra.mxu3 %v6042_v36  ;;  %v2530_v41 = vpop.f32.mrf.mxu2  ;;  %v1486_v36 = vld [vmem:[#allocation2 + $0x50] sm:$0xff] }
 0x2a4   : > { %v2531_v22 = vadd.f32 %v2530_v41, %v2442_v16  ;;  %v1594_v1 = vpack.c.bf16 %v1486_v36, %v1485_v14  ;;  %v1434_v16 = vld [vmem:[#allocation2 + $0xd9] sm:$0xff] }
 0x2a5   : > { %v2443_v25 = vpop.f32.mrf.mxu1  ;;  %v6162_v26 = vpack.c.bf16 %v1435_v63, %v1434_v16  ;;  %v1437_v63 = vld [vmem:[#allocation2 + $0xf9] sm:$0xff] }
 0x2a6   : > { %v2619_v56 = vpop.f32.mrf.mxu3  ;;  %v2444_v52 = vadd.f32 %v2443_v25, %v2355_v17  ;;  %v5014_v17 = vld [vmem:[#allocation8 + $0x210] sm:$0xff] }
 0x2a7   : > { %v6147_v40 = vadd.f32 %v2619_v56, %v2531_v22  ;;  %3020 = vmatpush.bf16.msrb.mxu0 %v5014_v17 }
 0x2aa   : > { %v2668_v51 = vpop.f32.mrf.mxu0 }
 0x2ab   : > { %v2532_v47 = vpop.f32.mrf.mxu2  ;;  %v6160_v33 = vadd.f32 %v2668_v51, %v6014_v37  ;;  %v1436_v51 = vld [vmem:[#allocation2 + $0xf1] sm:$0xff] }
 0x2ac   : > { %v2533_v45 = vadd.f32 %v2532_v47, %v2444_v52  ;;  %v1454_v47 = vld [vmem:[#allocation2 + $0x4a] sm:$0xff]  ;;  %v6183_v16 = vpack.c.bf16 %v1437_v63, %v1436_v51 }
 0x2ad   : > { %v2446_v27 = vpop.f32.mrf.mxu1  ;;  %2707 = vmatmul.bf16.gmra.mxu0 %v6162_v26  ;;  %v1439_v63 = vld [vmem:[#allocation2 + $0x111] sm:$0xff] }
 0x2ae   : > { %v2621_v49 = vpop.f32.mrf.mxu3  ;;  %v2447_v3 = vadd.f32 %v2446_v27, %v2358_v0 }
 0x2af   : > { %v6153_v19 = vadd.f32 %v2621_v49, %v2533_v45  ;;  %v1487_v49 = vld [vmem:[#allocation2 + $0x60] sm:$0xff] }
 0x2b0   : > { %2761 = vmatmul.bf16.gmra.mxu1 %v6155_v35  ;;  %2850 = vmatmul.bf16.gmra.mxu2 %v1594_v1  ;;  %v1603_v1 = vpack.c.bf16 %v1488_v44, %v1487_v49  ;;  %v2368_v44 = vadd.f32 %v6001_v15, %v6073_v59 }
 0x2b3   : > { %2939 = vmatmul.bf16.gmra.mxu3 %v6059_v54  ;;  %v2535_v58 = vpop.f32.mrf.mxu2  ;;  %v2670_v54 = vpop.f32.mrf.mxu0 }
 0x2b4   : > { %v2536_v10 = vadd.f32 %v2535_v58, %v2447_v3  ;;  %v6170_v37 = vadd.f32 %v2670_v54, %v6022_v2  ;;  %v6176_v3 = vpack.c.bf16 %v1455_v60, %v1454_v47  ;;  %v1457_v47 = vld [vmem:[#allocation2 + $0x6a] sm:$0xff]  ;;  %v1490_v60 = vld [vmem:[#allocation2 + $0x80] sm:$0xff] }
 0x2b5   : > { %v2448_v22 = vpop.f32.mrf.mxu1 }
 0x2b6   : > { %v2624_v41 = vpop.f32.mrf.mxu3  ;;  %v2449_v25 = vadd.f32 %v2448_v22, %v2360_v32  ;;  %v2365_v32 = vadd.f32 %v6001_v15, %v6066_v30 }
 0x2b7   : > { %v6167_v56 = vadd.f32 %v2624_v41, %v2536_v10 }
 0x2bb   : > { %v2537_v52 = vpop.f32.mrf.mxu2  ;;  %v2673_v2 = vpop.f32.mrf.mxu0 }
 0x2bc   : > { %v2538_v36 = vadd.f32 %v2537_v52, %v2449_v25  ;;  %v6181_v38 = vadd.f32 %v2673_v2, %v6030_v62  ;;  %v1456_v52 = vld [vmem:[#allocation2 + $0x62] sm:$0xff] }
 0x2bd   : > { %v2451_v45 = vpop.f32.mrf.mxu1  ;;  %2712 = vmatmul.bf16.gmra.mxu0 %v6183_v16  ;;  %v1438_v2 = vld [vmem:[#allocation2 + $0x109] sm:$0xff] }
 0x2be   : > { %v2626_v0 = vpop.f32.mrf.mxu3  ;;  %v2452_v14 = vadd.f32 %v2451_v45, %v2363_v7  ;;  %v6204_v51 = vpack.c.bf16 %v1439_v63, %v1438_v2  ;;  %v1441_v2 = vld [vmem:[#allocation2 + $0x129] sm:$0xff] }
 0x2bf   : > { %v6174_v27 = vadd.f32 %v2626_v0, %v2538_v36  ;;  %v1489_v0 = vld [vmem:[#allocation2 + $0x78] sm:$0xff] }
 0x2c0   : > { %2766 = vmatmul.bf16.gmra.mxu1 %v6176_v3  ;;  %2855 = vmatmul.bf16.gmra.mxu2 %v1603_v1  ;;  %v1612_v1 = vpack.c.bf16 %v1490_v60, %v1489_v0  ;;  %v1459_v60 = vld [vmem:[#allocation2 + $0x82] sm:$0xff]  ;;  %v1491_v0 = vld [vmem:[#allocation2 + $0x90] sm:$0xff] }
 0x2c3   : > { %2944 = vmatmul.bf16.gmra.mxu3 %v6076_v55  ;;  %v2540_v58 = vpop.f32.mrf.mxu2  ;;  %v2675_v54 = vpop.f32.mrf.mxu0 }
 0x2c4   : > { %v2541_v10 = vadd.f32 %v2540_v58, %v2452_v14  ;;  %v6191_v55 = vadd.f32 %v2675_v54, %v6036_v57  ;;  %v6197_v14 = vpack.c.bf16 %v1457_v47, %v1456_v52  ;;  %v1458_v47 = vld [vmem:[#allocation2 + $0x7a] sm:$0xff] }
 0x2c5   : > { %v2453_v17 = vpop.f32.mrf.mxu1  ;;  %v6218_v63 = vpack.c.bf16 %v1459_v60, %v1458_v47  ;;  %v1460_v60 = vld [vmem:[#allocation2 + $0x92] sm:$0xff] }
 0x2c6   : > { %v2629_v41 = vpop.f32.mrf.mxu3  ;;  %v2454_v25 = vadd.f32 %v2453_v17, %v2365_v32  ;;  %v2370_v32 = vadd.f32 %v6001_v15, %v6083_v39  ;;  %v5013_v17 = vld [vmem:[#allocation8 + $0x208] sm:$0xff]  ;;  %v2373_v39 = vadd.f32 %v6001_v15, %v6090_v53 }
 0x2c7   : > { %v6188_v22 = vadd.f32 %v2629_v41, %v2541_v10  ;;  %3021 = vmatpush.bf16.msrb.mxu0 %v5013_v17 }
 0x2cb   : > { %v2542_v62 = vpop.f32.mrf.mxu2  ;;  %v2678_v57 = vpop.f32.mrf.mxu0 }
 0x2cc   : > { %v2543_v30 = vadd.f32 %v2542_v62, %v2454_v25  ;;  %v6202_v59 = vadd.f32 %v2678_v57, %v6047_v4 }
 0x2cd   : > { %v2456_v36 = vpop.f32.mrf.mxu1  ;;  %2717 = vmatmul.bf16.gmra.mxu0 %v6204_v51 }
 0x2ce   : > { %v2631_v7 = vpop.f32.mrf.mxu3  ;;  %v2457_v49 = vadd.f32 %v2456_v36, %v2368_v44  ;;  %v1492_v44 = vld [vmem:[#allocation2 + $0x98] sm:$0xff] }
 0x2cf   : > { %v6195_v45 = vadd.f32 %v2631_v7, %v2543_v30  ;;  %v1621_v57 = vpack.c.bf16 %v1492_v44, %v1491_v0  ;;  %v1461_v44 = vld [vmem:[#allocation2 + $0x9a] sm:$0xff]  ;;  %v1493_v0 = vld [vmem:[#allocation2 + $0xa8] sm:$0xff] }
 0x2d0   : > { %2771 = vmatmul.bf16.gmra.mxu1 %v6197_v14  ;;  %2860 = vmatmul.bf16.gmra.mxu2 %v1612_v1 }
 0x2d3   : > { %2949 = vmatmul.bf16.gmra.mxu3 %v6093_v12  ;;  %v2545_v58 = vpop.f32.mrf.mxu2  ;;  %v2680_v12 = vpop.f32.mrf.mxu0 }
 0x2d4   : > { %v2546_v10 = vadd.f32 %v2545_v58, %v2457_v49  ;;  %v6212_v4 = vadd.f32 %v2680_v12, %v6053_v43  ;;  %v1440_v58 = vld [vmem:[#allocation2 + $0x121] sm:$0xff] }
 0x2d5   : > { %v2458_v25 = vpop.f32.mrf.mxu1 }
 0x2d6   : > { %v2634_v41 = vpop.f32.mrf.mxu3  ;;  %v2459_v62 = vadd.f32 %v2458_v25, %v2370_v32  ;;  %v6225_v32 = vpack.c.bf16 %v1441_v2, %v1440_v58  ;;  %v6239_v2 = vpack.c.bf16 %v1461_v44, %v1460_v60  ;;  %v1443_v58 = vld [vmem:[#allocation2 + $0x141] sm:$0xff] }
 0x2d7   : > { %v6209_v54 = vadd.f32 %v2634_v41, %v2546_v10  ;;  %v2375_v41 = vadd.f32 %v6001_v15, %v6100_v8 }
 0x2db   : > { %v2547_v52 = vpop.f32.mrf.mxu2  ;;  %v2683_v43 = vpop.f32.mrf.mxu0 }
 0x2dc   : > { %v2548_v30 = vadd.f32 %v2547_v52, %v2459_v62  ;;  %v6223_v53 = vadd.f32 %v2683_v43, %v6064_v23 }
 0x2dd   : > { %v2461_v36 = vpop.f32.mrf.mxu1  ;;  %2722 = vmatmul.bf16.gmra.mxu0 %v6225_v32 }
 0x2de   : > { %v2636_v7 = vpop.f32.mrf.mxu3  ;;  %v2462_v1 = vadd.f32 %v2461_v36, %v2373_v39  ;;  %v1494_v39 = vld [vmem:[#allocation2 + $0xb0] sm:$0xff] }
 0x2df   : > { %v6216_v49 = vadd.f32 %v2636_v7, %v2548_v30  ;;  %v2378_v30 = vadd.f32 %v6001_v15, %v6107_v50  ;;  %v1630_v43 = vpack.c.bf16 %v1494_v39, %v1493_v0 }
 0x2e0   : > { %2776 = vmatmul.bf16.gmra.mxu1 %v6218_v63  ;;  %2865 = vmatmul.bf16.gmra.mxu2 %v1621_v57 }
 0x2e3   : > { %2954 = vmatmul.bf16.gmra.mxu3 %v6110_v13  ;;  %v2550_v10 = vpop.f32.mrf.mxu2  ;;  %v2685_v47 = vpop.f32.mrf.mxu0 }
 0x2e4   : > { %v2551_v17 = vadd.f32 %v2550_v10, %v2462_v1  ;;  %v6233_v13 = vadd.f32 %v2685_v47, %v6070_v46  ;;  %v1442_v10 = vld [vmem:[#allocation2 + $0x139] sm:$0xff]  ;;  %v5012_v47 = vld [vmem:[#allocation8 + $0x200] sm:$0xff] }
 0x2e5   : > { %v2463_v62 = vpop.f32.mrf.mxu1  ;;  %3022 = vmatpush.bf16.msrb.mxu0 %v5012_v47 }
 0x2e6   : > { %v2639_v25 = vpop.f32.mrf.mxu3  ;;  %v2464_v52 = vadd.f32 %v2463_v62, %v2375_v41  ;;  %v6246_v41 = vpack.c.bf16 %v1443_v58, %v1442_v10 }
 0x2e7   : > { %v6230_v12 = vadd.f32 %v2639_v25, %v2551_v17  ;;  %v2380_v25 = vadd.f32 %v6001_v15, %v6117_v34  ;;  %v2383_v34 = vadd.f32 %v6001_v15, %v6124_v20 }
 0x2eb   : > { %v2552_v23 = vpop.f32.mrf.mxu2  ;;  %v2688_v46 = vpop.f32.mrf.mxu0 }
 0x2ec   : > { %v2553_v8 = vadd.f32 %v2552_v23, %v2464_v52  ;;  %v6244_v50 = vadd.f32 %v2688_v46, %v6081_v11 }
 0x2ed   : > { %v2466_v36 = vpop.f32.mrf.mxu1  ;;  %2727 = vmatmul.bf16.gmra.mxu0 %v6246_v41 }
 0x2ee   : > { %v2641_v7 = vpop.f32.mrf.mxu3  ;;  %v2467_v57 = vadd.f32 %v2466_v36, %v2378_v30  ;;  %v1462_v30 = vld [vmem:[#allocation2 + $0xaa] sm:$0xff] }
 0x2ef   : > { %v6237_v1 = vadd.f32 %v2641_v7, %v2553_v8  ;;  %v1463_v8 = vld [vmem:[#allocation2 + $0xb2] sm:$0xff]  ;;  %v1496_v7 = vld [vmem:[#allocation2 + $0xc8] sm:$0xff] }
 0x2f0   : > { %2781 = vmatmul.bf16.gmra.mxu1 %v6239_v2  ;;  %2870 = vmatmul.bf16.gmra.mxu2 %v1630_v43  ;;  %v1495_v43 = vld [vmem:[#allocation2 + $0xc0] sm:$0xff]  ;;  %v6260_v10 = vpack.c.bf16 %v1463_v8, %v1462_v30 }
 0x2f3   : > { %2959 = vmatmul.bf16.gmra.mxu3 %v6126_v42  ;;  %v2555_v17 = vpop.f32.mrf.mxu2  ;;  %v2690_v42 = vpop.f32.mrf.mxu0 }
 0x2f4   : > { %v2556_v62 = vadd.f32 %v2555_v17, %v2467_v57  ;;  %v6254_v11 = vadd.f32 %v2690_v42, %v6087_v24  ;;  %v1639_v17 = vpack.c.bf16 %v1496_v7, %v1495_v43  ;;  %v1465_v43 = vld [vmem:[#allocation2 + $0xca] sm:$0xff] }
 0x2f5   : > { %v2468_v23 = vpop.f32.mrf.mxu1 }
 0x2f6   : > { %v2644_v52 = vpop.f32.mrf.mxu3  ;;  %v2469_v44 = vadd.f32 %v2468_v23, %v2380_v25  ;;  %v1445_v25 = vld [vmem:[#allocation2 + $0x159] sm:$0xff]  ;;  %v2385_v23 = vadd.f32 %v6001_v15, %v6133_v6 }
 0x2f7   : > { %v6251_v60 = vadd.f32 %v2644_v52, %v2556_v62  ;;  %v1444_v62 = vld [vmem:[#allocation2 + $0x151] sm:$0xff] }
 0x2f8   : > { %v6267_v52 = vpack.c.bf16 %v1445_v25, %v1444_v62  ;;  %v5051_v25 = vld [vmem:[#allocation11 + $0xf4] sm:$0xf0] }
 0x2fb   : > { %v2557_v39 = vpop.f32.mrf.mxu2  ;;  %v2693_v24 = vpop.f32.mrf.mxu0 }
 0x2fc   : > { %v2558_v36 = vadd.f32 %v2557_v39, %v2469_v44  ;;  %v6265_v20 = vadd.f32 %v2693_v24, %v6098_v31  ;;  %v5048_v31 = vld [vmem:[#allocation11 + $0xe4] sm:$0xf] }
 0x2fd   : > { %v2471_v57 = vpop.f32.mrf.mxu1  ;;  %2732 = vmatmul.bf16.gmra.mxu0 %v6267_v52 }
 0x2fe   : > { %v2646_v0 = vpop.f32.mrf.mxu3  ;;  %v2472_v46 = vadd.f32 %v2471_v57, %v2383_v34  ;;  %v1464_v34 = vld [vmem:[#allocation2 + $0xc2] sm:$0xff] }
 0x2ff   : > { %v6258_v58 = vadd.f32 %v2646_v0, %v2558_v36  ;;  %v4898_v36 = vld [vmem:[#allocation11 + $0xf0] sm:$0xf0]  ;;  %v4904_v0 = vld [vmem:[#allocation11 + $0xe8] sm:$0xf] }
 0x300   : > { %2786 = vmatmul.bf16.gmra.mxu1 %v6260_v10  ;;  %2875 = vmatmul.bf16.gmra.mxu2 %v1639_v17  ;;  %v1498_v17 = vld [vmem:[#allocation2 + $0xe0] sm:$0xff]  ;;  %v4901_v6 = vor.u32 %v5048_v31, %v4898_v36  ;;  %v1446_v36 = vld [vmem:[#allocation2 + $0x169] sm:$0xff] }
 0x302   : > { %3443 = vmatpush.bf16.msra.mxu2 %v4901_v6  ;;  %v5050_v6 = vld [vmem:[#allocation11 + $0xec] sm:$0xf0] }
 0x303   : > { %2964 = vmatmul.bf16.gmra.mxu3 %v6142_v61  ;;  %v2560_v47 = vpop.f32.mrf.mxu2  ;;  %v2695_v7 = vpop.f32.mrf.mxu0 }
 0x304   : > { %v2561_v44 = vadd.f32 %v2560_v47, %v2472_v46  ;;  %v6275_v61 = vadd.f32 %v2695_v7, %v6104_v29  ;;  %v2388_v46 = vadd.f32 %v6001_v15, %v6139_v9  ;;  %v4905_v47 = vor.u32 %v5051_v25, %v4904_v0  ;;  %v5176_v0 = vld [vmem:[#allocation9] ss:$0 sm:$0xff]  ;;  %v5049_v25 = vld [vmem:[#allocation11 + $0xec] sm:$0xf] }
 0x305   : > { %v2473_v39 = vpop.f32.mrf.mxu1 }
 0x306   : > { %v2649_v42 = vpop.f32.mrf.mxu3  ;;  %v2474_v8 = vadd.f32 %v2473_v39, %v2385_v23  ;;  %7153 = vst [vmem:[#allocation17_spill] sm:$0xff] %v6275_v61  ;;  %v6281_v39 = vpack.c.bf16 %v1465_v43, %v1464_v34  ;;  %3532 = vmatpush.bf16.msra.mxu3 %v4905_v47  ;;  %v1447_v61 = vld [vmem:[#allocation2 + $0x171] sm:$0xff]  ;;  %v2390_v34 = vadd.f32 %v5176_v0, %v6149_v5 }
 0x307   : > { %v6272_v30 = vadd.f32 %v2649_v42, %v2561_v44  ;;  %v1497_v44 = vld [vmem:[#allocation2 + $0xd8] sm:$0xff]  ;;  %v6288_v9 = vpack.c.bf16 %v1447_v61, %v1446_v36  ;;  %v1499_v0 = vld [vmem:[#allocation2 + $0xf0] sm:$0xff] }
 0x308   : > { %v1648_v7 = vpack.c.bf16 %v1498_v17, %v1497_v44  ;;  %v4896_v17 = vld [vmem:[#allocation11 + $0xe0] sm:$0xf]  ;;  %v1466_v44 = vld [vmem:[#allocation2 + $0xda] sm:$0xff] }
 0x30b   : > { %v2562_v57 = vpop.f32.mrf.mxu2  ;;  %v2698_v31 = vpop.f32.mrf.mxu0 }
 0x30c   : > { %v2563_v24 = vadd.f32 %v2562_v57, %v2474_v8  ;;  %v6286_v15 = vadd.f32 %v2698_v31, %v6115_v48 }
 0x30d   : > { %v2476_v23 = vpop.f32.mrf.mxu1  ;;  %2737 = vmatmul.bf16.gmra.mxu0 %v6288_v9 }
 0x30e   : > { %v2651_v62 = vpop.f32.mrf.mxu3  ;;  %v2477_v29 = vadd.f32 %v2476_v23, %v2388_v46 }
 0x30f   : > { %v6279_v42 = vadd.f32 %v2651_v62, %v2563_v24  ;;  %v4897_v24 = vor.u32 %v5050_v6, %v4896_v17  ;;  %v4906_v62 = vld [vmem:[#allocation11 + $0xf8] sm:$0xf0] }
 0x310   : > { %2791 = vmatmul.bf16.gmra.mxu1 %v6281_v39  ;;  %2880 = vmatmul.bf16.gmra.mxu2 %v1648_v7  ;;  %v4909_v47 = vor.u32 %v5049_v25, %v4906_v62  ;;  %v1500_v7 = vld [vmem:[#allocation2 + $0xf8] sm:$0xff]  ;;  %v1449_v6 = vld [vmem:[#allocation2 + $0x189] sm:$0xff]  ;;  %v1448_v25 = vld [vmem:[#allocation2 + $0x181] sm:$0xff] }
 0x311   : > { %3354 = vmatpush.bf16.msra.mxu1 %v4897_v24  ;;  %v6307_v24 = vpack.c.bf16 %v1449_v6, %v1448_v25  ;;  %v5047_v6 = vld [vmem:[#allocation11 + $0xd4] sm:$0xf0] }
 0x312   : > { %3621 = vmatpush.bf16.msra.mxu0 %v4909_v47 }
 0x313   : > { %2969 = vmatmul.bf16.gmra.mxu3 %v6162_v26  ;;  %v2565_v8 = vpop.f32.mrf.mxu2  ;;  %v2700_v61 = vpop.f32.mrf.mxu0 }
 0x314   : > { %v2566_v57 = vadd.f32 %v2565_v8, %v2477_v29  ;;  %v6295_v23 = vadd.f32 %v2700_v61, %v6121_v21  ;;  %v1467_v29 = vld [vmem:[#allocation2 + $0xe2] sm:$0xff] }
 0x315   : > { %v2478_v46 = vpop.f32.mrf.mxu1 }
 0x316   : > { %v2654_v43 = vpop.f32.mrf.mxu3  ;;  %v2479_v48 = vadd.f32 %v2478_v46, %v2390_v34  ;;  %v6300_v34 = vpack.c.bf16 %v1467_v29, %v1466_v44  ;;  %v1468_v29 = vld [vmem:[#allocation2 + $0xf2] sm:$0xff] }
 0x317   : > { %v6292_v26 = vadd.f32 %v2654_v43, %v2566_v57  ;;  %v1657_v43 = vpack.c.bf16 %v1500_v7, %v1499_v0  ;;  %v1502_v0 = vld [vmem:[#allocation2 + $0x110] sm:$0xff] }
 0x31b   : > { %v2567_v5 = vpop.f32.mrf.mxu2  ;;  %v2703_v21 = vpop.f32.mrf.mxu0 }
 0x31c   : > { %v2568_v31 = vadd.f32 %v2567_v5, %v2479_v48  ;;  %v6305_v46 = vadd.f32 %v2703_v21, %v6131_v18  ;;  %v4882_v18 = vld [vmem:[#allocation11 + $0xd0] sm:$0xf0] }
 0x31d   : > { %v2757_v8 = vpop.f32.mrf.mxu1  ;;  %2742 = vmatmul.bf16.gmra.mxu0 %v6307_v24 }
 0x31e   : > { %v2656_v36 = vpop.f32.mrf.mxu3  ;;  %v2758_v57 = vadd.f32 %v2757_v8, %v6160_v33  ;;  %v1469_v8 = vld [vmem:[#allocation2 + $0xfa] sm:$0xff] }
 0x31f   : > { %v6297_v17 = vadd.f32 %v2656_v36, %v2568_v31  ;;  %v4888_v31 = vld [vmem:[#allocation11 + $0xc8] sm:$0xf] }
 0x320   : > { %2796 = vmatmul.bf16.gmra.mxu1 %v6300_v34  ;;  %2885 = vmatmul.bf16.gmra.mxu2 %v1657_v43  ;;  %v4889_v25 = vor.u32 %v5047_v6, %v4888_v31 }
 0x322   : > { %3533 = vmatpush.bf16.msra.mxu3 %v4889_v25  ;;  %v1470_v25 = vld [vmem:[#allocation2 + $0x10a] sm:$0xff] }
 0x323   : > { %2974 = vmatmul.bf16.gmra.mxu3 %v6183_v16  ;;  %v2846_v62 = vpop.f32.mrf.mxu2  ;;  %v2705_v44 = vpop.f32.mrf.mxu0  ;;  %v5044_v16 = vld [vmem:[#allocation11 + $0xc4] sm:$0xf] }
 0x324   : > { %v2847_v33 = vadd.f32 %v2846_v62, %v2758_v57  ;;  %v6314_v7 = vadd.f32 %v2705_v44, %v6137_v28  ;;  %v4885_v43 = vor.u32 %v5044_v16, %v4882_v18  ;;  %v6319_v28 = vpack.c.bf16 %v1469_v8, %v1468_v29  ;;  %v5045_v29 = vld [vmem:[#allocation11 + $0xcc] sm:$0xf] }
 0x325   : > { %v2759_v47 = vpop.f32.mrf.mxu1 }
 0x326   : > { %v2935_v48 = vpop.f32.mrf.mxu3  ;;  %v2760_v5 = vadd.f32 %v2759_v47, %v6170_v37  ;;  %3444 = vmatpush.bf16.msra.mxu2 %v4885_v43  ;;  %v4890_v43 = vld [vmem:[#allocation11 + $0xd8] sm:$0xf0] }
 0x327   : > { %v6310_v61 = vadd.f32 %v2935_v48, %v2847_v33  ;;  %v1501_v33 = vld [vmem:[#allocation2 + $0x108] sm:$0xff] }
 0x328   : > { %v1666_v47 = vpack.c.bf16 %v1502_v0, %v1501_v33  ;;  %v1504_v33 = vld [vmem:[#allocation2 + $0x128] sm:$0xff] }
 0x32b   : > { %v2848_v36 = vpop.f32.mrf.mxu2  ;;  %v2708_v44 = vpop.f32.mrf.mxu0 }
 0x32c   : > { %v2849_v57 = vadd.f32 %v2848_v36, %v2760_v5  ;;  %v6324_v5 = vadd.f32 %v2708_v44, %v6147_v40  ;;  %v4880_v36 = vld [vmem:[#allocation11 + $0xc0] sm:$0xf] }
 0x32d   : > { %v2762_v62 = vpop.f32.mrf.mxu1  ;;  %3023 = vmatmul.bf16.vlgmr.msrb.gmra.mxu0 %v6155_v35 }
 0x32e   : > { %v2937_v21 = vpop.f32.mrf.mxu3  ;;  %v2763_v48 = vadd.f32 %v2762_v62, %v6181_v38  ;;  %v5046_v38 = vld [vmem:[#allocation11 + $0xcc] sm:$0xf0]  ;;  %v1471_v62 = vld [vmem:[#allocation2 + $0x112] sm:$0xff] }
 0x32f   : > { %v6316_v37 = vadd.f32 %v2937_v21, %v2849_v57  ;;  %v4881_v0 = vor.u32 %v5046_v38, %v4880_v36  ;;  %v4893_v21 = vor.u32 %v5045_v29, %v4890_v43 }
 0x330   : > { %2801 = vmatmul.bf16.gmra.mxu1 %v6319_v28  ;;  %2890 = vmatmul.bf16.gmra.mxu2 %v1666_v47 }
 0x331   : > { %3355 = vmatpush.bf16.msra.mxu1 %v4881_v0  ;;  %3622 = vmatpush.bf16.msra.mxu0 %v4893_v21 }
 0x333   : > { %2979 = vmatmul.bf16.gmra.mxu3 %v6204_v51  ;;  %v2851_v16 = vpop.f32.mrf.mxu2  ;;  %v2710_v40 = vpop.f32.mrf.mxu0 }
 0x334   : > { %v2852_v18 = vadd.f32 %v2851_v16, %v2763_v48  ;;  %v6331_v51 = vadd.f32 %v2710_v40, %v6153_v19  ;;  %v1503_v16 = vld [vmem:[#allocation2 + $0x120] sm:$0xff] }
 0x335   : > { %v2764_v8 = vpop.f32.mrf.mxu1  ;;  %v1472_v40 = vld [vmem:[#allocation2 + $0x122] sm:$0xff] }
 0x336   : > { %v2940_v31 = vpop.f32.mrf.mxu3  ;;  %v2765_v57 = vadd.f32 %v2764_v8, %v6191_v55  ;;  %v6336_v55 = vpack.c.bf16 %v1471_v62, %v1470_v25  ;;  %v5040_v25 = vld [vmem:[#allocation11 + $0xa4] sm:$0xf]  ;;  %v4872_v62 = vld [vmem:[#allocation11 + $0xa8] sm:$0xf] }
 0x337   : > { %v6327_v6 = vadd.f32 %v2940_v31, %v2852_v18  ;;  %v1675_v31 = vpack.c.bf16 %v1504_v33, %v1503_v16  ;;  %v1473_v33 = vld [vmem:[#allocation2 + $0x12a] sm:$0xff] }
 0x33b   : > { %v2853_v35 = vpop.f32.mrf.mxu2  ;;  %v2713_v19 = vpop.f32.mrf.mxu0 }
 0x33c   : > { %v2854_v48 = vadd.f32 %v2853_v35, %v2765_v57  ;;  %v6341_v38 = vadd.f32 %v2713_v19, %v6167_v56  ;;  %v1505_v19 = vld [vmem:[#allocation2 + $0x138] sm:$0xff] }
 0x33d   : > { %v2767_v44 = vpop.f32.mrf.mxu1  ;;  %3028 = vmatmul.bf16.gmra.mxu0 %v6176_v3  ;;  %v5043_v3 = vld [vmem:[#allocation11 + $0xb4] sm:$0xf0] }
 0x33e   : > { %v2942_v47 = vpop.f32.mrf.mxu3  ;;  %v2768_v18 = vadd.f32 %v2767_v44, %v6202_v59 }
 0x33f   : > { %v6333_v36 = vadd.f32 %v2942_v47, %v2854_v48  ;;  %v1506_v48 = vld [vmem:[#allocation2 + $0x140] sm:$0xff] }
 0x340   : > { %2806 = vmatmul.bf16.gmra.mxu1 %v6336_v55  ;;  %2895 = vmatmul.bf16.gmra.mxu2 %v1675_v31 }
 0x343   : > { %2984 = vmatmul.bf16.gmra.mxu3 %v6225_v32  ;;  %v2856_v29 = vpop.f32.mrf.mxu2  ;;  %v2715_v21 = vpop.f32.mrf.mxu0  ;;  %v4866_v32 = vld [vmem:[#allocation11 + $0xb0] sm:$0xf0] }
 0x344   : > { %v2857_v8 = vadd.f32 %v2856_v29, %v2768_v18  ;;  %v6348_v35 = vadd.f32 %v2715_v21, %v6174_v27  ;;  %v4869_v47 = vor.u32 %v5040_v25, %v4866_v32  ;;  %v4873_v18 = vor.u32 %v5043_v3, %v4872_v62  ;;  %v4864_v32 = vld [vmem:[#allocation11 + $0xa0] sm:$0xf] }
 0x345   : > { %v2769_v43 = vpop.f32.mrf.mxu1  ;;  %v6353_v27 = vpack.c.bf16 %v1473_v33, %v1472_v40  ;;  %v5041_v40 = vld [vmem:[#allocation11 + $0xac] sm:$0xf]  ;;  %v4874_v33 = vld [vmem:[#allocation11 + $0xb8] sm:$0xf0] }
 0x346   : > { %v2945_v0 = vpop.f32.mrf.mxu3  ;;  %v2770_v59 = vadd.f32 %v2769_v43, %v6212_v4  ;;  %7154 = vst [vmem:[#allocation18_spill] sm:$0xff] %v6348_v35  ;;  %3445 = vmatpush.bf16.msra.mxu2 %v4869_v47  ;;  %3534 = vmatpush.bf16.msra.mxu3 %v4873_v18  ;;  %v4877_v3 = vor.u32 %v5041_v40, %v4874_v33  ;;  %v1508_v18 = vld [vmem:[#allocation2 + $0x158] sm:$0xff]  ;;  %v5027_v35 = vld [vmem:[#allocation11 + $0x34] sm:$0xf0] }
 0x347   : > { %v6344_v57 = vadd.f32 %v2945_v0, %v2857_v8  ;;  %v1684_v8 = vpack.c.bf16 %v1506_v48, %v1505_v19  ;;  %v1476_v33 = vld [vmem:[#allocation2 + $0x152] sm:$0xff] }
 0x348   : > { %3623 = vmatpush.bf16.msra.mxu0 %v4877_v3  ;;  %v5036_v3 = vld [vmem:[#allocation11 + $0x84] sm:$0xf] }
 0x34b   : > { %v2858_v56 = vpop.f32.mrf.mxu2  ;;  %v2718_v0 = vpop.f32.mrf.mxu0 }
 0x34c   : > { %v2859_v44 = vadd.f32 %v2858_v56, %v2770_v59  ;;  %v6358_v43 = vadd.f32 %v2718_v0, %v6188_v22 }
 0x34d   : > { %v2772_v31 = vpop.f32.mrf.mxu1  ;;  %3033 = vmatmul.bf16.gmra.mxu0 %v6197_v14 }
 0x34e   : > { %v2947_v16 = vpop.f32.mrf.mxu3  ;;  %v2773_v29 = vadd.f32 %v2772_v31, %v6223_v53  ;;  %v5042_v53 = vld [vmem:[#allocation11 + $0xac] sm:$0xf0] }
 0x34f   : > { %v6350_v4 = vadd.f32 %v2947_v16, %v2859_v44  ;;  %v4865_v56 = vor.u32 %v5042_v53, %v4864_v32  ;;  %v1474_v44 = vld [vmem:[#allocation2 + $0x13a] sm:$0xff]  ;;  %v1475_v16 = vld [vmem:[#allocation2 + $0x142] sm:$0xff] }
 0x350   : > { %2811 = vmatmul.bf16.gmra.mxu1 %v6353_v27  ;;  %2900 = vmatmul.bf16.gmra.mxu2 %v1684_v8  ;;  %v1507_v8 = vld [vmem:[#allocation2 + $0x150] sm:$0xff] }
 0x351   : > { %3356 = vmatpush.bf16.msra.mxu1 %v4865_v56 }
 0x353   : > { %2989 = vmatmul.bf16.gmra.mxu3 %v6246_v41  ;;  %v2861_v59 = vpop.f32.mrf.mxu2  ;;  %v2720_v22 = vpop.f32.mrf.mxu0 }
 0x354   : > { %v2862_v21 = vadd.f32 %v2861_v59, %v2773_v29  ;;  %v6365_v41 = vadd.f32 %v2720_v22, %v6195_v45  ;;  %v4850_v22 = vld [vmem:[#allocation11 + $0x90] sm:$0xf0] }
 0x355   : > { %v2774_v62 = vpop.f32.mrf.mxu1 }
 0x356   : > { %v2950_v25 = vpop.f32.mrf.mxu3  ;;  %v2775_v47 = vadd.f32 %v2774_v62, %v6233_v13  ;;  %7155 = vst [vmem:[#allocation19_spill] sm:$0xff] %v6365_v41  ;;  %v6370_v13 = vpack.c.bf16 %v1475_v16, %v1474_v44  ;;  %v1510_v44 = vld [vmem:[#allocation2 + $0x170] sm:$0xff]  ;;  %v4853_v16 = vor.u32 %v5036_v3, %v4850_v22 }
 0x357   : > { %v6361_v48 = vadd.f32 %v2950_v25, %v2862_v21  ;;  %v1693_v21 = vpack.c.bf16 %v1508_v18, %v1507_v8 }
 0x358   : > { %3446 = vmatpush.bf16.msra.mxu2 %v4853_v16 }
 0x35b   : > { %v2863_v14 = vpop.f32.mrf.mxu2  ;;  %v2723_v45 = vpop.f32.mrf.mxu0 }
 0x35c   : > { %v2864_v31 = vadd.f32 %v2863_v14, %v2775_v47  ;;  %v6375_v25 = vadd.f32 %v2723_v45, %v6209_v54  ;;  %v1477_v54 = vld [vmem:[#allocation2 + $0x15a] sm:$0xff] }
 0x35d   : > { %v2777_v29 = vpop.f32.mrf.mxu1  ;;  %3038 = vmatmul.bf16.gmra.mxu0 %v6218_v63  ;;  %v5039_v63 = vld [vmem:[#allocation11 + $0x94] sm:$0xf0] }
 0x35e   : > { %v2952_v19 = vpop.f32.mrf.mxu3  ;;  %v2778_v59 = vadd.f32 %v2777_v29, %v6244_v50  ;;  %v1509_v29 = vld [vmem:[#allocation2 + $0x168] sm:$0xff] }
 0x35f   : > { %v6367_v0 = vadd.f32 %v2952_v19, %v2864_v31 }
 0x360   : > { %2816 = vmatmul.bf16.gmra.mxu1 %v6370_v13  ;;  %2905 = vmatmul.bf16.gmra.mxu2 %v1693_v21 }
 0x363   : > { %2994 = vmatmul.bf16.gmra.mxu3 %v6267_v52  ;;  %v2866_v32 = vpop.f32.mrf.mxu2  ;;  %v2725_v56 = vpop.f32.mrf.mxu0  ;;  %v4856_v52 = vld [vmem:[#allocation11 + $0x88] sm:$0xf] }
 0x364   : > { %v2867_v53 = vadd.f32 %v2866_v32, %v2778_v59  ;;  %v6383_v47 = vadd.f32 %v2725_v56, %v6216_v49  ;;  %v4857_v31 = vor.u32 %v5039_v63, %v4856_v52  ;;  %v6390_v59 = vpack.c.bf16 %v1477_v54, %v1476_v33  ;;  %v4848_v56 = vld [vmem:[#allocation11 + $0x80] sm:$0xf]  ;;  %v5037_v33 = vld [vmem:[#allocation11 + $0x8c] sm:$0xf]  ;;  %v4858_v52 = vld [vmem:[#allocation11 + $0x98] sm:$0xf0] }
 0x365   : > { %v6378_v62 = vpop.f32.mrf.mxu1  ;;  %v1702_v49 = vpack.c.bf16 %v1510_v44, %v1509_v29  ;;  %v4861_v44 = vor.u32 %v5037_v33, %v4858_v52  ;;  %v1479_v63 = vld [vmem:[#allocation2 + $0x172] sm:$0xff] }
 0x366   : > { %v2955_v40 = vpop.f32.mrf.mxu3  ;;  %7156 = vst [vmem:[#allocation20_spill] sm:$0xff] %v6383_v47  ;;  %3535 = vmatpush.bf16.msra.mxu3 %v4857_v31  ;;  %v1512_v31 = vld [vmem:[#allocation2 + $0x188] sm:$0xff]  ;;  %v1545_v52 = vld [vmem:[#allocation2 + $0x199] sm:$0xff] }
 0x367   : > { %v6380_v50 = vadd.f32 %v2955_v40, %v2867_v53  ;;  %3624 = vmatpush.bf16.msra.mxu0 %v4861_v44  ;;  %v1546_v44 = vld [vmem:[#allocation2 + $0x1a1] sm:$0xff] }
 0x36b   : > { %v6385_v14 = vpop.f32.mrf.mxu2  ;;  %v2728_v21 = vpop.f32.mrf.mxu0 }
 0x36c   : > { %v6395_v45 = vadd.f32 %v2728_v21, %v6230_v12 }
 0x36d   : > { %v2782_v19 = vpop.f32.mrf.mxu1  ;;  %3043 = vmatmul.bf16.gmra.mxu0 %v6239_v2  ;;  %v1478_v2 = vld [vmem:[#allocation2 + $0x16a] sm:$0xff] }
 0x36e   : > { %v6387_v18 = vpop.f32.mrf.mxu3  ;;  %v2783_v8 = vadd.f32 %v2782_v19, %v6265_v20  ;;  %v5038_v20 = vld [vmem:[#allocation11 + $0x8c] sm:$0xf0]  ;;  %v6410_v21 = vpack.c.bf16 %v1479_v63, %v1478_v2  ;;  %v5032_v2 = vld [vmem:[#allocation11 + $0x64] sm:$0xf]  ;;  %v4840_v63 = vld [vmem:[#allocation11 + $0x68] sm:$0xf] }
 0x36f   : > { %v4849_v22 = vor.u32 %v5038_v20, %v4848_v56 }
 0x370   : > { %2821 = vmatmul.bf16.gmra.mxu1 %v6390_v59  ;;  %2910 = vmatmul.bf16.gmra.mxu2 %v1702_v49 }
 0x371   : > { %3357 = vmatpush.bf16.msra.mxu1 %v4849_v22 }
 0x373   : > { %2999 = vmatmul.bf16.gmra.mxu3 %v6288_v9  ;;  %v2871_v32 = vpop.f32.mrf.mxu2  ;;  %v2730_v9 = vpop.f32.mrf.mxu0 }
 0x374   : > { %v2872_v53 = vadd.f32 %v2871_v32, %v2783_v8  ;;  %v6403_v12 = vadd.f32 %v2730_v9, %v6237_v1  ;;  %v1511_v8 = vld [vmem:[#allocation2 + $0x180] sm:$0xff] }
 0x375   : > { %v6398_v3 = vpop.f32.mrf.mxu1  ;;  %v1711_v32 = vpack.c.bf16 %v1512_v31, %v1511_v8  ;;  %v1480_v31 = vld [vmem:[#allocation2 + $0x182] sm:$0xff]  ;;  %v5035_v8 = vld [vmem:[#allocation11 + $0x74] sm:$0xf0] }
 0x376   : > { %v2960_v40 = vpop.f32.mrf.mxu3  ;;  %7157 = vst [vmem:[#allocation21_spill] sm:$0xff] %v6403_v12  ;;  %v5034_v12 = vld [vmem:[#allocation11 + $0x6c] sm:$0xf0] }
 0x377   : > { %v6400_v54 = vadd.f32 %v2960_v40, %v2872_v53 }
 0x37b   : > { %v6405_v16 = vpop.f32.mrf.mxu2  ;;  %v2733_v53 = vpop.f32.mrf.mxu0 }
 0x37c   : > { %v6415_v1 = vadd.f32 %v2733_v53, %v6251_v60 }
 0x37d   : > { %v2787_v29 = vpop.f32.mrf.mxu1  ;;  %3048 = vmatmul.bf16.gmra.mxu0 %v6260_v10 }
 0x37e   : > { %v6407_v19 = vpop.f32.mrf.mxu3  ;;  %v2788_v49 = vadd.f32 %v2787_v29, %v6286_v15  ;;  %v1481_v29 = vld [vmem:[#allocation2 + $0x18a] sm:$0xff] }
 0x380   : > { %2826 = vmatmul.bf16.gmra.mxu1 %v6410_v21  ;;  %2915 = vmatmul.bf16.gmra.mxu2 %v1711_v32  ;;  %v5177_v32 = vld [vmem:[#allocation2] sm:$0xff] }
 0x381   : > { %v1720_v53 = vpack.c.bf16 %v5177_v32, %v5177_v32  ;;  %v5030_v32 = vld [vmem:[#allocation11 + $0x4c] sm:$0xf0] }
 0x383   : > { %3004 = vmatmul.bf16.gmra.mxu3 %v6307_v24  ;;  %v2876_v40 = vpop.f32.mrf.mxu2  ;;  %v2735_v22 = vpop.f32.mrf.mxu0  ;;  %v4834_v24 = vld [vmem:[#allocation11 + $0x70] sm:$0xf0] }
 0x384   : > { %v2877_v56 = vadd.f32 %v2876_v40, %v2788_v49  ;;  %v6423_v9 = vadd.f32 %v2735_v22, %v6258_v58  ;;  %v4837_v10 = vor.u32 %v5032_v2, %v4834_v24  ;;  %v4841_v40 = vor.u32 %v5035_v8, %v4840_v63 }
 0x385   : > { %v6418_v33 = vpop.f32.mrf.mxu1  ;;  %v6430_v22 = vpack.c.bf16 %v1481_v29, %v1480_v31  ;;  %v4842_v31 = vld [vmem:[#allocation11 + $0x78] sm:$0xf0]  ;;  %v4816_v29 = vld [vmem:[#allocation11 + $0x40] sm:$0xf] }
 0x386   : > { %v2965_v20 = vpop.f32.mrf.mxu3  ;;  %7158 = vst [vmem:[#allocation22_spill] sm:$0xff] %v6423_v9  ;;  %3447 = vmatpush.bf16.msra.mxu2 %v4837_v10  ;;  %3536 = vmatpush.bf16.msra.mxu3 %v4841_v40  ;;  %v4832_v9 = vld [vmem:[#allocation11 + $0x60] sm:$0xf]  ;;  %v4818_v40 = vld [vmem:[#allocation11 + $0x50] sm:$0xf0] }
 0x387   : > { %v6420_v15 = vadd.f32 %v2965_v20, %v2877_v56  ;;  %v1721_v20 = vpack.c.bf16 %v1546_v44, %v1545_v52  ;;  %v4833_v24 = vor.u32 %v5034_v12, %v4832_v9  ;;  %v5033_v44 = vld [vmem:[#allocation11 + $0x6c] sm:$0xf]  ;;  %v4817_v12 = vor.u32 %v5030_v32, %v4816_v29  ;;  %v4824_v9 = vld [vmem:[#allocation11 + $0x48] sm:$0xf] }
 0x388   : > { %v4845_v8 = vor.u32 %v5033_v44, %v4842_v31  ;;  %v4802_v44 = vld [vmem:[#allocation11 + $0x30] sm:$0xf0]  ;;  %v4808_v31 = vld [vmem:[#allocation11 + $0x28] sm:$0xf] }
 0x389   : > { %3358 = vmatpush.bf16.msra.mxu1 %v4833_v24  ;;  %v5024_v24 = vld [vmem:[#allocation11 + $0x24] sm:$0xf]  ;;  %v4809_v29 = vor.u32 %v5027_v35, %v4808_v31 }
 0x38a   : > { %3625 = vmatpush.bf16.msra.mxu0 %v4845_v8 }
 0x38b   : > { %v6425_v60 = vpop.f32.mrf.mxu2  ;;  %v2738_v2 = vpop.f32.mrf.mxu0 }
 0x38c   : > { %v6434_v47 = vadd.f32 %v2738_v2, %v6272_v30 }
 0x38d   : > { %v2792_v56 = vpop.f32.mrf.mxu1  ;;  %3053 = vmatmul.bf16.gmra.mxu0 %v6281_v39  ;;  %3359 = vmatpush.bf16.msra.mxu1 %v4817_v12  ;;  %v4800_v39 = vld [vmem:[#allocation11 + $0x20] sm:$0xf]  ;;  %v5020_v12 = vld [vmem:[#allocation11 + $0x4] sm:$0xf] }
 0x38e   : > { %v6427_v49 = vpop.f32.mrf.mxu3  ;;  %v2793_v58 = vadd.f32 %v2792_v56, %v6305_v46 }
 0x390   : > { %2831 = vmatmul.bf16.gmra.mxu1 %v6430_v22  ;;  %2920 = vmatmul.bf16.gmra.mxu2 %v1720_v53  ;;  %v5028_v53 = vld [vmem:[#allocation11 + $0x44] sm:$0xf] }
 0x391   : > { %v4821_v30 = vor.u32 %v5028_v53, %v4818_v40  ;;  %v4784_v53 = vld [vmem:[#allocation11] sm:$0xf]  ;;  %v5022_v40 = vld [vmem:[#allocation11 + $0xc] sm:$0xf0] }
 0x393   : > { %3009 = vmatmul.bf16.gmra.mxu3 %v1721_v20  ;;  %v2881_v63 = vpop.f32.mrf.mxu2  ;;  %v5031_v20 = vld [vmem:[#allocation11 + $0x54] sm:$0xf0]  ;;  %3448 = vmatpush.bf16.msra.mxu2 %v4821_v30 }
 0x394   : > { %v2882_v52 = vadd.f32 %v2881_v63, %v2793_v58  ;;  %v4825_v2 = vor.u32 %v5031_v20, %v4824_v9  ;;  %v5026_v58 = vld [vmem:[#allocation11 + $0x2c] sm:$0xf0]  ;;  %v2740_v63 = vpop.f32.mrf.mxu0  ;;  %v4785_v9 = vor.u32 %v5022_v40, %v4784_v53  ;;  %v4786_v20 = vld [vmem:[#allocation11 + $0x10] sm:$0xf0] }
 0x395   : > { %v6437_v10 = vpop.f32.mrf.mxu1  ;;  %v4801_v41 = vor.u32 %v5026_v58, %v4800_v39  ;;  %v5023_v39 = vld [vmem:[#allocation11 + $0x14] sm:$0xf0]  ;;  %v4789_v58 = vor.u32 %v5020_v12, %v4786_v20 }
 0x396   : > { %v2970_v46 = vpop.f32.mrf.mxu3  ;;  %3537 = vmatpush.bf16.msra.mxu3 %v4825_v2  ;;  %v4792_v2 = vld [vmem:[#allocation11 + $0x8] sm:$0xf] }
 0x397   : > { %v6439_v56 = vadd.f32 %v2970_v46, %v2882_v52  ;;  %v6442_v52 = vadd.f32 %v2740_v63, %v6279_v42  ;;  %v4805_v46 = vor.u32 %v5024_v24, %v4802_v44  ;;  %3360 = vmatpush.bf16.msra.mxu1 %v4801_v41  ;;  %v4793_v24 = vor.u32 %v5023_v39, %v4792_v2  ;;  %v5029_v39 = vld [vmem:[#allocation11 + $0x4c] sm:$0xf] }
 0x399   : > { %7159 = vst [vmem:[#allocation23_spill] sm:$0xff] %v6442_v52  ;;  %3449 = vmatpush.bf16.msra.mxu2 %v4805_v46 }
 0x39a   : > { %3538 = vmatpush.bf16.msra.mxu3 %v4809_v29 }
 0x39b   : > { %v6444_v32 = vpop.f32.mrf.mxu2  ;;  %3361 = vmatpush.bf16.msra.mxu1 %v4785_v9 }
 0x39c   : > { %v2743_v35 = vpop.f32.mrf.mxu0 }
 0x39d   : > { %v2797_v30 = vpop.f32.mrf.mxu1  ;;  %3450 = vmatpush.bf16.msra.mxu2 %v4789_v58  ;;  %v6450_v41 = vadd.f32 %v2743_v35, %v6292_v26  ;;  %3058 = vmatmul.bf16.gmra.mxu0 %v6300_v34 }
 0x39e   : > { %v6446_v8 = vpop.f32.mrf.mxu3  ;;  %v2798_v42 = vadd.f32 %v2797_v30, %v6324_v5  ;;  %3539 = vmatpush.bf16.msra.mxu3 %v4793_v24 }
 0x3a3   : > { %v2886_v63 = vpop.f32.mrf.mxu2 }
 0x3a4   : > { %v2887_v44 = vadd.f32 %v2886_v63, %v2798_v42  ;;  %v2745_v53 = vpop.f32.mrf.mxu0  ;;  %v4826_v42 = vld [vmem:[#allocation11 + $0x58] sm:$0xf0] }
 0x3a5   : > { %v6453_v46 = vpop.f32.mrf.mxu1  ;;  %v6458_v5 = vadd.f32 %v2745_v53, %v6297_v17  ;;  %v4829_v24 = vor.u32 %v5029_v39, %v4826_v42 }
 0x3a6   : > { %v2975_v31 = vpop.f32.mrf.mxu3 }
 0x3a7   : > { %v6455_v29 = vadd.f32 %v2975_v31, %v2887_v44  ;;  %7160 = vst [vmem:[#allocation24_spill] sm:$0xff] %v6458_v5  ;;  %3626 = vmatpush.bf16.msra.mxu0 %v4829_v24 }
 0x3ab   : > { %v6460_v40 = vpop.f32.mrf.mxu2 }
 0x3ac   : > { %v3024_v9 = vpop.f32.mrf.mxu0 }
 0x3ad   : > { %v2802_v30 = vpop.f32.mrf.mxu1  ;;  %3063 = vmatmul.bf16.gmra.mxu0 %v6319_v28  ;;  %v3025_v35 = vadd.f32 %v3024_v9, %v6310_v61 }
 0x3ae   : > { %v6462_v12 = vpop.f32.mrf.mxu3  ;;  %v2803_v26 = vadd.f32 %v2802_v30, %v6341_v38 }
 0x3af   : > { %v3104_v31 = vmax.f32 %v3025_v35, 0.0 }
 0x3b3   : > { %v2891_v20 = vpop.f32.mrf.mxu2 }
 0x3b4   : > { %v2892_v34 = vadd.f32 %v2891_v20, %v2803_v26  ;;  %v3026_v63 = vpop.f32.mrf.mxu0 }
 0x3b5   : > { %v6466_v58 = vpop.f32.mrf.mxu1  ;;  %v3027_v44 = vadd.f32 %v3026_v63, %v6316_v37 }
 0x3b6   : > { %v2980_v2 = vpop.f32.mrf.mxu3 }
 0x3b7   : > { %v6468_v17 = vadd.f32 %v2980_v2, %v2892_v34  ;;  %v3105_v53 = vmax.f32 %v3027_v44, 0.0 }
 0x3b9   : > { %v6476_v26 = vpack.c.bf16 %v3105_v53, %v3104_v31 }
 0x3bb   : > { %v6472_v38 = vpop.f32.mrf.mxu2  ;;  %3362 = vmatmul.bf16.vlgmr.msra.gmra.mxu1 %v6476_v26  ;;  %3451 = vmatmul.bf16.vlgmr.msra.gmra.mxu2 %v6476_v26 }
 0x3bc   : > { %3540 = vmatmul.bf16.vlgmr.msra.gmra.mxu3 %v6476_v26  ;;  %v3029_v61 = vpop.f32.mrf.mxu0 }
 0x3bd   : > { %v2807_v30 = vpop.f32.mrf.mxu1  ;;  %3068 = vmatmul.bf16.gmra.mxu0 %v6336_v55  ;;  %v3030_v42 = vadd.f32 %v3029_v61, %v6327_v6 }
 0x3be   : > { %v6474_v28 = vpop.f32.mrf.mxu3  ;;  %v2808_v20 = vadd.f32 %v2807_v30, %v6358_v43 }
 0x3bf   : > { %v3106_v63 = vmax.f32 %v3030_v42, 0.0 }
 0x3c3   : > { %v2896_v9 = vpop.f32.mrf.mxu2 }
 0x3c4   : > { %v2897_v37 = vadd.f32 %v2896_v9, %v2808_v20  ;;  %v3031_v24 = vpop.f32.mrf.mxu0  ;;  %v5025_v9 = vld [vmem:[#allocation11 + $0x2c] sm:$0xf] }
 0x3c5   : > { %v6483_v2 = vpop.f32.mrf.mxu1  ;;  %v3032_v43 = vadd.f32 %v3031_v24, %v6333_v36 }
 0x3c6   : > { %v2985_v34 = vpop.f32.mrf.mxu3 }
 0x3c7   : > { %v6485_v39 = vadd.f32 %v2985_v34, %v2897_v37  ;;  %v3107_v44 = vmax.f32 %v3032_v43, 0.0  ;;  %v4810_v37 = vld [vmem:[#allocation11 + $0x38] sm:$0xf0] }
 0x3c8   : > { %v4813_v42 = vor.u32 %v5025_v9, %v4810_v37 }
 0x3c9   : > { %v6493_v30 = vpack.c.bf16 %v3107_v44, %v3106_v63 }
 0x3ca   : > { %3627 = vmatpush.bf16.msra.mxu0 %v4813_v42 }
 0x3cb   : > { %v6489_v35 = vpop.f32.mrf.mxu2  ;;  %3367 = vmatmul.bf16.gmra.mxu1 %v6493_v30  ;;  %3456 = vmatmul.bf16.gmra.mxu2 %v6493_v30 }
 0x3cc   : > { %3545 = vmatmul.bf16.gmra.mxu3 %v6493_v30  ;;  %v3034_v6 = vpop.f32.mrf.mxu0 }
 0x3cd   : > { %v2812_v53 = vpop.f32.mrf.mxu1  ;;  %3073 = vmatmul.bf16.gmra.mxu0 %v6353_v27 }
 0x3ce   : > { %v6491_v31 = vpop.f32.mrf.mxu3  ;;  %v2813_v55 = vadd.f32 %v2812_v53, %v6375_v25  ;;  %v3035_v25 = vadd.f32 %v3034_v6, %v6344_v57 }
 0x3d0   : > { %v3108_v53 = vmax.f32 %v3035_v25, 0.0 }
 0x3d3   : > { %v2901_v20 = vpop.f32.mrf.mxu2 }
 0x3d4   : > { %v2902_v36 = vadd.f32 %v2901_v20, %v2813_v55  ;;  %v3036_v43 = vpop.f32.mrf.mxu0 }
 0x3d5   : > { %v6500_v34 = vpop.f32.mrf.mxu1  ;;  %v3037_v63 = vadd.f32 %v3036_v43, %v6350_v4 }
 0x3d6   : > { %v2990_v61 = vpop.f32.mrf.mxu3 }
 0x3d7   : > { %v6502_v24 = vadd.f32 %v2990_v61, %v2902_v36  ;;  %v3109_v5 = vmax.f32 %v3037_v63, 0.0 }
 0x3d9   : > { %v6510_v20 = vpack.c.bf16 %v3109_v5, %v3108_v53 }
 0x3db   : > { %v6506_v44 = vpop.f32.mrf.mxu2  ;;  %3372 = vmatmul.bf16.gmra.mxu1 %v6510_v20  ;;  %3461 = vmatmul.bf16.gmra.mxu2 %v6510_v20 }
 0x3dc   : > { %3550 = vmatmul.bf16.gmra.mxu3 %v6510_v20  ;;  %v3039_v57 = vpop.f32.mrf.mxu0 }
 0x3dd   : > { %v2817_v55 = vpop.f32.mrf.mxu1  ;;  %3078 = vmatmul.bf16.gmra.mxu0 %v6370_v13  ;;  %v3040_v5 = vadd.f32 %v3039_v57, %v6361_v48 }
 0x3de   : > { %v6508_v27 = vpop.f32.mrf.mxu3  ;;  %v2818_v52 = vadd.f32 %v2817_v55, %v6395_v45 }
 0x3df   : > { %v3110_v25 = vmax.f32 %v3040_v5, 0.0  ;;  %v4794_v5 = vld [vmem:[#allocation11 + $0x18] sm:$0xf0] }
 0x3e3   : > { %v2906_v6 = vpop.f32.mrf.mxu2 }
 0x3e4   : > { %v2907_v4 = vadd.f32 %v2906_v6, %v2818_v52  ;;  %v3041_v37 = vpop.f32.mrf.mxu0 }
 0x3e5   : > { %v6517_v61 = vpop.f32.mrf.mxu1  ;;  %v3042_v45 = vadd.f32 %v3041_v37, %v6367_v0  ;;  %v2780_v0 = vadd.f32 %v6378_v62, %v6254_v11 }
 0x3e6   : > { %v2995_v36 = vpop.f32.mrf.mxu3 }
 0x3e7   : > { %v6519_v9 = vadd.f32 %v2995_v36, %v2907_v4  ;;  %v3111_v43 = vmax.f32 %v3042_v45, 0.0  ;;  %v2869_v57 = vadd.f32 %v6385_v14, %v2780_v0  ;;  %v5021_v36 = vld [vmem:[#allocation11 + $0xc] sm:$0xf] }
 0x3e8   : > { %v4797_v37 = vor.u32 %v5021_v36, %v4794_v5 }
 0x3e9   : > { %v6527_v55 = vpack.c.bf16 %v3111_v43, %v3110_v25  ;;  %v2958_v25 = vadd.f32 %v6387_v18, %v2869_v57  ;;  %v7161_v18 = vld [vmem:[#allocation17_spill] sm:$0xff] }
 0x3ea   : > { %3628 = vmatpush.bf16.msra.mxu0 %v4797_v37 }
 0x3eb   : > { %v6523_v42 = vpop.f32.mrf.mxu2  ;;  %3377 = vmatmul.bf16.gmra.mxu1 %v6527_v55  ;;  %3466 = vmatmul.bf16.gmra.mxu2 %v6527_v55 }
 0x3ec   : > { %3555 = vmatmul.bf16.gmra.mxu3 %v6527_v55  ;;  %v3044_v48 = vpop.f32.mrf.mxu0 }
 0x3ed   : > { %v2822_v53 = vpop.f32.mrf.mxu1  ;;  %3083 = vmatmul.bf16.gmra.mxu0 %v6390_v59  ;;  %v3045_v43 = vadd.f32 %v3044_v48, %v6380_v50  ;;  %v2785_v48 = vadd.f32 %v6398_v3, %v7161_v18 }
 0x3ee   : > { %v6525_v63 = vpop.f32.mrf.mxu3  ;;  %v2823_v13 = vadd.f32 %v2822_v53, %v6415_v1 }
 0x3ef   : > { %v3112_v14 = vmax.f32 %v3045_v43, 0.0 }
 0x3f3   : > { %v2911_v52 = vpop.f32.mrf.mxu2 }
 0x3f4   : > { %v2912_v6 = vadd.f32 %v2911_v52, %v2823_v13  ;;  %v3046_v11 = vpop.f32.mrf.mxu0 }
 0x3f5   : > { %v6537_v1 = vpop.f32.mrf.mxu1  ;;  %v3047_v62 = vadd.f32 %v3046_v11, %v2958_v25 }
 0x3f6   : > { %v3000_v4 = vpop.f32.mrf.mxu3 }
 0x3f7   : > { %v6539_v45 = vadd.f32 %v3000_v4, %v2912_v6  ;;  %v3113_v59 = vmax.f32 %v3047_v62, 0.0  ;;  %v2874_v6 = vadd.f32 %v6405_v16, %v2785_v48 }
 0x3f9   : > { %v6547_v52 = vpack.c.bf16 %v3113_v59, %v3112_v14  ;;  %v2963_v25 = vadd.f32 %v6407_v19, %v2874_v6  ;;  %v2790_v19 = vadd.f32 %v6418_v33, %v6295_v23 }
 0x3fb   : > { %v6543_v53 = vpop.f32.mrf.mxu2  ;;  %3382 = vmatmul.bf16.gmra.mxu1 %v6547_v52  ;;  %3471 = vmatmul.bf16.gmra.mxu2 %v6547_v52  ;;  %v2879_v18 = vadd.f32 %v6425_v60, %v2790_v19 }
 0x3fc   : > { %3560 = vmatmul.bf16.gmra.mxu3 %v6547_v52  ;;  %v3049_v50 = vpop.f32.mrf.mxu0 }
 0x3fd   : > { %v2827_v0 = vpop.f32.mrf.mxu1  ;;  %3088 = vmatmul.bf16.gmra.mxu0 %v6410_v21  ;;  %v3050_v43 = vadd.f32 %v3049_v50, %v6400_v54 }
 0x3fe   : > { %v6545_v13 = vpop.f32.mrf.mxu3  ;;  %v2828_v36 = vadd.f32 %v2827_v0, %v6434_v47 }
 0x3ff   : > { %v3114_v3 = vmax.f32 %v3050_v43, 0.0 }
 0x403   : > { %v2916_v57 = vpop.f32.mrf.mxu2 }
 0x404   : > { %v2917_v4 = vadd.f32 %v2916_v57, %v2828_v36  ;;  %v3051_v11 = vpop.f32.mrf.mxu0 }
 0x405   : > { %v6557_v37 = vpop.f32.mrf.mxu1  ;;  %v3052_v62 = vadd.f32 %v3051_v11, %v2963_v25 }
 0x406   : > { %v3005_v5 = vpop.f32.mrf.mxu3 }
 0x407   : > { %v6559_v47 = vadd.f32 %v3005_v5, %v2917_v4  ;;  %v3115_v59 = vmax.f32 %v3052_v62, 0.0  ;;  %v1577_v62 = vld [vmem:[#allocation2 + $0x19a] sm:$0xff] }
 0x409   : > { %v6567_v21 = vpack.c.bf16 %v3115_v59, %v3114_v3  ;;  %v1578_v3 = vld [vmem:[#allocation2 + $0x1a2] sm:$0xff] }
 0x40a   : > { %v1722_v33 = vpack.c.bf16 %v1578_v3, %v1577_v62 }
 0x40b   : > { %v6563_v14 = vpop.f32.mrf.mxu2  ;;  %3387 = vmatmul.bf16.gmra.mxu1 %v6567_v21  ;;  %3476 = vmatmul.bf16.gmra.mxu2 %v6567_v21 }
 0x40c   : > { %3565 = vmatmul.bf16.gmra.mxu3 %v6567_v21  ;;  %v3054_v54 = vpop.f32.mrf.mxu0 }
 0x40d   : > { %v2832_v16 = vpop.f32.mrf.mxu1  ;;  %3093 = vmatmul.bf16.gmra.mxu0 %v6430_v22  ;;  %v3055_v4 = vadd.f32 %v3054_v54, %v6420_v15 }
 0x40e   : > { %v6565_v0 = vpop.f32.mrf.mxu3  ;;  %v2833_v36 = vadd.f32 %v2832_v16, %v6450_v41  ;;  %v2968_v41 = vadd.f32 %v6427_v49, %v2879_v18  ;;  %v2795_v49 = vadd.f32 %v6437_v10, %v6314_v7  ;;  %v2800_v10 = vadd.f32 %v6453_v46, %v6331_v51 }
 0x40f   : > { %v3116_v43 = vmax.f32 %v3055_v4, 0.0 }
 0x410   : > { %v2884_v15 = vadd.f32 %v6444_v32, %v2795_v49  ;;  %v2889_v32 = vadd.f32 %v6460_v40, %v2800_v10 }
 0x412   : > { %v2973_v22 = vadd.f32 %v6446_v8, %v2884_v15  ;;  %v6605_v8 = vld [vmem:[%s7143_s6] sm:$0xf]  ;;  %v2978_v18 = vadd.f32 %v6462_v12, %v2889_v32 }
 0x413   : > { %v2921_v50 = vpop.f32.mrf.mxu2  ;;  %v6610_v4 = vperm.slane %v6605_v8, 0  ;;  %v6627_v3 = vperm.slane %v6605_v8, 2 }
 0x414   : > { %v2922_v48 = vadd.f32 %v2921_v50, %v2833_v36  ;;  %v3056_v5 = vpop.f32.mrf.mxu0 }
 0x415   : > { %v3057_v25 = vadd.f32 %v3056_v5, %v2968_v41 }
 0x416   : > { %v3010_v57 = vpop.f32.mrf.mxu3 }
 0x417   : > { %v6577_v6 = vadd.f32 %v3010_v57, %v2922_v48  ;;  %v3117_v11 = vmax.f32 %v3057_v25, 0.0  ;;  %v3710_v25 = vld [vmem:[%s5578_s15] sm:$0xff] }
 0x419   : > { %v6581_v23 = vpack.c.bf16 %v3117_v11, %v3116_v43  ;;  %v6623_v11 = vperm.slane %v6605_v8, 1 }
 0x41b   : > { %3392 = vmatmul.bf16.gmra.mxu1 %v6581_v23  ;;  %3481 = vmatmul.bf16.gmra.mxu2 %v6581_v23  ;;  %v6612_v51 = vpop.f32.mrf.mxu2 }
 0x41c   : > { %3570 = vmatmul.bf16.gmra.mxu3 %v6581_v23  ;;  %v3059_v60 = vpop.f32.mrf.mxu0 }
 0x41d   : > { %3098 = vmatmul.bf16.gmra.mxu0 %v1722_v33  ;;  %v3060_v59 = vadd.f32 %v3059_v60, %v6439_v56  ;;  %v6600_v56 = vpop.f32.mrf.mxu1  ;;  %v7162_v33 = vld [vmem:[#allocation18_spill] sm:$0xff] }
 0x41e   : > { %v6614_v46 = vpop.f32.mrf.mxu3  ;;  %v2805_v60 = vadd.f32 %v6466_v58, %v7162_v33 }
 0x41f   : > { %v3118_v54 = vmax.f32 %v3060_v59, 0.0 }
 0x420   : > { %v2894_v59 = vadd.f32 %v6472_v38, %v2805_v60 }
 0x424   : > { %v3061_v16 = vpop.f32.mrf.mxu0 }
 0x425   : > { %v3062_v36 = vadd.f32 %v3061_v16, %v2973_v22  ;;  %v3711_v22 = vld [vmem:[%s5578_s15 + $0x8] sm:$0xff] }
 0x427   : > { %v3119_v19 = vmax.f32 %v3062_v36, 0.0 }
 0x429   : > { %v6591_v50 = vpack.c.bf16 %v3119_v19, %v3118_v54  ;;  %v3712_v54 = vld [vmem:[%s5578_s15 + $0x10] sm:$0xff] }
 0x42b   : > { %3397 = vmatmul.bf16.gmra.mxu1 %v6591_v50  ;;  %3486 = vmatmul.bf16.gmra.mxu2 %v6591_v50 }
 0x42c   : > { %3575 = vmatmul.bf16.gmra.mxu3 %v6591_v50  ;;  %v3064_v7 = vpop.f32.mrf.mxu0 }
 0x42d   : > { %3629 = vmatmul.bf16.vlgmr.msra.gmra.mxu0 %v6476_v26  ;;  %v3065_v48 = vadd.f32 %v3064_v7, %v6455_v29  ;;  %v3714_v7 = vld [vmem:[%s5578_s15 + $0x20] sm:$0xff] }
 0x42f   : > { %v3120_v40 = vmax.f32 %v3065_v48, 0.0 }
 0x434   : > { %v3066_v57 = vpop.f32.mrf.mxu0 }
 0x435   : > { %v3067_v41 = vadd.f32 %v3066_v57, %v2978_v18  ;;  %v2983_v18 = vadd.f32 %v6474_v28, %v2894_v59 }
 0x437   : > { %v3121_v26 = vmax.f32 %v3067_v41, 0.0 }
 0x438   : > { %v3363_v5 = vpop.f32.mrf.mxu1 }
 0x439   : > { %v6617_v43 = vpack.c.bf16 %v3121_v26, %v3120_v40  ;;  %v3364_v12 = vadd.f32 %v3363_v5, %v6610_v4 }
 0x43b   : > { %v3838_v29 = vadd.f32 %v3710_v25, %v3364_v12  ;;  %3402 = vmatmul.bf16.gmra.mxu1 %v6617_v43  ;;  %3491 = vmatmul.bf16.gmra.mxu2 %v6617_v43  ;;  %v3715_v12 = vld [vmem:[%s5578_s15 + $0x28] sm:$0xff] }
 0x43c   : > { %3580 = vmatmul.bf16.gmra.mxu3 %v6617_v43  ;;  %v3069_v62 = vpop.f32.mrf.mxu0 }
 0x43d   : > { %v3966_v49 = vmax.f32 %v3838_v29, 0.0  ;;  %3634 = vmatmul.bf16.gmra.mxu0 %v6493_v30  ;;  %v3070_v48 = vadd.f32 %v3069_v62, %v6468_v17 }
 0x43e   : > { %v3452_v15 = vpop.f32.mrf.mxu2 }
 0x43f   : > { %4094 = vst [vmem:[%s6635_s16] sm:$0xff] %v3966_v49  ;;  %v3453_v16 = vadd.f32 %v3452_v15, %v6623_v11  ;;  %v3541_v36 = vpop.f32.mrf.mxu3  ;;  %v3122_v29 = vmax.f32 %v3070_v48, 0.0  ;;  %v3716_v49 = vld [vmem:[%s5578_s15 + $0x30] sm:$0xff]  ;;  %v3718_v15 = vld [vmem:[%s5578_s15 + $0x40] sm:$0xff]  ;;  %v3719_v48 = vld [vmem:[%s5578_s15 + $0x48] sm:$0xff] }
 0x440   : > { %v3542_v58 = vadd.f32 %v3541_v36, %v6627_v3  ;;  %v3365_v19 = vpop.f32.mrf.mxu1 }
 0x441   : > { %v3839_v10 = vadd.f32 %v3711_v22, %v3453_v16  ;;  %v3366_v38 = vadd.f32 %v3365_v19, %v6610_v4 }
 0x442   : > { %v3840_v32 = vadd.f32 %v3712_v54, %v3542_v58 }
 0x443   : > { %v3967_v57 = vmax.f32 %v3839_v10, 0.0  ;;  %v3842_v41 = vadd.f32 %v3714_v7, %v3366_v38  ;;  %v7163_v10 = vld [vmem:[#allocation19_spill] sm:$0xff] }
 0x444   : > { %v3968_v40 = vmax.f32 %v3840_v32, 0.0  ;;  %v3071_v30 = vpop.f32.mrf.mxu0  ;;  %v2810_v38 = vadd.f32 %v6483_v2, %v7163_v10  ;;  %v3722_v2 = vld [vmem:[%s5578_s15 + $0x60] sm:$0xff] }
 0x445   : > { %4095 = vst [vmem:[%s6635_s16 + $0x8] sm:$0xff] %v3967_v57  ;;  %v3970_v26 = vmax.f32 %v3842_v41, 0.0  ;;  %v3072_v5 = vadd.f32 %v3071_v30, %v2983_v18  ;;  %v3720_v30 = vld [vmem:[%s5578_s15 + $0x50] sm:$0xff] }
 0x446   : > { %4096 = vst [vmem:[%s6635_s16 + $0x10] sm:$0xff] %v3968_v40  ;;  %v3454_v25 = vpop.f32.mrf.mxu2  ;;  %v2899_v57 = vadd.f32 %v6489_v35, %v2810_v38 }
 0x447   : > { %4098 = vst [vmem:[%s6635_s16 + $0x20] sm:$0xff] %v3970_v26  ;;  %v3123_v33 = vmax.f32 %v3072_v5, 0.0  ;;  %v3455_v60 = vadd.f32 %v3454_v25, %v6623_v11  ;;  %v3543_v28 = vpop.f32.mrf.mxu3 }
 0x448   : > { %v3544_v17 = vadd.f32 %v3543_v28, %v6627_v3  ;;  %v3368_v62 = vpop.f32.mrf.mxu1  ;;  %v2988_v35 = vadd.f32 %v6491_v31, %v2899_v57 }
 0x449   : > { %v6654_v22 = vpack.c.bf16 %v3123_v33, %v3122_v29  ;;  %v3843_v59 = vadd.f32 %v3715_v12, %v3455_v60  ;;  %v3369_v16 = vadd.f32 %v3368_v62, %v6610_v4 }
 0x44a   : > { %v3844_v36 = vadd.f32 %v3716_v49, %v3544_v17 }
 0x44b   : > { %v3971_v54 = vmax.f32 %v3843_v59, 0.0  ;;  %v3846_v58 = vadd.f32 %v3718_v15, %v3369_v16  ;;  %3407 = vmatmul.bf16.gmra.mxu1 %v6654_v22  ;;  %3496 = vmatmul.bf16.gmra.mxu2 %v6654_v22  ;;  %v3723_v59 = vld [vmem:[%s5578_s15 + $0x68] sm:$0xff] }
 0x44c   : > { %v3972_v19 = vmax.f32 %v3844_v36, 0.0  ;;  %3585 = vmatmul.bf16.gmra.mxu3 %v6654_v22  ;;  %v3074_v7 = vpop.f32.mrf.mxu0 }
 0x44d   : > { %4099 = vst [vmem:[%s6635_s16 + $0x28] sm:$0xff] %v3971_v54  ;;  %v3974_v32 = vmax.f32 %v3846_v58, 0.0  ;;  %3639 = vmatmul.bf16.gmra.mxu0 %v6510_v20  ;;  %v3075_v33 = vadd.f32 %v3074_v7, %v6485_v39  ;;  %v3724_v58 = vld [vmem:[%s5578_s15 + $0x70] sm:$0xff]  ;;  %v3726_v7 = vld [vmem:[%s5578_s15 + $0x80] sm:$0xff] }
 0x44e   : > { %4100 = vst [vmem:[%s6635_s16 + $0x30] sm:$0xff] %v3972_v19  ;;  %v3457_v18 = vpop.f32.mrf.mxu2 }
 0x44f   : > { %4102 = vst [vmem:[%s6635_s16 + $0x40] sm:$0xff] %v3974_v32  ;;  %v3458_v41 = vadd.f32 %v3457_v18, %v6623_v11  ;;  %v3546_v40 = vpop.f32.mrf.mxu3  ;;  %v3124_v16 = vmax.f32 %v3075_v33, 0.0  ;;  %v3728_v33 = vld [vmem:[%s5578_s15 + $0x90] sm:$0xff] }
 0x450   : > { %v3547_v26 = vadd.f32 %v3546_v40, %v6627_v3  ;;  %v3370_v5 = vpop.f32.mrf.mxu1 }
 0x451   : > { %v3847_v25 = vadd.f32 %v3719_v48, %v3458_v41  ;;  %v3371_v12 = vadd.f32 %v3370_v5, %v6610_v4 }
 0x452   : > { %v3848_v29 = vadd.f32 %v3720_v30, %v3547_v26  ;;  %v7164_v30 = vld [vmem:[#allocation20_spill] sm:$0xff] }
 0x453   : > { %v3975_v60 = vmax.f32 %v3847_v25, 0.0  ;;  %v3850_v28 = vadd.f32 %v3722_v2, %v3371_v12  ;;  %v2815_v26 = vadd.f32 %v6500_v34, %v7164_v30  ;;  %v3727_v25 = vld [vmem:[%s5578_s15 + $0x88] sm:$0xff]  ;;  %v3730_v34 = vld [vmem:[%s5578_s15 + $0xa0] sm:$0xff] }
 0x454   : > { %v3976_v49 = vmax.f32 %v3848_v29, 0.0  ;;  %v3076_v20 = vpop.f32.mrf.mxu0 }
 0x455   : > { %4103 = vst [vmem:[%s6635_s16 + $0x48] sm:$0xff] %v3975_v60  ;;  %v3978_v17 = vmax.f32 %v3850_v28, 0.0  ;;  %v3077_v62 = vadd.f32 %v3076_v20, %v2988_v35  ;;  %v2904_v12 = vadd.f32 %v6506_v44, %v2815_v26 }
 0x456   : > { %4104 = vst [vmem:[%s6635_s16 + $0x50] sm:$0xff] %v3976_v49  ;;  %v3459_v15 = vpop.f32.mrf.mxu2 }
 0x457   : > { %4106 = vst [vmem:[%s6635_s16 + $0x60] sm:$0xff] %v3978_v17  ;;  %v3125_v36 = vmax.f32 %v3077_v62, 0.0  ;;  %v3460_v54 = vadd.f32 %v3459_v15, %v6623_v11  ;;  %v3548_v31 = vpop.f32.mrf.mxu3  ;;  %v2993_v44 = vadd.f32 %v6508_v27, %v2904_v12 }
 0x458   : > { %v3549_v39 = vadd.f32 %v3548_v31, %v6627_v3  ;;  %v3373_v19 = vpop.f32.mrf.mxu1 }
 0x459   : > { %v6683_v10 = vpack.c.bf16 %v3125_v36, %v3124_v16  ;;  %v3851_v38 = vadd.f32 %v3723_v59, %v3460_v54  ;;  %v3374_v32 = vadd.f32 %v3373_v19, %v6610_v4 }
 0x45a   : > { %v3852_v18 = vadd.f32 %v3724_v58, %v3549_v39  ;;  %v3731_v58 = vld [vmem:[%s5578_s15 + $0xa8] sm:$0xff] }
 0x45b   : > { %v3979_v48 = vmax.f32 %v3851_v38, 0.0  ;;  %v3854_v57 = vadd.f32 %v3726_v7, %v3374_v32  ;;  %3412 = vmatmul.bf16.gmra.mxu1 %v6683_v10  ;;  %3501 = vmatmul.bf16.gmra.mxu2 %v6683_v10  ;;  %v3732_v38 = vld [vmem:[%s5578_s15 + $0xb0] sm:$0xff] }
 0x45c   : > { %v3980_v41 = vmax.f32 %v3852_v18, 0.0  ;;  %3590 = vmatmul.bf16.gmra.mxu3 %v6683_v10  ;;  %v3079_v40 = vpop.f32.mrf.mxu0  ;;  %v3734_v18 = vld [vmem:[%s5578_s15 + $0xc0] sm:$0xff] }
 0x45d   : > { %4107 = vst [vmem:[%s6635_s16 + $0x68] sm:$0xff] %v3979_v48  ;;  %v3982_v5 = vmax.f32 %v3854_v57, 0.0  ;;  %3644 = vmatmul.bf16.gmra.mxu0 %v6527_v55  ;;  %v3080_v62 = vadd.f32 %v3079_v40, %v6502_v24 }
 0x45e   : > { %4108 = vst [vmem:[%s6635_s16 + $0x70] sm:$0xff] %v3980_v41  ;;  %v3462_v2 = vpop.f32.mrf.mxu2 }
 0x45f   : > { %4110 = vst [vmem:[%s6635_s16 + $0x80] sm:$0xff] %v3982_v5  ;;  %v3463_v29 = vadd.f32 %v3462_v2, %v6623_v11  ;;  %v3551_v35 = vpop.f32.mrf.mxu3  ;;  %v3126_v39 = vmax.f32 %v3080_v62, 0.0 }
 0x460   : > { %v3552_v60 = vadd.f32 %v3551_v35, %v6627_v3  ;;  %v3375_v28 = vpop.f32.mrf.mxu1 }
 0x461   : > { %v3855_v49 = vadd.f32 %v3727_v25, %v3463_v29  ;;  %v3376_v20 = vadd.f32 %v3375_v28, %v6610_v4  ;;  %v7165_v25 = vld [vmem:[#allocation21_spill] sm:$0xff] }
 0x462   : > { %v3856_v17 = vadd.f32 %v3728_v33, %v3552_v60  ;;  %v2820_v12 = vadd.f32 %v6517_v61, %v7165_v25  ;;  %v3735_v33 = vld [vmem:[%s5578_s15 + $0xc8] sm:$0xff]  ;;  %v3738_v61 = vld [vmem:[%s5578_s15 + $0xe0] sm:$0xff] }
 0x463   : > { %v3983_v15 = vmax.f32 %v3855_v49, 0.0  ;;  %v3858_v59 = vadd.f32 %v3730_v34, %v3376_v20  ;;  %v3736_v49 = vld [vmem:[%s5578_s15 + $0xd0] sm:$0xff] }
 0x464   : > { %v3984_v16 = vmax.f32 %v3856_v17, 0.0  ;;  %v3081_v55 = vpop.f32.mrf.mxu0  ;;  %v2909_v60 = vadd.f32 %v6523_v42, %v2820_v12  ;;  %v7166_v25 = vld [vmem:[#allocation22_spill] sm:$0xff] }
 0x465   : > { %4111 = vst [vmem:[%s6635_s16 + $0x88] sm:$0xff] %v3983_v15  ;;  %v3986_v36 = vmax.f32 %v3858_v59, 0.0  ;;  %v3082_v54 = vadd.f32 %v3081_v55, %v2993_v44  ;;  %v2825_v12 = vadd.f32 %v6537_v1, %v7166_v25  ;;  %v3746_v1 = vld [vmem:[%s5578_s15 + $0x120] sm:$0xff]  ;;  %v3751_v25 = vld [vmem:[%s5578_s15 + $0x148] sm:$0xff] }
 0x466   : > { %4112 = vst [vmem:[%s6635_s16 + $0x90] sm:$0xff] %v3984_v16  ;;  %v3464_v31 = vpop.f32.mrf.mxu2  ;;  %v2998_v42 = vadd.f32 %v6525_v63, %v2909_v60 }
 0x467   : > { %4114 = vst [vmem:[%s6635_s16 + $0xa0] sm:$0xff] %v3986_v36  ;;  %v3127_v19 = vmax.f32 %v3082_v54, 0.0  ;;  %v3465_v7 = vadd.f32 %v3464_v31, %v6623_v11  ;;  %v3553_v27 = vpop.f32.mrf.mxu3  ;;  %v2914_v60 = vadd.f32 %v6543_v53, %v2825_v12 }
 0x468   : > { %v3554_v24 = vadd.f32 %v3553_v27, %v6627_v3  ;;  %v3378_v32 = vpop.f32.mrf.mxu1 }
 0x469   : > { %v6712_v48 = vpack.c.bf16 %v3127_v19, %v3126_v39  ;;  %v3859_v57 = vadd.f32 %v3731_v58, %v3465_v7  ;;  %v3379_v41 = vadd.f32 %v3378_v32, %v6610_v4  ;;  %v3739_v39 = vld [vmem:[%s5578_s15 + $0xe8] sm:$0xff]  ;;  %v3742_v32 = vld [vmem:[%s5578_s15 + $0x100] sm:$0xff]  ;;  %v3003_v53 = vadd.f32 %v6545_v13, %v2914_v60 }
 0x46a   : > { %v3860_v40 = vadd.f32 %v3732_v38, %v3554_v24  ;;  %v3740_v38 = vld [vmem:[%s5578_s15 + $0xf0] sm:$0xff] }
 0x46b   : > { %v3987_v30 = vmax.f32 %v3859_v57, 0.0  ;;  %v3862_v26 = vadd.f32 %v3734_v18, %v3379_v41  ;;  %3417 = vmatmul.bf16.gmra.mxu1 %v6712_v48  ;;  %3506 = vmatmul.bf16.gmra.mxu2 %v6712_v48 }
 0x46c   : > { %v3988_v5 = vmax.f32 %v3860_v40, 0.0  ;;  %3595 = vmatmul.bf16.gmra.mxu3 %v6712_v48  ;;  %v3084_v2 = vpop.f32.mrf.mxu0 }
 0x46d   : > { %4115 = vst [vmem:[%s6635_s16 + $0xa8] sm:$0xff] %v3987_v30  ;;  %v3990_v29 = vmax.f32 %v3862_v26, 0.0  ;;  %3649 = vmatmul.bf16.gmra.mxu0 %v6547_v52  ;;  %v3085_v59 = vadd.f32 %v3084_v2, %v6519_v9 }
 0x46e   : > { %4116 = vst [vmem:[%s6635_s16 + $0xb0] sm:$0xff] %v3988_v5  ;;  %v3467_v35 = vpop.f32.mrf.mxu2 }
 0x46f   : > { %4118 = vst [vmem:[%s6635_s16 + $0xc0] sm:$0xff] %v3990_v29  ;;  %v3468_v28 = vadd.f32 %v3467_v35, %v6623_v11  ;;  %v3556_v34 = vpop.f32.mrf.mxu3  ;;  %v3128_v19 = vmax.f32 %v3085_v59, 0.0 }
 0x470   : > { %v3557_v20 = vadd.f32 %v3556_v34, %v6627_v3  ;;  %v3380_v17 = vpop.f32.mrf.mxu1 }
 0x471   : > { %v3863_v44 = vadd.f32 %v3735_v33, %v3468_v28  ;;  %v3381_v62 = vadd.f32 %v3380_v17, %v6610_v4  ;;  %v3743_v33 = vld [vmem:[%s5578_s15 + $0x108] sm:$0xff] }
 0x472   : > { %v3864_v15 = vadd.f32 %v3736_v49, %v3557_v20  ;;  %v3744_v49 = vld [vmem:[%s5578_s15 + $0x110] sm:$0xff] }
 0x473   : > { %v3991_v16 = vmax.f32 %v3863_v44, 0.0  ;;  %v3866_v55 = vadd.f32 %v3738_v61, %v3381_v62 }
 0x474   : > { %v3992_v36 = vmax.f32 %v3864_v15, 0.0  ;;  %v3086_v52 = vpop.f32.mrf.mxu0 }
 0x475   : > { %4119 = vst [vmem:[%s6635_s16 + $0xc8] sm:$0xff] %v3991_v16  ;;  %v3994_v54 = vmax.f32 %v3866_v55, 0.0  ;;  %v3087_v31 = vadd.f32 %v3086_v52, %v2998_v42 }
 0x476   : > { %4120 = vst [vmem:[%s6635_s16 + $0xd0] sm:$0xff] %v3992_v36  ;;  %v3469_v58 = vpop.f32.mrf.mxu2 }
 0x477   : > { %4122 = vst [vmem:[%s6635_s16 + $0xe0] sm:$0xff] %v3994_v54  ;;  %v3129_v7 = vmax.f32 %v3087_v31, 0.0  ;;  %v3470_v27 = vadd.f32 %v3469_v58, %v6623_v11  ;;  %v3558_v63 = vpop.f32.mrf.mxu3  ;;  %v3747_v54 = vld [vmem:[%s5578_s15 + $0x128] sm:$0xff] }
 0x478   : > { %v3559_v9 = vadd.f32 %v3558_v63, %v6627_v3  ;;  %v3383_v24 = vpop.f32.mrf.mxu1 }
 0x479   : > { %v6741_v18 = vpack.c.bf16 %v3129_v7, %v3128_v19  ;;  %v3867_v57 = vadd.f32 %v3739_v39, %v3470_v27  ;;  %v3384_v41 = vadd.f32 %v3383_v24, %v6610_v4  ;;  %v3748_v19 = vld [vmem:[%s5578_s15 + $0x130] sm:$0xff]  ;;  %v3750_v27 = vld [vmem:[%s5578_s15 + $0x140] sm:$0xff] }
 0x47a   : > { %v3868_v40 = vadd.f32 %v3740_v38, %v3559_v9 }
 0x47b   : > { %v3995_v30 = vmax.f32 %v3867_v57, 0.0  ;;  %v3870_v26 = vadd.f32 %v3742_v32, %v3384_v41  ;;  %3422 = vmatmul.bf16.gmra.mxu1 %v6741_v18  ;;  %3511 = vmatmul.bf16.gmra.mxu2 %v6741_v18 }
 0x47c   : > { %v3996_v5 = vmax.f32 %v3868_v40, 0.0  ;;  %3600 = vmatmul.bf16.gmra.mxu3 %v6741_v18  ;;  %v3089_v2 = vpop.f32.mrf.mxu0 }
 0x47d   : > { %4123 = vst [vmem:[%s6635_s16 + $0xe8] sm:$0xff] %v3995_v30  ;;  %v3998_v29 = vmax.f32 %v3870_v26, 0.0  ;;  %3654 = vmatmul.bf16.gmra.mxu0 %v6567_v21  ;;  %v3090_v15 = vadd.f32 %v3089_v2, %v6539_v45  ;;  %v7167_v30 = vld [vmem:[#allocation23_spill] sm:$0xff] }
 0x47e   : > { %4124 = vst [vmem:[%s6635_s16 + $0xf0] sm:$0xff] %v3996_v5  ;;  %v3472_v35 = vpop.f32.mrf.mxu2  ;;  %v2830_v26 = vadd.f32 %v6557_v37, %v7167_v30  ;;  %v3754_v37 = vld [vmem:[%s5578_s15 + $0x160] sm:$0xff]  ;;  %v3760_v30 = vld [vmem:[%s5578_s15 + $0x190] sm:$0xff] }
 0x47f   : > { %4126 = vst [vmem:[%s6635_s16 + $0x100] sm:$0xff] %v3998_v29  ;;  %v3473_v28 = vadd.f32 %v3472_v35, %v6623_v11  ;;  %v3561_v34 = vpop.f32.mrf.mxu3  ;;  %v3130_v31 = vmax.f32 %v3090_v15, 0.0 }
 0x480   : > { %v3562_v20 = vadd.f32 %v3561_v34, %v6627_v3  ;;  %v3385_v17 = vpop.f32.mrf.mxu1  ;;  %v2919_v12 = vadd.f32 %v6563_v14, %v2830_v26 }
 0x481   : > { %v3871_v61 = vadd.f32 %v3743_v33, %v3473_v28  ;;  %v3386_v44 = vadd.f32 %v3385_v17, %v6610_v4  ;;  %v3752_v33 = vld [vmem:[%s5578_s15 + $0x150] sm:$0xff] }
 0x482   : > { %v3872_v62 = vadd.f32 %v3744_v49, %v3562_v20  ;;  %v3008_v14 = vadd.f32 %v6565_v0, %v2919_v12 }
 0x483   : > { %v3999_v42 = vmax.f32 %v3871_v61, 0.0  ;;  %v3874_v59 = vadd.f32 %v3746_v1, %v3386_v44 }
 0x484   : > { %v4000_v16 = vmax.f32 %v3872_v62, 0.0  ;;  %v3091_v21 = vpop.f32.mrf.mxu0 }
 0x485   : > { %4127 = vst [vmem:[%s6635_s16 + $0x108] sm:$0xff] %v3999_v42  ;;  %v4002_v55 = vmax.f32 %v3874_v59, 0.0  ;;  %v3092_v36 = vadd.f32 %v3091_v21, %v3003_v53  ;;  %v3755_v42 = vld [vmem:[%s5578_s15 + $0x168] sm:$0xff] }
 0x486   : > { %4128 = vst [vmem:[%s6635_s16 + $0x110] sm:$0xff] %v4000_v16  ;;  %v3474_v52 = vpop.f32.mrf.mxu2 }
 0x487   : > { %4130 = vst [vmem:[%s6635_s16 + $0x120] sm:$0xff] %v4002_v55  ;;  %v3131_v58 = vmax.f32 %v3092_v36, 0.0  ;;  %v3475_v39 = vadd.f32 %v3474_v52, %v6623_v11  ;;  %v3563_v13 = vpop.f32.mrf.mxu3  ;;  %v3756_v55 = vld [vmem:[%s5578_s15 + $0x170] sm:$0xff]  ;;  %v3758_v52 = vld [vmem:[%s5578_s15 + $0x180] sm:$0xff] }
 0x488   : > { %v3564_v45 = vadd.f32 %v3563_v13, %v6627_v3  ;;  %v3388_v7 = vpop.f32.mrf.mxu1 }
 0x489   : > { %v6770_v63 = vpack.c.bf16 %v3131_v58, %v3130_v31  ;;  %v3875_v38 = vadd.f32 %v3747_v54, %v3475_v39  ;;  %v3389_v9 = vadd.f32 %v3388_v7, %v6610_v4 }
 0x48a   : > { %v3876_v24 = vadd.f32 %v3748_v19, %v3564_v45 }
 0x48b   : > { %v4003_v32 = vmax.f32 %v3875_v38, 0.0  ;;  %v3878_v57 = vadd.f32 %v3750_v27, %v3389_v9  ;;  %3427 = vmatmul.bf16.gmra.mxu1 %v6770_v63  ;;  %3516 = vmatmul.bf16.gmra.mxu2 %v6770_v63  ;;  %v7168_v27 = vld [vmem:[#allocation24_spill] sm:$0xff] }
 0x48c   : > { %v4004_v41 = vmax.f32 %v3876_v24, 0.0  ;;  %3605 = vmatmul.bf16.gmra.mxu3 %v6770_v63  ;;  %v3094_v40 = vpop.f32.mrf.mxu0  ;;  %v2835_v38 = vadd.f32 %v6600_v56, %v7168_v27  ;;  %v3762_v56 = vld [vmem:[%s5578_s15 + $0x1a0] sm:$0xff] }
 0x48d   : > { %4131 = vst [vmem:[%s6635_s16 + $0x128] sm:$0xff] %v4003_v32  ;;  %v4006_v5 = vmax.f32 %v3878_v57, 0.0  ;;  %3659 = vmatmul.bf16.gmra.mxu0 %v6581_v23  ;;  %v3095_v17 = vadd.f32 %v3094_v40, %v6559_v47  ;;  %v3759_v32 = vld [vmem:[%s5578_s15 + $0x188] sm:$0xff] }
 0x48e   : > { %4132 = vst [vmem:[%s6635_s16 + $0x130] sm:$0xff] %v4004_v41  ;;  %v3477_v2 = vpop.f32.mrf.mxu2  ;;  %v2924_v57 = vadd.f32 %v6612_v51, %v2835_v38 }
 0x48f   : > { %4134 = vst [vmem:[%s6635_s16 + $0x140] sm:$0xff] %v4006_v5  ;;  %v3478_v29 = vadd.f32 %v3477_v2, %v6623_v11  ;;  %v3566_v35 = vpop.f32.mrf.mxu3  ;;  %v3132_v59 = vmax.f32 %v3095_v17, 0.0 }
 0x490   : > { %v3567_v60 = vadd.f32 %v3566_v35, %v6627_v3  ;;  %v3390_v28 = vpop.f32.mrf.mxu1  ;;  %v3013_v51 = vadd.f32 %v6614_v46, %v2924_v57 }
 0x491   : > { %v3879_v34 = vadd.f32 %v3751_v25, %v3478_v29  ;;  %v3391_v49 = vadd.f32 %v3390_v28, %v6610_v4 }
 0x492   : > { %v3880_v20 = vadd.f32 %v3752_v33, %v3567_v60 }
 0x493   : > { %v4007_v1 = vmax.f32 %v3879_v34, 0.0  ;;  %v3882_v61 = vadd.f32 %v3754_v37, %v3391_v49  ;;  %v3763_v49 = vld [vmem:[%s5578_s15 + $0x1a8] sm:$0xff] }
 0x494   : > { %v4008_v44 = vmax.f32 %v3880_v20, 0.0  ;;  %v3096_v23 = vpop.f32.mrf.mxu0 }
 0x495   : > { %4135 = vst [vmem:[%s6635_s16 + $0x148] sm:$0xff] %v4007_v1  ;;  %v4010_v62 = vmax.f32 %v3882_v61, 0.0  ;;  %v3097_v53 = vadd.f32 %v3096_v23, %v3008_v14  ;;  %v3764_v1 = vld [vmem:[%s5578_s15 + $0x1b0] sm:$0xff] }
 0x496   : > { %4136 = vst [vmem:[%s6635_s16 + $0x150] sm:$0xff] %v4008_v44  ;;  %v3479_v15 = vpop.f32.mrf.mxu2  ;;  %v3766_v44 = vld [vmem:[%s5578_s15 + $0x1c0] sm:$0xff] }
 0x497   : > { %4138 = vst [vmem:[%s6635_s16 + $0x160] sm:$0xff] %v4010_v62  ;;  %v3133_v16 = vmax.f32 %v3097_v53, 0.0  ;;  %v3480_v21 = vadd.f32 %v3479_v15, %v6623_v11  ;;  %v3568_v0 = vpop.f32.mrf.mxu3  ;;  %v6832_v15 = vperm.slane %v6605_v8, 3 }
 0x498   : > { %v3569_v47 = vadd.f32 %v3568_v0, %v6627_v3  ;;  %v3393_v36 = vpop.f32.mrf.mxu1 }
 0x499   : > { %v6799_v54 = vpack.c.bf16 %v3133_v16, %v3132_v59  ;;  %v3883_v31 = vadd.f32 %v3755_v42, %v3480_v21  ;;  %v3394_v58 = vadd.f32 %v3393_v36, %v6610_v4 }
 0x49a   : > { %v3884_v39 = vadd.f32 %v3756_v55, %v3569_v47  ;;  %v3713_v55 = vld [vmem:[%s5578_s15 + $0x18] sm:$0xff] }
 0x49b   : > { %v4011_v13 = vmax.f32 %v3883_v31, 0.0  ;;  %v3886_v19 = vadd.f32 %v3758_v52, %v3394_v58  ;;  %3432 = vmatmul.bf16.gmra.mxu1 %v6799_v54  ;;  %3521 = vmatmul.bf16.gmra.mxu2 %v6799_v54  ;;  %v3767_v52 = vld [vmem:[%s5578_s15 + $0x1c8] sm:$0xff] }
 0x49c   : > { %v4012_v45 = vmax.f32 %v3884_v39, 0.0  ;;  %3610 = vmatmul.bf16.gmra.mxu3 %v6799_v54  ;;  %v3099_v7 = vpop.f32.mrf.mxu0 }
 0x49d   : > { %4139 = vst [vmem:[%s6635_s16 + $0x168] sm:$0xff] %v4011_v13  ;;  %v4014_v9 = vmax.f32 %v3886_v19, 0.0  ;;  %3664 = vmatmul.bf16.gmra.mxu0 %v6591_v50  ;;  %v3100_v29 = vadd.f32 %v3099_v7, %v6577_v6  ;;  %v3768_v13 = vld [vmem:[%s5578_s15 + $0x1d0] sm:$0xff]  ;;  %v3770_v7 = vld [vmem:[%s5578_s15 + $0x1e0] sm:$0xff] }
 0x49e   : > { %4140 = vst [vmem:[%s6635_s16 + $0x170] sm:$0xff] %v4012_v45  ;;  %v3482_v24 = vpop.f32.mrf.mxu2 }
 0x49f   : > { %4142 = vst [vmem:[%s6635_s16 + $0x180] sm:$0xff] %v4014_v9  ;;  %v3483_v41 = vadd.f32 %v3482_v24, %v6623_v11  ;;  %v3571_v40 = vpop.f32.mrf.mxu3  ;;  %v3134_v20 = vmax.f32 %v3100_v29, 0.0 }
 0x4a0   : > { %v3572_v26 = vadd.f32 %v3571_v40, %v6627_v3  ;;  %v3395_v5 = vpop.f32.mrf.mxu1 }
 0x4a1   : > { %v3887_v2 = vadd.f32 %v3759_v32, %v3483_v41  ;;  %v3396_v25 = vadd.f32 %v3395_v5, %v6610_v4 }
 0x4a2   : > { %v3888_v12 = vadd.f32 %v3760_v30, %v3572_v26 }
 0x4a3   : > { %v4015_v35 = vmax.f32 %v3887_v2, 0.0  ;;  %v3890_v33 = vadd.f32 %v3762_v56, %v3396_v25  ;;  %v3771_v56 = vld [vmem:[%s5578_s15 + $0x1e8] sm:$0xff] }
 0x4a4   : > { %v4016_v60 = vmax.f32 %v3888_v12, 0.0  ;;  %v3101_v50 = vpop.f32.mrf.mxu0 }
 0x4a5   : > { %4143 = vst [vmem:[%s6635_s16 + $0x188] sm:$0xff] %v4015_v35  ;;  %v4018_v28 = vmax.f32 %v3890_v33, 0.0  ;;  %v3102_v37 = vadd.f32 %v3101_v50, %v3013_v51  ;;  %v3772_v51 = vld [vmem:[%s5578_s15 + $0x1f0] sm:$0xff]  ;;  %v3774_v33 = vld [vmem:[%s5578_s15 + $0x200] sm:$0xff] }
 0x4a6   : > { %4144 = vst [vmem:[%s6635_s16 + $0x190] sm:$0xff] %v4016_v60  ;;  %v3484_v34 = vpop.f32.mrf.mxu2 }
 0x4a7   : > { %4146 = vst [vmem:[%s6635_s16 + $0x1a0] sm:$0xff] %v4018_v28  ;;  %v3135_v14 = vmax.f32 %v3102_v37, 0.0  ;;  %v3485_v17 = vadd.f32 %v3484_v34, %v6623_v11  ;;  %v3573_v46 = vpop.f32.mrf.mxu3 }
 0x4a8   : > { %v3574_v6 = vadd.f32 %v3573_v46, %v6627_v3  ;;  %v3398_v61 = vpop.f32.mrf.mxu1 }
 0x4a9   : > { %v6828_v23 = vpack.c.bf16 %v3135_v14, %v3134_v20  ;;  %v3891_v62 = vadd.f32 %v3763_v49, %v3485_v17  ;;  %v3399_v53 = vadd.f32 %v3398_v61, %v6610_v4  ;;  %v3721_v17 = vld [vmem:[%s5578_s15 + $0x58] sm:$0xff]  ;;  %v3775_v61 = vld [vmem:[%s5578_s15 + $0x208] sm:$0xff] }
 0x4aa   : > { %v3892_v42 = vadd.f32 %v3764_v1, %v3574_v6 }
 0x4ab   : > { %v4019_v59 = vmax.f32 %v3891_v62, 0.0  ;;  %v3894_v16 = vadd.f32 %v3766_v44, %v3399_v53  ;;  %3437 = vmatmul.bf16.gmra.mxu1 %v6828_v23  ;;  %3526 = vmatmul.bf16.gmra.mxu2 %v6828_v23 }
 0x4ac   : > { %v4020_v21 = vmax.f32 %v3892_v42, 0.0  ;;  %3615 = vmatmul.bf16.gmra.mxu3 %v6828_v23  ;;  %v3630_v0 = vpop.f32.mrf.mxu0  ;;  %v3776_v42 = vld [vmem:[%s5578_s15 + $0x210] sm:$0xff] }
 0x4ad   : > { %4147 = vst [vmem:[%s6635_s16 + $0x1a8] sm:$0xff] %v4019_v59  ;;  %v4022_v47 = vmax.f32 %v3894_v16, 0.0  ;;  %v3631_v8 = vadd.f32 %v3630_v0, %v6832_v15  ;;  %3669 = vmatmul.bf16.gmra.mxu0 %v6617_v43  ;;  %v3717_v43 = vld [vmem:[%s5578_s15 + $0x38] sm:$0xff] }
 0x4ae   : > { %4148 = vst [vmem:[%s6635_s16 + $0x1b0] sm:$0xff] %v4020_v21  ;;  %v3487_v36 = vpop.f32.mrf.mxu2  ;;  %v3778_v21 = vld [vmem:[%s5578_s15 + $0x220] sm:$0xff] }
 0x4af   : > { %4150 = vst [vmem:[%s6635_s16 + $0x1c0] sm:$0xff] %v4022_v47  ;;  %v3841_v31 = vadd.f32 %v3713_v55, %v3631_v8  ;;  %v3488_v58 = vadd.f32 %v3487_v36, %v6623_v11  ;;  %v3576_v39 = vpop.f32.mrf.mxu3 }
 0x4b0   : > { %v3577_v19 = vadd.f32 %v3576_v39, %v6627_v3  ;;  %v3400_v45 = vpop.f32.mrf.mxu1 }
 0x4b1   : > { %v3969_v27 = vmax.f32 %v3841_v31, 0.0  ;;  %v3895_v38 = vadd.f32 %v3767_v52, %v3488_v58  ;;  %v3401_v9 = vadd.f32 %v3400_v45, %v6610_v4  ;;  %v3779_v45 = vld [vmem:[%s5578_s15 + $0x228] sm:$0xff] }
 0x4b2   : > { %v3896_v24 = vadd.f32 %v3768_v13, %v3577_v19 }
 0x4b3   : > { %4097 = vst [vmem:[%s6635_s16 + $0x18] sm:$0xff] %v3969_v27  ;;  %v4023_v32 = vmax.f32 %v3895_v38, 0.0  ;;  %v3898_v57 = vadd.f32 %v3770_v7, %v3401_v9  ;;  %v3780_v9 = vld [vmem:[%s5578_s15 + $0x230] sm:$0xff] }
 0x4b4   : > { %v4024_v41 = vmax.f32 %v3896_v24, 0.0  ;;  %v3632_v40 = vpop.f32.mrf.mxu0 }
 0x4b5   : > { %4151 = vst [vmem:[%s6635_s16 + $0x1c8] sm:$0xff] %v4023_v32  ;;  %v4026_v30 = vmax.f32 %v3898_v57, 0.0  ;;  %v3633_v26 = vadd.f32 %v3632_v40, %v6832_v15  ;;  %v3782_v57 = vld [vmem:[%s5578_s15 + $0x240] sm:$0xff] }
 0x4b6   : > { %4152 = vst [vmem:[%s6635_s16 + $0x1d0] sm:$0xff] %v4024_v41  ;;  %v3489_v5 = vpop.f32.mrf.mxu2 }
 0x4b7   : > { %4154 = vst [vmem:[%s6635_s16 + $0x1e0] sm:$0xff] %v4026_v30  ;;  %v3845_v2 = vadd.f32 %v3717_v43, %v3633_v26  ;;  %v3490_v25 = vadd.f32 %v3489_v5, %v6623_v11  ;;  %v3578_v12 = vpop.f32.mrf.mxu3 }
 0x4b8   : > { %v3579_v29 = vadd.f32 %v3578_v12, %v6627_v3  ;;  %v3403_v35 = vpop.f32.mrf.mxu1 }
 0x4b9   : > { %v3973_v60 = vmax.f32 %v3845_v2, 0.0  ;;  %v3899_v50 = vadd.f32 %v3771_v56, %v3490_v25  ;;  %v3404_v28 = vadd.f32 %v3403_v35, %v6610_v4  ;;  %v3729_v25 = vld [vmem:[%s5578_s15 + $0x98] sm:$0xff]  ;;  %v3783_v35 = vld [vmem:[%s5578_s15 + $0x248] sm:$0xff] }
 0x4ba   : > { %v3900_v37 = vadd.f32 %v3772_v51, %v3579_v29 }
 0x4bb   : > { %4101 = vst [vmem:[%s6635_s16 + $0x38] sm:$0xff] %v3973_v60  ;;  %v4027_v34 = vmax.f32 %v3899_v50, 0.0  ;;  %v3902_v49 = vadd.f32 %v3774_v33, %v3404_v28  ;;  %v3784_v28 = vld [vmem:[%s5578_s15 + $0x250] sm:$0xff] }
 0x4bc   : > { %v4028_v20 = vmax.f32 %v3900_v37, 0.0  ;;  %v3635_v14 = vpop.f32.mrf.mxu0 }
 0x4bd   : > { %4155 = vst [vmem:[%s6635_s16 + $0x1e8] sm:$0xff] %v4027_v34  ;;  %v4030_v46 = vmax.f32 %v3902_v49, 0.0  ;;  %v3636_v1 = vadd.f32 %v3635_v14, %v6832_v15  ;;  %3674 = vmatmul.bf16.gmra.mxu0 %v6654_v22  ;;  %v3725_v22 = vld [vmem:[%s5578_s15 + $0x78] sm:$0xff]  ;;  %v3786_v49 = vld [vmem:[%s5578_s15 + $0x260] sm:$0xff] }
 0x4be   : > { %4156 = vst [vmem:[%s6635_s16 + $0x1f0] sm:$0xff] %v4028_v20  ;;  %v3492_v6 = vpop.f32.mrf.mxu2 }
 0x4bf   : > { %4158 = vst [vmem:[%s6635_s16 + $0x200] sm:$0xff] %v4030_v46  ;;  %v3849_v44 = vadd.f32 %v3721_v17, %v3636_v1  ;;  %v3493_v62 = vadd.f32 %v3492_v6, %v6623_v11  ;;  %v3581_v53 = vpop.f32.mrf.mxu3 }
 0x4c0   : > { %v3582_v59 = vadd.f32 %v3581_v53, %v6627_v3  ;;  %v3405_v16 = vpop.f32.mrf.mxu1 }
 0x4c1   : > { %v3977_v0 = vmax.f32 %v3849_v44, 0.0  ;;  %v3903_v55 = vadd.f32 %v3775_v61, %v3493_v62  ;;  %v3406_v47 = vadd.f32 %v3405_v16, %v6610_v4 }
 0x4c2   : > { %v3904_v8 = vadd.f32 %v3776_v42, %v3582_v59  ;;  %v3787_v59 = vld [vmem:[%s5578_s15 + $0x268] sm:$0xff] }
 0x4c3   : > { %4105 = vst [vmem:[%s6635_s16 + $0x58] sm:$0xff] %v3977_v0  ;;  %v4031_v36 = vmax.f32 %v3903_v55, 0.0  ;;  %v3906_v52 = vadd.f32 %v3778_v21, %v3406_v47  ;;  %v3788_v55 = vld [vmem:[%s5578_s15 + $0x270] sm:$0xff] }
 0x4c4   : > { %v4032_v31 = vmax.f32 %v3904_v8, 0.0  ;;  %v3637_v58 = vpop.f32.mrf.mxu0 }
 0x4c5   : > { %4159 = vst [vmem:[%s6635_s16 + $0x208] sm:$0xff] %v4031_v36  ;;  %v4034_v39 = vmax.f32 %v3906_v52, 0.0  ;;  %v3638_v13 = vadd.f32 %v3637_v58, %v6832_v15  ;;  %v3790_v36 = vld [vmem:[%s5578_s15 + $0x280] sm:$0xff] }
 0x4c6   : > { %4160 = vst [vmem:[%s6635_s16 + $0x210] sm:$0xff] %v4032_v31  ;;  %v3494_v19 = vpop.f32.mrf.mxu2 }
 0x4c7   : > { %4162 = vst [vmem:[%s6635_s16 + $0x220] sm:$0xff] %v4034_v39  ;;  %v3853_v7 = vadd.f32 %v3725_v22, %v3638_v13  ;;  %v3495_v27 = vadd.f32 %v3494_v19, %v6623_v11  ;;  %v3583_v38 = vpop.f32.mrf.mxu3 }
 0x4c8   : > { %v3584_v24 = vadd.f32 %v3583_v38, %v6627_v3  ;;  %v3408_v32 = vpop.f32.mrf.mxu1 }
 0x4c9   : > { %v3981_v41 = vmax.f32 %v3853_v7, 0.0  ;;  %v3907_v40 = vadd.f32 %v3779_v45, %v3495_v27  ;;  %v3409_v43 = vadd.f32 %v3408_v32, %v6610_v4  ;;  %v3737_v7 = vld [vmem:[%s5578_s15 + $0xd8] sm:$0xff] }
 0x4ca   : > { %v3908_v30 = vadd.f32 %v3780_v9, %v3584_v24  ;;  %v3791_v24 = vld [vmem:[%s5578_s15 + $0x288] sm:$0xff] }
 0x4cb   : > { %4109 = vst [vmem:[%s6635_s16 + $0x78] sm:$0xff] %v3981_v41  ;;  %v4035_v26 = vmax.f32 %v3907_v40, 0.0  ;;  %v3910_v5 = vadd.f32 %v3782_v57, %v3409_v43  ;;  %v3792_v40 = vld [vmem:[%s5578_s15 + $0x290] sm:$0xff] }
 0x4cc   : > { %v4036_v56 = vmax.f32 %v3908_v30, 0.0  ;;  %v3640_v2 = vpop.f32.mrf.mxu0 }
 0x4cd   : > { %4163 = vst [vmem:[%s6635_s16 + $0x228] sm:$0xff] %v4035_v26  ;;  %v4038_v12 = vmax.f32 %v3910_v5, 0.0  ;;  %v3641_v51 = vadd.f32 %v3640_v2, %v6832_v15  ;;  %3679 = vmatmul.bf16.gmra.mxu0 %v6683_v10  ;;  %v3733_v10 = vld [vmem:[%s5578_s15 + $0xb8] sm:$0xff]  ;;  %v3794_v26 = vld [vmem:[%s5578_s15 + $0x2a0] sm:$0xff] }
 0x4ce   : > { %4164 = vst [vmem:[%s6635_s16 + $0x230] sm:$0xff] %v4036_v56  ;;  %v3497_v29 = vpop.f32.mrf.mxu2 }
 0x4cf   : > { %4166 = vst [vmem:[%s6635_s16 + $0x240] sm:$0xff] %v4038_v12  ;;  %v3857_v33 = vadd.f32 %v3729_v25, %v3641_v51  ;;  %v3498_v60 = vadd.f32 %v3497_v29, %v6623_v11  ;;  %v3586_v50 = vpop.f32.mrf.mxu3 }
 0x4d0   : > { %v3587_v37 = vadd.f32 %v3586_v50, %v6627_v3  ;;  %v3410_v34 = vpop.f32.mrf.mxu1 }
 0x4d1   : > { %v3985_v20 = vmax.f32 %v3857_v33, 0.0  ;;  %v3911_v14 = vadd.f32 %v3783_v35, %v3498_v60  ;;  %v3411_v17 = vadd.f32 %v3410_v34, %v6610_v4 }
 0x4d2   : > { %v3912_v46 = vadd.f32 %v3784_v28, %v3587_v37  ;;  %v3795_v28 = vld [vmem:[%s5578_s15 + $0x2a8] sm:$0xff] }
 0x4d3   : > { %4113 = vst [vmem:[%s6635_s16 + $0x98] sm:$0xff] %v3985_v20  ;;  %v4039_v1 = vmax.f32 %v3911_v14, 0.0  ;;  %v3914_v6 = vadd.f32 %v3786_v49, %v3411_v17  ;;  %v3796_v20 = vld [vmem:[%s5578_s15 + $0x2b0] sm:$0xff] }
 0x4d4   : > { %v4040_v61 = vmax.f32 %v3912_v46, 0.0  ;;  %v3642_v44 = vpop.f32.mrf.mxu0  ;;  %v3798_v46 = vld [vmem:[%s5578_s15 + $0x2c0] sm:$0xff] }
 0x4d5   : > { %4167 = vst [vmem:[%s6635_s16 + $0x248] sm:$0xff] %v4039_v1  ;;  %v4042_v62 = vmax.f32 %v3914_v6, 0.0  ;;  %v3643_v53 = vadd.f32 %v3642_v44, %v6832_v15 }
 0x4d6   : > { %4168 = vst [vmem:[%s6635_s16 + $0x250] sm:$0xff] %v4040_v61  ;;  %v3499_v42 = vpop.f32.mrf.mxu2 }
 0x4d7   : > { %4170 = vst [vmem:[%s6635_s16 + $0x260] sm:$0xff] %v4042_v62  ;;  %v3861_v16 = vadd.f32 %v3733_v10, %v3643_v53  ;;  %v3500_v21 = vadd.f32 %v3499_v42, %v6623_v11  ;;  %v3588_v0 = vpop.f32.mrf.mxu3 }
 0x4d8   : > { %v3589_v47 = vadd.f32 %v3588_v0, %v6627_v3  ;;  %v3413_v8 = vpop.f32.mrf.mxu1 }
 0x4d9   : > { %v3989_v52 = vmax.f32 %v3861_v16, 0.0  ;;  %v3915_v31 = vadd.f32 %v3787_v59, %v3500_v21  ;;  %v3414_v58 = vadd.f32 %v3413_v8, %v6610_v4  ;;  %v3745_v59 = vld [vmem:[%s5578_s15 + $0x118] sm:$0xff] }
 0x4da   : > { %v3916_v22 = vadd.f32 %v3788_v55, %v3589_v47  ;;  %v3799_v55 = vld [vmem:[%s5578_s15 + $0x2c8] sm:$0xff] }
 0x4db   : > { %4117 = vst [vmem:[%s6635_s16 + $0xb8] sm:$0xff] %v3989_v52  ;;  %v4043_v39 = vmax.f32 %v3915_v31, 0.0  ;;  %v3918_v13 = vadd.f32 %v3790_v36, %v3414_v58  ;;  %v3800_v52 = vld [vmem:[%s5578_s15 + $0x2d0] sm:$0xff] }
 0x4dc   : > { %v4044_v19 = vmax.f32 %v3916_v22, 0.0  ;;  %v3645_v45 = vpop.f32.mrf.mxu0  ;;  %v3802_v22 = vld [vmem:[%s5578_s15 + $0x2e0] sm:$0xff] }
 0x4dd   : > { %4171 = vst [vmem:[%s6635_s16 + $0x268] sm:$0xff] %v4043_v39  ;;  %v4046_v27 = vmax.f32 %v3918_v13, 0.0  ;;  %v3646_v38 = vadd.f32 %v3645_v45, %v6832_v15  ;;  %3684 = vmatmul.bf16.gmra.mxu0 %v6712_v48  ;;  %v3741_v48 = vld [vmem:[%s5578_s15 + $0xf8] sm:$0xff] }
 0x4de   : > { %4172 = vst [vmem:[%s6635_s16 + $0x270] sm:$0xff] %v4044_v19  ;;  %v3502_v9 = vpop.f32.mrf.mxu2 }
 0x4df   : > { %4174 = vst [vmem:[%s6635_s16 + $0x280] sm:$0xff] %v4046_v27  ;;  %v3865_v32 = vadd.f32 %v3737_v7, %v3646_v38  ;;  %v3503_v57 = vadd.f32 %v3502_v9, %v6623_v11  ;;  %v3591_v41 = vpop.f32.mrf.mxu3 }
 0x4e0   : > { %v3592_v43 = vadd.f32 %v3591_v41, %v6627_v3  ;;  %v3415_v30 = vpop.f32.mrf.mxu1  ;;  %v3803_v41 = vld [vmem:[%s5578_s15 + $0x2e8] sm:$0xff] }
 0x4e1   : > { %v3993_v5 = vmax.f32 %v3865_v32, 0.0  ;;  %v3919_v56 = vadd.f32 %v3791_v24, %v3503_v57  ;;  %v3416_v2 = vadd.f32 %v3415_v30, %v6610_v4 }
 0x4e2   : > { %v3920_v25 = vadd.f32 %v3792_v40, %v3592_v43 }
 0x4e3   : > { %4121 = vst [vmem:[%s6635_s16 + $0xd8] sm:$0xff] %v3993_v5  ;;  %v4047_v12 = vmax.f32 %v3919_v56, 0.0  ;;  %v3922_v51 = vadd.f32 %v3794_v26, %v3416_v2  ;;  %v3804_v26 = vld [vmem:[%s5578_s15 + $0x2f0] sm:$0xff]  ;;  %v3806_v2 = vld [vmem:[%s5578_s15 + $0x300] sm:$0xff] }
 0x4e4   : > { %v4048_v29 = vmax.f32 %v3920_v25, 0.0  ;;  %v3647_v35 = vpop.f32.mrf.mxu0 }
 0x4e5   : > { %4175 = vst [vmem:[%s6635_s16 + $0x288] sm:$0xff] %v4047_v12  ;;  %v4050_v33 = vmax.f32 %v3922_v51, 0.0  ;;  %v3648_v60 = vadd.f32 %v3647_v35, %v6832_v15 }
 0x4e6   : > { %4176 = vst [vmem:[%s6635_s16 + $0x290] sm:$0xff] %v4048_v29  ;;  %v3504_v50 = vpop.f32.mrf.mxu2 }
 0x4e7   : > { %4178 = vst [vmem:[%s6635_s16 + $0x2a0] sm:$0xff] %v4050_v33  ;;  %v3869_v37 = vadd.f32 %v3741_v48, %v3648_v60  ;;  %v3505_v34 = vadd.f32 %v3504_v50, %v6623_v11  ;;  %v3593_v49 = vpop.f32.mrf.mxu3  ;;  %v3753_v50 = vld [vmem:[%s5578_s15 + $0x158] sm:$0xff] }
 0x4e8   : > { %v3594_v14 = vadd.f32 %v3593_v49, %v6627_v3  ;;  %v3418_v17 = vpop.f32.mrf.mxu1  ;;  %v3807_v49 = vld [vmem:[%s5578_s15 + $0x308] sm:$0xff] }
 0x4e9   : > { %v3997_v1 = vmax.f32 %v3869_v37, 0.0  ;;  %v3923_v6 = vadd.f32 %v3795_v28, %v3505_v34  ;;  %v3419_v61 = vadd.f32 %v3418_v17, %v6610_v4 }
 0x4ea   : > { %v3924_v44 = vadd.f32 %v3796_v20, %v3594_v14 }
 0x4eb   : > { %4125 = vst [vmem:[%s6635_s16 + $0xf8] sm:$0xff] %v3997_v1  ;;  %v4051_v10 = vmax.f32 %v3923_v6, 0.0  ;;  %v3926_v62 = vadd.f32 %v3798_v46, %v3419_v61  ;;  %v3808_v46 = vld [vmem:[%s5578_s15 + $0x310] sm:$0xff]  ;;  %v3810_v61 = vld [vmem:[%s5578_s15 + $0x320] sm:$0xff] }
 0x4ec   : > { %v4052_v53 = vmax.f32 %v3924_v44, 0.0  ;;  %v3650_v42 = vpop.f32.mrf.mxu0 }
 0x4ed   : > { %4179 = vst [vmem:[%s6635_s16 + $0x2a8] sm:$0xff] %v4051_v10  ;;  %v4054_v16 = vmax.f32 %v3926_v62, 0.0  ;;  %v3651_v21 = vadd.f32 %v3650_v42, %v6832_v15  ;;  %3689 = vmatmul.bf16.gmra.mxu0 %v6741_v18  ;;  %v3749_v18 = vld [vmem:[%s5578_s15 + $0x138] sm:$0xff] }
 0x4ee   : > { %4180 = vst [vmem:[%s6635_s16 + $0x2b0] sm:$0xff] %v4052_v53  ;;  %v3507_v0 = vpop.f32.mrf.mxu2 }
 0x4ef   : > { %4182 = vst [vmem:[%s6635_s16 + $0x2c0] sm:$0xff] %v4054_v16  ;;  %v3873_v47 = vadd.f32 %v3745_v59, %v3651_v21  ;;  %v3508_v8 = vadd.f32 %v3507_v0, %v6623_v11  ;;  %v3596_v36 = vpop.f32.mrf.mxu3 }
 0x4f0   : > { %v3597_v31 = vadd.f32 %v3596_v36, %v6627_v3  ;;  %v3420_v58 = vpop.f32.mrf.mxu1 }
 0x4f1   : > { %v4001_v39 = vmax.f32 %v3873_v47, 0.0  ;;  %v3927_v13 = vadd.f32 %v3799_v55, %v3508_v8  ;;  %v3421_v19 = vadd.f32 %v3420_v58, %v6610_v4  ;;  %v3811_v8 = vld [vmem:[%s5578_s15 + $0x328] sm:$0xff]  ;;  %v3812_v58 = vld [vmem:[%s5578_s15 + $0x330] sm:$0xff] }
 0x4f2   : > { %v3928_v45 = vadd.f32 %v3800_v52, %v3597_v31 }
 0x4f3   : > { %4129 = vst [vmem:[%s6635_s16 + $0x118] sm:$0xff] %v4001_v39  ;;  %v4055_v7 = vmax.f32 %v3927_v13, 0.0  ;;  %v3930_v27 = vadd.f32 %v3802_v22, %v3421_v19  ;;  %v3814_v13 = vld [vmem:[%s5578_s15 + $0x340] sm:$0xff] }
 0x4f4   : > { %v4056_v38 = vmax.f32 %v3928_v45, 0.0  ;;  %v3652_v9 = vpop.f32.mrf.mxu0 }
 0x4f5   : > { %4183 = vst [vmem:[%s6635_s16 + $0x2c8] sm:$0xff] %v4055_v7  ;;  %v4058_v24 = vmax.f32 %v3930_v27, 0.0  ;;  %v3653_v32 = vadd.f32 %v3652_v9, %v6832_v15 }
 0x4f6   : > { %4184 = vst [vmem:[%s6635_s16 + $0x2d0] sm:$0xff] %v4056_v38  ;;  %v3509_v57 = vpop.f32.mrf.mxu2 }
 0x4f7   : > { %4186 = vst [vmem:[%s6635_s16 + $0x2e0] sm:$0xff] %v4058_v24  ;;  %v3877_v40 = vadd.f32 %v3749_v18, %v3653_v32  ;;  %v3510_v43 = vadd.f32 %v3509_v57, %v6623_v11  ;;  %v3598_v30 = vpop.f32.mrf.mxu3  ;;  %v3761_v32 = vld [vmem:[%s5578_s15 + $0x198] sm:$0xff] }
 0x4f8   : > { %v3599_v5 = vadd.f32 %v3598_v30, %v6627_v3  ;;  %v3423_v56 = vpop.f32.mrf.mxu1 }
 0x4f9   : > { %v4005_v25 = vmax.f32 %v3877_v40, 0.0  ;;  %v3931_v12 = vadd.f32 %v3803_v41, %v3510_v43  ;;  %v3424_v51 = vadd.f32 %v3423_v56, %v6610_v4  ;;  %v3815_v43 = vld [vmem:[%s5578_s15 + $0x348] sm:$0xff]  ;;  %v3816_v56 = vld [vmem:[%s5578_s15 + $0x350] sm:$0xff] }
 0x4fa   : > { %v3932_v29 = vadd.f32 %v3804_v26, %v3599_v5 }
 0x4fb   : > { %4133 = vst [vmem:[%s6635_s16 + $0x138] sm:$0xff] %v4005_v25  ;;  %v4059_v35 = vmax.f32 %v3931_v12, 0.0  ;;  %v3934_v48 = vadd.f32 %v3806_v2, %v3424_v51  ;;  %v3818_v12 = vld [vmem:[%s5578_s15 + $0x360] sm:$0xff] }
 0x4fc   : > { %v4060_v33 = vmax.f32 %v3932_v29, 0.0  ;;  %v3655_v60 = vpop.f32.mrf.mxu0 }
 0x4fd   : > { %4187 = vst [vmem:[%s6635_s16 + $0x2e8] sm:$0xff] %v4059_v35  ;;  %v4062_v28 = vmax.f32 %v3934_v48, 0.0  ;;  %v3656_v37 = vadd.f32 %v3655_v60, %v6832_v15  ;;  %3694 = vmatmul.bf16.gmra.mxu0 %v6770_v63  ;;  %v3757_v63 = vld [vmem:[%s5578_s15 + $0x178] sm:$0xff] }
 0x4fe   : > { %4188 = vst [vmem:[%s6635_s16 + $0x2f0] sm:$0xff] %v4060_v33  ;;  %v3512_v34 = vpop.f32.mrf.mxu2 }
 0x4ff   : > { %4190 = vst [vmem:[%s6635_s16 + $0x300] sm:$0xff] %v4062_v28  ;;  %v3881_v20 = vadd.f32 %v3753_v50, %v3656_v37  ;;  %v3513_v14 = vadd.f32 %v3512_v34, %v6623_v11  ;;  %v3601_v17 = vpop.f32.mrf.mxu3 }
 0x500   : > { %v3602_v1 = vadd.f32 %v3601_v17, %v6627_v3  ;;  %v3425_v6 = vpop.f32.mrf.mxu1 }
 0x501   : > { %v4009_v44 = vmax.f32 %v3881_v20, 0.0  ;;  %v3935_v10 = vadd.f32 %v3807_v49, %v3513_v14  ;;  %v3426_v62 = vadd.f32 %v3425_v6, %v6610_v4  ;;  %v3819_v20 = vld [vmem:[%s5578_s15 + $0x368] sm:$0xff] }
 0x502   : > { %v3936_v53 = vadd.f32 %v3808_v46, %v3602_v1  ;;  %v3820_v1 = vld [vmem:[%s5578_s15 + $0x370] sm:$0xff] }
 0x503   : > { %4137 = vst [vmem:[%s6635_s16 + $0x158] sm:$0xff] %v4009_v44  ;;  %v4063_v42 = vmax.f32 %v3935_v10, 0.0  ;;  %v3938_v59 = vadd.f32 %v3810_v61, %v3426_v62  ;;  %v3822_v44 = vld [vmem:[%s5578_s15 + $0x380] sm:$0xff] }
 0x504   : > { %v4064_v16 = vmax.f32 %v3936_v53, 0.0  ;;  %v3657_v21 = vpop.f32.mrf.mxu0 }
 0x505   : > { %4191 = vst [vmem:[%s6635_s16 + $0x308] sm:$0xff] %v4063_v42  ;;  %v4066_v0 = vmax.f32 %v3938_v59, 0.0  ;;  %v3658_v55 = vadd.f32 %v3657_v21, %v6832_v15 }
 0x506   : > { %4192 = vst [vmem:[%s6635_s16 + $0x310] sm:$0xff] %v4064_v16  ;;  %v3514_v47 = vpop.f32.mrf.mxu2 }
 0x507   : > { %4194 = vst [vmem:[%s6635_s16 + $0x320] sm:$0xff] %v4066_v0  ;;  %v3885_v36 = vadd.f32 %v3757_v63, %v3658_v55  ;;  %v3515_v52 = vadd.f32 %v3514_v47, %v6623_v11  ;;  %v3603_v31 = vpop.f32.mrf.mxu3  ;;  %v3769_v0 = vld [vmem:[%s5578_s15 + $0x1d8] sm:$0xff] }
 0x508   : > { %v3604_v22 = vadd.f32 %v3603_v31, %v6627_v3  ;;  %v3428_v39 = vpop.f32.mrf.mxu1 }
 0x509   : > { %v4013_v19 = vmax.f32 %v3885_v36, 0.0  ;;  %v3939_v45 = vadd.f32 %v3811_v8, %v3515_v52  ;;  %v3429_v7 = vadd.f32 %v3428_v39, %v6610_v4  ;;  %v3823_v36 = vld [vmem:[%s5578_s15 + $0x388] sm:$0xff] }
 0x50a   : > { %v3940_v27 = vadd.f32 %v3812_v58, %v3604_v22  ;;  %v3824_v22 = vld [vmem:[%s5578_s15 + $0x390] sm:$0xff] }
 0x50b   : > { %4141 = vst [vmem:[%s6635_s16 + $0x178] sm:$0xff] %v4013_v19  ;;  %v4067_v38 = vmax.f32 %v3939_v45, 0.0  ;;  %v3942_v9 = vadd.f32 %v3814_v13, %v3429_v7  ;;  %v3826_v19 = vld [vmem:[%s5578_s15 + $0x3a0] sm:$0xff] }
 0x50c   : > { %v4068_v18 = vmax.f32 %v3940_v27, 0.0  ;;  %v3660_v24 = vpop.f32.mrf.mxu0 }
 0x50d   : > { %4195 = vst [vmem:[%s6635_s16 + $0x328] sm:$0xff] %v4067_v38  ;;  %v4070_v57 = vmax.f32 %v3942_v9, 0.0  ;;  %v3661_v41 = vadd.f32 %v3660_v24, %v6832_v15  ;;  %3699 = vmatmul.bf16.gmra.mxu0 %v6799_v54  ;;  %v3765_v54 = vld [vmem:[%s5578_s15 + $0x1b8] sm:$0xff] }
 0x50e   : > { %4196 = vst [vmem:[%s6635_s16 + $0x330] sm:$0xff] %v4068_v18  ;;  %v3517_v40 = vpop.f32.mrf.mxu2 }
 0x50f   : > { %4198 = vst [vmem:[%s6635_s16 + $0x340] sm:$0xff] %v4070_v57  ;;  %v3889_v30 = vadd.f32 %v3761_v32, %v3661_v41  ;;  %v3518_v26 = vadd.f32 %v3517_v40, %v6623_v11  ;;  %v3606_v5 = vpop.f32.mrf.mxu3 }
 0x510   : > { %v3607_v2 = vadd.f32 %v3606_v5, %v6627_v3  ;;  %v3430_v25 = vpop.f32.mrf.mxu1 }
 0x511   : > { %v4017_v51 = vmax.f32 %v3889_v30, 0.0  ;;  %v3943_v29 = vadd.f32 %v3815_v43, %v3518_v26  ;;  %v3431_v35 = vadd.f32 %v3430_v25, %v6610_v4  ;;  %v3827_v43 = vld [vmem:[%s5578_s15 + $0x3a8] sm:$0xff] }
 0x512   : > { %v3944_v48 = vadd.f32 %v3816_v56, %v3607_v2  ;;  %v3828_v56 = vld [vmem:[%s5578_s15 + $0x3b0] sm:$0xff] }
 0x513   : > { %4145 = vst [vmem:[%s6635_s16 + $0x198] sm:$0xff] %v4017_v51  ;;  %v4071_v33 = vmax.f32 %v3943_v29, 0.0  ;;  %v3946_v60 = vadd.f32 %v3818_v12, %v3431_v35  ;;  %v3830_v12 = vld [vmem:[%s5578_s15 + $0x3c0] sm:$0xff] }
 0x514   : > { %v4072_v50 = vmax.f32 %v3944_v48, 0.0  ;;  %v3662_v28 = vpop.f32.mrf.mxu0 }
 0x515   : > { %4199 = vst [vmem:[%s6635_s16 + $0x348] sm:$0xff] %v4071_v33  ;;  %v4074_v37 = vmax.f32 %v3946_v60, 0.0  ;;  %v3663_v34 = vadd.f32 %v3662_v28, %v6832_v15 }
 0x516   : > { %4200 = vst [vmem:[%s6635_s16 + $0x350] sm:$0xff] %v4072_v50  ;;  %v3519_v49 = vpop.f32.mrf.mxu2 }
 0x517   : > { %4202 = vst [vmem:[%s6635_s16 + $0x360] sm:$0xff] %v4074_v37  ;;  %v3893_v14 = vadd.f32 %v3765_v54, %v3663_v34  ;;  %v3520_v17 = vadd.f32 %v3519_v49, %v6623_v11  ;;  %v3608_v46 = vpop.f32.mrf.mxu3  ;;  %v3777_v54 = vld [vmem:[%s5578_s15 + $0x218] sm:$0xff] }
 0x518   : > { %v3609_v6 = vadd.f32 %v3608_v46, %v6627_v3  ;;  %v3433_v61 = vpop.f32.mrf.mxu1 }
 0x519   : > { %v4021_v10 = vmax.f32 %v3893_v14, 0.0  ;;  %v3947_v62 = vadd.f32 %v3819_v20, %v3520_v17  ;;  %v3434_v53 = vadd.f32 %v3433_v61, %v6610_v4  ;;  %v3831_v20 = vld [vmem:[%s5578_s15 + $0x3c8] sm:$0xff] }
 0x51a   : > { %v3948_v42 = vadd.f32 %v3820_v1, %v3609_v6  ;;  %v3832_v1 = vld [vmem:[%s5578_s15 + $0x3d0] sm:$0xff] }
 0x51b   : > { %4149 = vst [vmem:[%s6635_s16 + $0x1b8] sm:$0xff] %v4021_v10  ;;  %v4075_v59 = vmax.f32 %v3947_v62, 0.0  ;;  %v3950_v16 = vadd.f32 %v3822_v44, %v3434_v53  ;;  %v3834_v44 = vld [vmem:[%s5578_s15 + $0x3e0] sm:$0xff] }
 0x51c   : > { %v4076_v21 = vmax.f32 %v3948_v42, 0.0  ;;  %v3665_v63 = vpop.f32.mrf.mxu0 }
 0x51d   : > { %4203 = vst [vmem:[%s6635_s16 + $0x368] sm:$0xff] %v4075_v59  ;;  %v4078_v55 = vmax.f32 %v3950_v16, 0.0  ;;  %v3666_v47 = vadd.f32 %v3665_v63, %v6832_v15  ;;  %3704 = vmatmul.bf16.gmra.mxu0 %v6828_v23  ;;  %v3773_v23 = vld [vmem:[%s5578_s15 + $0x1f8] sm:$0xff] }
 0x51e   : > { %4204 = vst [vmem:[%s6635_s16 + $0x370] sm:$0xff] %v4076_v21  ;;  %v3522_v8 = vpop.f32.mrf.mxu2 }
 0x51f   : > { %4206 = vst [vmem:[%s6635_s16 + $0x380] sm:$0xff] %v4078_v55  ;;  %v3897_v52 = vadd.f32 %v3769_v0, %v3666_v47  ;;  %v3523_v31 = vadd.f32 %v3522_v8, %v6623_v11  ;;  %v3611_v58 = vpop.f32.mrf.mxu3  ;;  %v3781_v0 = vld [vmem:[%s5578_s15 + $0x238] sm:$0xff] }
 0x520   : > { %v3612_v39 = vadd.f32 %v3611_v58, %v6627_v3  ;;  %v3435_v13 = vpop.f32.mrf.mxu1  ;;  %v3836_v58 = vld [vmem:[%s5578_s15 + $0x3f0] sm:$0xff] }
 0x521   : > { %v4025_v45 = vmax.f32 %v3897_v52, 0.0  ;;  %v3951_v7 = vadd.f32 %v3823_v36, %v3523_v31  ;;  %v3436_v27 = vadd.f32 %v3435_v13, %v6610_v4  ;;  %v3835_v36 = vld [vmem:[%s5578_s15 + $0x3e8] sm:$0xff] }
 0x522   : > { %v3952_v38 = vadd.f32 %v3824_v22, %v3612_v39 }
 0x523   : > { %4153 = vst [vmem:[%s6635_s16 + $0x1d8] sm:$0xff] %v4025_v45  ;;  %v4079_v9 = vmax.f32 %v3951_v7, 0.0  ;;  %v3954_v18 = vadd.f32 %v3826_v19, %v3436_v27 }
 0x524   : > { %v4080_v24 = vmax.f32 %v3952_v38, 0.0  ;;  %v3667_v32 = vpop.f32.mrf.mxu0  ;;  %v3785_v38 = vld [vmem:[%s5578_s15 + $0x258] sm:$0xff] }
 0x525   : > { %4207 = vst [vmem:[%s6635_s16 + $0x388] sm:$0xff] %v4079_v9  ;;  %v4082_v57 = vmax.f32 %v3954_v18, 0.0  ;;  %v3668_v41 = vadd.f32 %v3667_v32, %v6832_v15 }
 0x526   : > { %4208 = vst [vmem:[%s6635_s16 + $0x390] sm:$0xff] %v4080_v24  ;;  %v3524_v40 = vpop.f32.mrf.mxu2  ;;  %v3789_v24 = vld [vmem:[%s5578_s15 + $0x278] sm:$0xff] }
 0x527   : > { %4210 = vst [vmem:[%s6635_s16 + $0x3a0] sm:$0xff] %v4082_v57  ;;  %v3901_v30 = vadd.f32 %v3773_v23, %v3668_v41  ;;  %v3525_v26 = vadd.f32 %v3524_v40, %v6623_v11  ;;  %v3613_v5 = vpop.f32.mrf.mxu3  ;;  %v3793_v40 = vld [vmem:[%s5578_s15 + $0x298] sm:$0xff] }
 0x528   : > { %v3614_v2 = vadd.f32 %v3613_v5, %v6627_v3  ;;  %v3438_v25 = vpop.f32.mrf.mxu1 }
 0x529   : > { %v4029_v51 = vmax.f32 %v3901_v30, 0.0  ;;  %v3955_v29 = vadd.f32 %v3827_v43, %v3525_v26  ;;  %v3439_v35 = vadd.f32 %v3438_v25, %v6610_v4 }
 0x52a   : > { %v3956_v48 = vadd.f32 %v3828_v56, %v3614_v2  ;;  %v3797_v56 = vld [vmem:[%s5578_s15 + $0x2b8] sm:$0xff] }
 0x52b   : > { %4157 = vst [vmem:[%s6635_s16 + $0x1f8] sm:$0xff] %v4029_v51  ;;  %v4083_v33 = vmax.f32 %v3955_v29, 0.0  ;;  %v3958_v60 = vadd.f32 %v3830_v12, %v3439_v35  ;;  %v3801_v29 = vld [vmem:[%s5578_s15 + $0x2d8] sm:$0xff] }
 0x52c   : > { %v4084_v50 = vmax.f32 %v3956_v48, 0.0  ;;  %v3670_v28 = vpop.f32.mrf.mxu0 }
 0x52d   : > { %4211 = vst [vmem:[%s6635_s16 + $0x3a8] sm:$0xff] %v4083_v33  ;;  %v4086_v37 = vmax.f32 %v3958_v60, 0.0  ;;  %v3671_v34 = vadd.f32 %v3670_v28, %v6832_v15 }
 0x52e   : > { %4212 = vst [vmem:[%s6635_s16 + $0x3b0] sm:$0xff] %v4084_v50  ;;  %v3527_v49 = vpop.f32.mrf.mxu2  ;;  %v3805_v50 = vld [vmem:[%s5578_s15 + $0x2f8] sm:$0xff] }
 0x52f   : > { %4214 = vst [vmem:[%s6635_s16 + $0x3c0] sm:$0xff] %v4086_v37  ;;  %v3905_v14 = vadd.f32 %v3777_v54, %v3671_v34  ;;  %v3528_v17 = vadd.f32 %v3527_v49, %v6623_v11  ;;  %v3616_v46 = vpop.f32.mrf.mxu3  ;;  %v3809_v49 = vld [vmem:[%s5578_s15 + $0x318] sm:$0xff] }
 0x530   : > { %v3617_v6 = vadd.f32 %v3616_v46, %v6627_v3  ;;  %v3440_v61 = vpop.f32.mrf.mxu1 }
 0x531   : > { %v4033_v10 = vmax.f32 %v3905_v14, 0.0  ;;  %v3959_v62 = vadd.f32 %v3831_v20, %v3528_v17  ;;  %v3441_v53 = vadd.f32 %v3440_v61, %v6610_v4 }
 0x532   : > { %v3960_v42 = vadd.f32 %v3832_v1, %v3617_v6  ;;  %v3813_v1 = vld [vmem:[%s5578_s15 + $0x338] sm:$0xff] }
 0x533   : > { %4161 = vst [vmem:[%s6635_s16 + $0x218] sm:$0xff] %v4033_v10  ;;  %v4087_v59 = vmax.f32 %v3959_v62, 0.0  ;;  %v3962_v16 = vadd.f32 %v3834_v44, %v3441_v53  ;;  %v3817_v62 = vld [vmem:[%s5578_s15 + $0x358] sm:$0xff] }
 0x534   : > { %v4088_v21 = vmax.f32 %v3960_v42, 0.0  ;;  %v3672_v63 = vpop.f32.mrf.mxu0 }
 0x535   : > { %4215 = vst [vmem:[%s6635_s16 + $0x3c8] sm:$0xff] %v4087_v59  ;;  %v4090_v55 = vmax.f32 %v3962_v16, 0.0  ;;  %v3673_v47 = vadd.f32 %v3672_v63, %v6832_v15 }
 0x536   : > { %4216 = vst [vmem:[%s6635_s16 + $0x3d0] sm:$0xff] %v4088_v21  ;;  %v3529_v8 = vpop.f32.mrf.mxu2  ;;  %v3821_v21 = vld [vmem:[%s5578_s15 + $0x378] sm:$0xff] }
 0x537   : > { %4218 = vst [vmem:[%s6635_s16 + $0x3e0] sm:$0xff] %v4090_v55  ;;  %v3909_v4 = vadd.f32 %v3781_v0, %v3673_v47  ;;  %v3530_v52 = vadd.f32 %v3529_v8, %v6623_v11  ;;  %v3618_v31 = vpop.f32.mrf.mxu3  ;;  %v3825_v8 = vld [vmem:[%s5578_s15 + $0x398] sm:$0xff] }
 0x538   : > { %v3619_v22 = vadd.f32 %v3618_v31, %v6627_v3 }
 0x539   : > { %v4037_v39 = vmax.f32 %v3909_v4, 0.0  ;;  %v3963_v13 = vadd.f32 %v3835_v36, %v3530_v52 }
 0x53a   : > { %v3964_v19 = vadd.f32 %v3836_v58, %v3619_v22  ;;  %v3829_v58 = vld [vmem:[%s5578_s15 + $0x3b8] sm:$0xff] }
 0x53b   : > { %4165 = vst [vmem:[%s6635_s16 + $0x238] sm:$0xff] %v4037_v39  ;;  %v4091_v45 = vmax.f32 %v3963_v13, 0.0 }
 0x53c   : > { %v4092_v7 = vmax.f32 %v3964_v19, 0.0  ;;  %v3675_v27 = vpop.f32.mrf.mxu0 }
 0x53d   : > { %4219 = vst [vmem:[%s6635_s16 + $0x3e8] sm:$0xff] %v4091_v45  ;;  %v3676_v9 = vadd.f32 %v3675_v27, %v6832_v15  ;;  %v3833_v45 = vld [vmem:[%s5578_s15 + $0x3d8] sm:$0xff] }
 0x53e   : > { %4220 = vst [vmem:[%s6635_s16 + $0x3f0] sm:$0xff] %v4092_v7 }
 0x53f   : > { %v3913_v11 = vadd.f32 %v3785_v38, %v3676_v9 }
 0x541   : > { %v4041_v18 = vmax.f32 %v3913_v11, 0.0  ;;  %v3837_v11 = vld [vmem:[%s5578_s15 + $0x3f8] sm:$0xff]  ;;  %s5348_s15 = scalar_lea.hbm %s7144_s7, 2048 }
 0x542   : > { %p5350_p9 = scmp.lt.s32.totalorder %s5348_s15, %s5344_s12 }
 0x543   : > { %4169 = vst [vmem:[%s6635_s16 + $0x258] sm:$0xff] %v4041_v18 }
 0x544   : > { %v3677_v3 = vpop.f32.mrf.mxu0  ;;  %p5351_p2 = por %p5350_p9, %p5349_p11 }
 0x545   : > { %v3678_v32 = vadd.f32 %v3677_v3, %v6832_v15 }
 0x546   : > { %p5352_p10 = pnand %p5351_p2, %p5347_p8 }
 0x547   : > { %v3917_v23 = vadd.f32 %v3789_v24, %v3678_v32 }
 0x549   : > { %v4045_v57 = vmax.f32 %v3917_v23, 0.0 }
 0x54b   : > { %4173 = vst [vmem:[%s6635_s16 + $0x278] sm:$0xff] %v4045_v57 }
 0x54c   : > { %v3680_v41 = vpop.f32.mrf.mxu0 }
 0x54d   : > { %v3681_v43 = vadd.f32 %v3680_v41, %v6832_v15 }
 0x54f   : > { %v3921_v30 = vadd.f32 %v3793_v40, %v3681_v43 }
 0x551   : > { %v4049_v26 = vmax.f32 %v3921_v30, 0.0 }
 0x553   : > { %4177 = vst [vmem:[%s6635_s16 + $0x298] sm:$0xff] %v4049_v26 }
 0x554   : > { %v3682_v5 = vpop.f32.mrf.mxu0 }
 0x555   : > { %v3683_v2 = vadd.f32 %v3682_v5, %v6832_v15 }
 0x557   : > { %v3925_v25 = vadd.f32 %v3797_v56, %v3683_v2 }
 0x559   : > { %v4053_v12 = vmax.f32 %v3925_v25, 0.0 }
 0x55b   : > { %4181 = vst [vmem:[%s6635_s16 + $0x2b8] sm:$0xff] %v4053_v12 }
 0x55c   : > { %v3685_v51 = vpop.f32.mrf.mxu0 }
 0x55d   : > { %v3686_v35 = vadd.f32 %v3685_v51, %v6832_v15 }
 0x55f   : > { %v3929_v48 = vadd.f32 %v3801_v29, %v3686_v35 }
 0x561   : > { %v4057_v33 = vmax.f32 %v3929_v48, 0.0 }
 0x563   : > { %4185 = vst [vmem:[%s6635_s16 + $0x2d8] sm:$0xff] %v4057_v33 }
 0x564   : > { %v3687_v60 = vpop.f32.mrf.mxu0 }
 0x565   : > { %v3688_v28 = vadd.f32 %v3687_v60, %v6832_v15 }
 0x567   : > { %v3933_v54 = vadd.f32 %v3805_v50, %v3688_v28 }
 0x569   : > { %v4061_v37 = vmax.f32 %v3933_v54, 0.0 }
 0x56b   : > { %4189 = vst [vmem:[%s6635_s16 + $0x2f8] sm:$0xff] %v4061_v37 }
 0x56c   : > { %v3690_v34 = vpop.f32.mrf.mxu0 }
 0x56d   : > { %v3691_v20 = vadd.f32 %v3690_v34, %v6832_v15 }
 0x56f   : > { %v3937_v14 = vadd.f32 %v3809_v49, %v3691_v20 }
 0x571   : > { %v4065_v17 = vmax.f32 %v3937_v14, 0.0 }
 0x573   : > { %4193 = vst [vmem:[%s6635_s16 + $0x318] sm:$0xff] %v4065_v17 }
 0x574   : > { %v3692_v46 = vpop.f32.mrf.mxu0 }
 0x575   : > { %v3693_v6 = vadd.f32 %v3692_v46, %v6832_v15 }
 0x577   : > { %v3941_v61 = vadd.f32 %v3813_v1, %v3693_v6 }
 0x579   : > { %v4069_v44 = vmax.f32 %v3941_v61, 0.0 }
 0x57b   : > { %4197 = vst [vmem:[%s6635_s16 + $0x338] sm:$0xff] %v4069_v44 }
 0x57c   : > { %v3695_v10 = vpop.f32.mrf.mxu0 }
 0x57d   : > { %v3696_v53 = vadd.f32 %v3695_v10, %v6832_v15 }
 0x57f   : > { %v3945_v42 = vadd.f32 %v3817_v62, %v3696_v53 }
 0x581   : > { %v4073_v59 = vmax.f32 %v3945_v42, 0.0 }
 0x583   : > { %4201 = vst [vmem:[%s6635_s16 + $0x358] sm:$0xff] %v4073_v59 }
 0x584   : > { %v3697_v16 = vpop.f32.mrf.mxu0 }
 0x585   : > { %v3698_v63 = vadd.f32 %v3697_v16, %v6832_v15 }
 0x587   : > { %v3949_v0 = vadd.f32 %v3821_v21, %v3698_v63 }
 0x589   : > { %v4077_v55 = vmax.f32 %v3949_v0, 0.0 }
 0x58b   : > { %4205 = vst [vmem:[%s6635_s16 + $0x378] sm:$0xff] %v4077_v55 }
 0x58c   : > { %v3700_v47 = vpop.f32.mrf.mxu0 }
 0x58d   : > { %v3701_v36 = vadd.f32 %v3700_v47, %v6832_v15 }
 0x58f   : > { %v3953_v4 = vadd.f32 %v3825_v8, %v3701_v36 }
 0x591   : > { %v4081_v52 = vmax.f32 %v3953_v4, 0.0 }
 0x593   : > { %4209 = vst [vmem:[%s6635_s16 + $0x398] sm:$0xff] %v4081_v52 }
 0x594   : > { %v3702_v31 = vpop.f32.mrf.mxu0 }
 0x595   : > { %v3703_v22 = vadd.f32 %v3702_v31, %v6832_v15 }
 0x597   : > { %v3957_v39 = vadd.f32 %v3829_v58, %v3703_v22 }
 0x599   : > { %v4085_v13 = vmax.f32 %v3957_v39, 0.0 }
 0x59b   : > { %4213 = vst [vmem:[%s6635_s16 + $0x3b8] sm:$0xff] %v4085_v13 }
 0x59c   : > { %v3705_v19 = vpop.f32.mrf.mxu0 }
 0x59d   : > { %v3706_v7 = vadd.f32 %v3705_v19, %v6832_v15 }
 0x59f   : > { %v3961_v27 = vadd.f32 %v3833_v45, %v3706_v7 }
 0x5a1   : > { %v4089_v38 = vmax.f32 %v3961_v27, 0.0 }
 0x5a3   : > { %4217 = vst [vmem:[%s6635_s16 + $0x3d8] sm:$0xff] %v4089_v38 }
 0x5a4   : > { %v3707_v9 = vpop.f32.mrf.mxu0 }
 0x5a5   : > { %v3708_v18 = vadd.f32 %v3707_v9, %v6832_v15 }
 0x5a7   : > { %v3965_v3 = vadd.f32 %v3837_v11, %v3708_v18 }
 0x5a9   : > { %v4093_v24 = vmax.f32 %v3965_v3, 0.0 }
 0x5ab   : > { %4221 = vst [vmem:[%s6635_s16 + $0x3f8] sm:$0xff] %v4093_v24 }
 0x5ac   : > { %5355 = shalt.err (!%p5352_p10)
}
 0x5ad   : > { %s5416_s9 = smov 512   ;;  %s5417_s16 = smov 32  }
 0x5ae   : > { %5095 = dma.vmem_to_hbm [thread:$0]  (%p5545_p5), %s4236_s10, 16384, %s4238_s1, %s4223_s30, %s5416_s9, %s5416_s9, %s5417_s16  }
 0x5af PF: > { %s4252_s11 = sand.u32 1, %s5390_s24   ;;  %p7169_p12 = scmp.ge.s32.totalorder %s5402_s27, 2 }
 0x5b0   : > { %s4253_s14 = scalar_lea.sflag [#allocation5], %s4252_s11 }
 0x5b1   : > { %p5115_p13 = pnand %p7169_p12, %p5493_p6 }
 0x5b3   : > { %p5116_p0 = pneg %p5115_p13 }
 0x5b5   : > { %5385 = dma.done.wait (%p5116_p0), %s4253_s14, 16384  }
 0x5b6   : > { %5387 = vsyncadd (%p5116_p0), %s4253_s14, 4294950912  ;;  %p22_p3 = scmp.ge.s32.totalorder %s5532_s23, 4   ;;  %s7170_s24 = smov %s5394_s25 }
 0x5b7   : > { %s7171_s25 = smov %s5398_s26  ;;  %s7172_s26 = smov %s5541_s13 }
 0x5b8   : > { %s7173_s27 = smov %s5532_s23  ;;  %24 = sbr.rel (!%p22_p3) target bundleno = 9 (0x9), region = 111 }
 0x5bd   :  { %4259 = vsyncpa [#allocation4], 1 }
 0x5be   :  { %4261 = vsyncpa [#allocation4 + $0x1], 1 }
 0x5bf   :  { %4262 = vsyncpa [#allocation7], 1 }
 0x5c0   :  { %4263 = vsyncpa [#allocation10], 1 }
 0x5c1   :  { %4264 = vsyncpa [#allocation5], 1 }
 0x5c2   :  { %4266 = vsyncpa [#allocation5 + $0x1], 1 }

</bundles_post_ra>
